<compile_context>
chip_gen: v7x
topology: tpu7x:2x2x1
jax: 0.10.0
libtpu: 0.0.40
codegen_flags: <defaults>
</compile_context>

<pallas_src>
import functools
import math

import jax
import jax.numpy as jnp
import numpy as np
from jax import lax
from jax.experimental import pallas as pl
from jax.experimental.pallas import tpu as pltpu


def _cmi_kernel(pan_ref, ms_ref, panw_ref, panb_ref, msw_ref, msb_ref,
                blkw_ref, blkb_ref, ms_out_ref, pan_out_ref,
                qpan_ref, qms_ref, vstack_ref, vout_ref,
                ssp_ref, ssm_ref, mxp_ref, mxm_ref,
                *, C, HW, tile_q, nqt):
    eps_l2 = 1e-6      # L2Norm epsilon (torch)
    eps_mm = 1e-5      # MutualMatching epsilon (torch)

    pan = pan_ref[...]        # (C, HW)
    ms = ms_ref[...]          # (C, HW)

    # ---- stacked K/Q/V projections: one (3C,C)@(C,HW) matmul per modality ----
    # fused 1x1 conv + folded (inference) BN + ReLU + residual (self.extra == id)
    yp = jnp.maximum(
        jnp.dot(panw_ref[...], pan, preferred_element_type=jnp.float32)
        + panb_ref[...], 0.0)                       # (3C, HW) -> [K; Q; V]
    ym = jnp.maximum(
        jnp.dot(msw_ref[...], ms, preferred_element_type=jnp.float32)
        + msb_ref[...], 0.0)

    k_pan = yp[0:C, :] + pan                        # conv1
    k_ms = ym[0:C, :] + ms                          # conv4
    qpan_ref[...] = yp[C:2 * C, :] + pan            # conv2
    qms_ref[...] = ym[C:2 * C, :] + ms              # conv5
    # value slab: rows [0:C] = ms_v (conv6), rows [C:2C] = pan_v (conv3)
    vstack_ref[...] = jnp.concatenate(
        [ym[2 * C:3 * C, :] + ms, yp[2 * C:3 * C, :] + pan], axis=0)

    vout_ref[...] = jnp.zeros_like(vout_ref)
    ssp_ref[...] = jnp.zeros_like(ssp_ref)
    ssm_ref[...] = jnp.zeros_like(ssm_ref)
    mxp_ref[...] = jnp.full_like(mxp_ref, -jnp.inf)
    mxm_ref[...] = jnp.full_like(mxm_ref, -jnp.inf)

    dn = (((0,), (0,)), ((), ()))   # contract the channel dim of q and k

    def corr_tiles(qs):
        qp = qpan_ref[:, pl.ds(qs, tile_q)]          # (C, TQ)
        qm = qms_ref[:, pl.ds(qs, tile_q)]
        cp = lax.dot_general(qp, k_pan, dn,
                             preferred_element_type=jnp.float32)  # (TQ, HW)
        cm = lax.dot_general(qm, k_ms, dn,
                             preferred_element_type=jnp.float32)
        return cp, cm

    # ---- pass 1: per-key (column) statistics over all query tiles -----------
    @pl.loop(0, nqt)
    def _stats_pass(j):
        qs = pl.multiple_of(j * tile_q, tile_q)
        cp, cm = corr_tiles(qs)
        ssp_ref[...] += jnp.sum(cp * cp, axis=0, keepdims=True)
        ssm_ref[...] += jnp.sum(cm * cm, axis=0, keepdims=True)
        mxp_ref[...] = jnp.maximum(mxp_ref[...],
                                   jnp.max(cp, axis=0, keepdims=True))
        mxm_ref[...] = jnp.maximum(mxm_ref[...],
                                   jnp.max(cm, axis=0, keepdims=True))

    # L2Norm(corr/sqrt(C)) == corr * rsqrt(sum_q corr^2 + eps*C)  (scale folded)
    r_p = lax.rsqrt(ssp_ref[...] + (eps_l2 * C))     # (1, HW)
    r_m = lax.rsqrt(ssm_ref[...] + (eps_l2 * C))
    # column max of the normalized map: rnorm > 0, so max commutes with it.
    icm_p = pl.reciprocal(mxp_ref[...] * r_p + eps_mm, approx=False)  # (1, HW)
    icm_m = pl.reciprocal(mxm_ref[...] * r_m + eps_mm, approx=False)

    # ---- pass 2: per-query-tile attention + value-matmul accumulation -------
    @pl.loop(0, nqt)
    def _compute_pass(j):
        qs = pl.multiple_of(j * tile_q, tile_q)
        cp, cm = corr_tiles(qs)
        a_p = cp * r_p                               # pan_attn1 tile (TQ, HW)
        a_m = cm * r_m                               # ms_attn1 tile
        irm_p = pl.reciprocal(jnp.max(a_p, axis=1, keepdims=True) + eps_mm,
                              approx=False)          # (TQ, 1)
        irm_m = pl.reciprocal(jnp.max(a_m, axis=1, keepdims=True) + eps_mm,
                              approx=False)
        # attn1 + MutualMatching(attn1) == attn1 * (1 + attn1^2 * irm * icm)
        pan_attn = a_p * (1.0 + (a_p * a_p) * (irm_p * icm_p))
        ms_attn = a_m * (1.0 + (a_m * a_m) * (irm_m * icm_m))
        logits = pan_attn * ms_attn
        e = jnp.exp(logits - jnp.max(logits, axis=1, keepdims=True))
        attn = e * pl.reciprocal(jnp.sum(e, axis=1, keepdims=True),
                                 approx=False)       # (TQ, HW), rows sum to 1
        # stacked value matmul, contraction over the query tile:
        vt = vstack_ref[:, pl.ds(qs, tile_q)]        # (2C, TQ) = [ms_v; pan_v]
        vout_ref[...] += jnp.dot(vt, attn, preferred_element_type=jnp.float32)

    # ---- gates: block1/block2 merged into one block-diagonal matmul ---------
    vout = vout_ref[...]                             # [ms_to_pan; pan_to_ms]
    gate = jax.nn.sigmoid(
        jnp.dot(blkw_ref[...], vout, preferred_element_type=jnp.float32)
        + blkb_ref[...])
    res = gate * vout
    ms_out_ref[...] = ms_ref[...] + res[0:C, :]
    pan_out_ref[...] = pan_ref[...] + res[C:2 * C, :]
    # TODO(synk): Complementary_Learning_Loss is undefined in the source module,
    # so the loss output (and its mean/std normalization) is not produced here.


def cross_modal_interaction(ms, pan, conv_w, conv_b, blk_w, blk_b, *, tile_q=None):
    """ms, pan: (B, C, H, W) float32. Returns (ms_out, pan_out) in NCHW."""
    B, C, H, W = ms.shape
    HW = H * W
    ms2 = ms.reshape(B, C, HW)
    pan2 = pan.reshape(B, C, HW)

    # Query-tile size: bounds the live (TQ, HW) temporaries; lane-dense when
    # HW is a multiple of 128 (pad HW host-side for odd spatial sizes if needed).
    if tile_q is None:
        tile_q = 128 if (HW % 128 == 0 and HW > 128) else HW
    assert HW % tile_q == 0, "tile_q must divide H*W"
    nqt = HW // tile_q

    # Stack per-modality conv weights/biases: rows [K; Q; V].
    pan_w = conv_w[0:3].reshape(3 * C, C)
    pan_b = conv_b[0:3].reshape(3 * C, 1)
    ms_w = conv_w[3:6].reshape(3 * C, C)
    ms_b = conv_b[3:6].reshape(3 * C, 1)
    # Merge block1/block2 into one block-diagonal gate conv over [ms_to_pan; pan_to_ms].
    blk_wd = jnp.zeros((2 * C, 2 * C), conv_w.dtype)
    blk_wd = blk_wd.at[:C, :C].set(blk_w[0]).at[C:, C:].set(blk_w[1])
    blk_bd = blk_b.reshape(2 * C, 1)

    # Scoped-VMEM budget: scratch + double-buffered I/O blocks + live tile temps.
    f32b = 4
    est = f32b * (2 * C * HW            # q_pan, q_ms scratch
                  + 4 * C * HW          # vstack + vout scratch
                  + 4 * HW              # column statistics
                  + 6 * C * HW          # stacked K/Q/V values during setup
                  + 8 * C * HW          # 4 (C,HW) I/O blocks, double-buffered
                  + 10 * tile_q * HW    # live (TQ,HW) temporaries in pass 2
                  ) + (2 << 20)
    vmem_limit = int(min(max(2 * est, 32 << 20), 100 << 20))

    kernel = functools.partial(_cmi_kernel, C=C, HW=HW, tile_q=tile_q, nqt=nqt)

    def batch_spec():
        return pl.BlockSpec((None, C, HW), lambda b: (b, 0, 0))

    def param_spec(shape):
        nd = len(shape)
        return pl.BlockSpec(shape, lambda b, nd=nd: (0,) * nd)

    ms_out, pan_out = pl.pallas_call(
        kernel,
        out_shape=(jax.ShapeDtypeStruct((B, C, HW), jnp.float32),
                   jax.ShapeDtypeStruct((B, C, HW), jnp.float32)),
        grid_spec=pltpu.PrefetchScalarGridSpec(
            num_scalar_prefetch=0,
            grid=(B,),
            in_specs=[
                batch_spec(),                       # pan
                batch_spec(),                       # ms
                param_spec((3 * C, C)),             # pan conv weights [K;Q;V]
                param_spec((3 * C, 1)),             # pan conv biases
                param_spec((3 * C, C)),             # ms conv weights [K;Q;V]
                param_spec((3 * C, 1)),             # ms conv biases
                param_spec((2 * C, 2 * C)),         # block-diagonal gate weights
                param_spec((2 * C, 1)),             # gate biases
            ],
            out_specs=[batch_spec(), batch_spec()],
            scratch_shapes=[
                pltpu.VMEM((C, HW), jnp.float32),       # pan_q
                pltpu.VMEM((C, HW), jnp.float32),       # ms_q
                pltpu.VMEM((2 * C, HW), jnp.float32),   # [ms_v; pan_v]
                pltpu.VMEM((2 * C, HW), jnp.float32),   # value-matmul accumulator
                pltpu.VMEM((1, HW), jnp.float32),       # pan column sum-of-squares
                pltpu.VMEM((1, HW), jnp.float32),       # ms  column sum-of-squares
                pltpu.VMEM((1, HW), jnp.float32),       # pan column max
                pltpu.VMEM((1, HW), jnp.float32),       # ms  column max
            ],
        ),
        compiler_params=pltpu.CompilerParams(
            dimension_semantics=("parallel",),
            vmem_limit_bytes=vmem_limit),
    )(pan2, ms2, pan_w, pan_b, ms_w, ms_b, blk_wd, blk_bd)

    return ms_out.reshape(B, C, H, W), pan_out.reshape(B, C, H, W)


def make_folded_params(key, C):
    """Deterministic synthetic params. Conv(1x1)+BN(eval) folded to W', b'."""
    ks = jax.random.split(key, 12)
    # six conv branches (conv1..conv6), each Conv2d(C, C, 1) with bias + BN
    conv_w_raw = 0.2 * jax.random.normal(ks[0], (6, C, C), jnp.float32)
    conv_b_raw = 0.1 * jax.random.normal(ks[1], (6, C), jnp.float32)
    gamma = 1.0 + 0.1 * jax.random.normal(ks[2], (6, C), jnp.float32)
    beta = 0.1 * jax.random.normal(ks[3], (6, C), jnp.float32)
    r_mean = 0.1 * jax.random.normal(ks[4], (6, C), jnp.float32)
    r_var = 1.0 + 0.1 * jax.random.uniform(ks[5], (6, C), jnp.float32)
    scale = gamma / jnp.sqrt(r_var + 1e-5)
    conv_w = scale[:, :, None] * conv_w_raw
    conv_b = scale * (conv_b_raw - r_mean) + beta

    # block1/block2: Conv2d(C, C, 1, bias=False) + BN (+ sigmoid in-kernel)
    blk_w_raw = 0.2 * jax.random.normal(ks[6], (2, C, C), jnp.float32)
    bgamma = 1.0 + 0.1 * jax.random.normal(ks[7], (2, C), jnp.float32)
    bbeta = 0.1 * jax.random.normal(ks[8], (2, C), jnp.float32)
    br_mean = 0.1 * jax.random.normal(ks[9], (2, C), jnp.float32)
    br_var = 1.0 + 0.1 * jax.random.uniform(ks[10], (2, C), jnp.float32)
    bscale = bgamma / jnp.sqrt(br_var + 1e-5)
    blk_w = bscale[:, :, None] * blk_w_raw
    blk_b = bscale * (0.0 - br_mean) + bbeta

    return (conv_w, conv_b[..., None], blk_w, blk_b[..., None])


def reference(ms, pan, conv_w, conv_b, blk_w, blk_b):
    """Pure-JAX reference mirroring the PyTorch forward (BN folded, eval mode)."""
    B, C, H, W = ms.shape
    HW = H * W
    ms2 = ms.reshape(B, C, HW)
    pan2 = pan.reshape(B, C, HW)

    def branch(x, w, b):
        y = jnp.einsum("oc,bcn->bon", w, x) + b[None]
        return jnp.maximum(y, 0.0) + x

    pan_k = branch(pan2, conv_w[0], conv_b[0])
    pan_q = branch(pan2, conv_w[1], conv_b[1])
    pan_v = branch(pan2, conv_w[2], conv_b[2])
    ms_k = branch(ms2, conv_w[3], conv_b[3])
    ms_q = branch(ms2, conv_w[4], conv_b[4])
    ms_v = branch(ms2, conv_w[5], conv_b[5])

    def l2norm(x):
        return x / jnp.sqrt(jnp.sum(x * x, axis=1, keepdims=True) + 1e-6)

    def mutual(c):
        eps = 1e-5
        b_max = jnp.max(c, axis=1, keepdims=True)
        a_max = jnp.max(c, axis=2, keepdims=True)
        return c * ((c / (a_max + eps)) * (c / (b_max + eps)))

    pan_attn1 = l2norm(jnp.einsum("bcq,bck->bqk", pan_q, pan_k) / math.sqrt(C))
    ms_attn1 = l2norm(jnp.einsum("bcq,bck->bqk", ms_q, ms_k) / math.sqrt(C))
    pan_attn = pan_attn1 + mutual(pan_attn1)
    ms_attn = ms_attn1 + mutual(ms_attn1)
    attn = jax.nn.softmax(pan_attn * ms_attn, axis=-1)

    ms_to_pan = jnp.einsum("bcn,bnm->bcm", ms_v, attn)
    pan_to_ms = jnp.einsum("bcn,bnm->bcm", pan_v, attn)

    g1 = jax.nn.sigmoid(jnp.einsum("oc,bcn->bon", blk_w[0], ms_to_pan) + blk_b[0][None])
    g2 = jax.nn.sigmoid(jnp.einsum("oc,bcn->bon", blk_w[1], pan_to_ms) + blk_b[1][None])

    ms_out = ms2 + g1 * ms_to_pan
    pan_out = pan2 + g2 * pan_to_ms
    return ms_out.reshape(B, C, H, W), pan_out.reshape(B, C, H, W)


if __name__ == "__main__":
    B, C, H, W = 2, 4, 16, 16
    key = jax.random.PRNGKey(0)
    k_ms, k_pan, k_par = jax.random.split(key, 3)
    ms = jax.random.normal(k_ms, (B, C, H, W), jnp.float32)
    pan = jax.random.normal(k_pan, (B, C, H, W), jnp.float32)

    conv_w, conv_b, blk_w, blk_b = make_folded_params(k_par, C)

    # HW = 256 -> tile_q = 128, 2 query tiles per batch element (exercises the
    # two-pass accumulation path).
    ms_out, pan_out = cross_modal_interaction(ms, pan, conv_w, conv_b, blk_w, blk_b)
    jax.block_until_ready((ms_out, pan_out))

    ms_ref, pan_ref = reference(ms, pan, conv_w, conv_b, blk_w, blk_b)
    np.testing.assert_allclose(np.asarray(ms_out), np.asarray(ms_ref), rtol=1e-3, atol=1e-4)
    np.testing.assert_allclose(np.asarray(pan_out), np.asarray(pan_ref), rtol=1e-3, atol=1e-4)

    print("KERNEL_OK")
</pallas_src>

<mosaic_0001>
module attributes {stable_mosaic.version = 11 : i64} {
  func.func @_cmi_kernel(%arg0: i32, %arg1: memref<1x4x256xf32, #tpu.memory_space<vmem>>, %arg2: memref<1x4x256xf32, #tpu.memory_space<vmem>>, %arg3: memref<12x4xf32, #tpu.memory_space<vmem>>, %arg4: memref<12x1xf32, #tpu.memory_space<vmem>>, %arg5: memref<12x4xf32, #tpu.memory_space<vmem>>, %arg6: memref<12x1xf32, #tpu.memory_space<vmem>>, %arg7: memref<8x8xf32, #tpu.memory_space<vmem>>, %arg8: memref<8x1xf32, #tpu.memory_space<vmem>>, %arg9: memref<1x4x256xf32, #tpu.memory_space<vmem>>, %arg10: memref<1x4x256xf32, #tpu.memory_space<vmem>>, %arg11: memref<4x256xf32, #tpu.memory_space<vmem>>, %arg12: memref<4x256xf32, #tpu.memory_space<vmem>>, %arg13: memref<8x256xf32, #tpu.memory_space<vmem>>, %arg14: memref<8x256xf32, #tpu.memory_space<vmem>>, %arg15: memref<1x256xf32, #tpu.memory_space<vmem>>, %arg16: memref<1x256xf32, #tpu.memory_space<vmem>>, %arg17: memref<1x256xf32, #tpu.memory_space<vmem>>, %arg18: memref<1x256xf32, #tpu.memory_space<vmem>>) attributes {dimension_semantics = [#tpu.dimension_semantics<parallel>], iteration_bounds = array<i64: 2>, scalar_prefetch = 0 : i64, scratch_operands = 8 : i64, tpu.core_type = #tpu.core_type<tc>, window_params = [{transform_indices = @transform_0, window_bounds = array<i64: 1, 4, 256>}, {transform_indices = @transform_1, window_bounds = array<i64: 1, 4, 256>}, {pipeline_mode = #tpu.pipeline_mode<synchronous>, transform_indices = @transform_2, window_bounds = array<i64: 12, 4>}, {pipeline_mode = #tpu.pipeline_mode<synchronous>, transform_indices = @transform_3, window_bounds = array<i64: 12, 1>}, {pipeline_mode = #tpu.pipeline_mode<synchronous>, transform_indices = @transform_4, window_bounds = array<i64: 12, 4>}, {pipeline_mode = #tpu.pipeline_mode<synchronous>, transform_indices = @transform_5, window_bounds = array<i64: 12, 1>}, {pipeline_mode = #tpu.pipeline_mode<synchronous>, transform_indices = @transform_6, window_bounds = array<i64: 8, 8>}, {pipeline_mode = #tpu.pipeline_mode<synchronous>, transform_indices = @transform_7, window_bounds = array<i64: 8, 1>}, {transform_indices = @transform_8, window_bounds = array<i64: 1, 4, 256>}, {transform_indices = @transform_9, window_bounds = array<i64: 1, 4, 256>}]} {
    %c0 = arith.constant 0 : index
    %c0_0 = arith.constant 0 : index
    %c0_1 = arith.constant 0 : index
    %0 = vector.load %arg1[%c0, %c0_0, %c0_1] : memref<1x4x256xf32, #tpu.memory_space<vmem>>, vector<1x4x256xf32>
    %1 = vector.shape_cast %0 : vector<1x4x256xf32> to vector<4x256xf32>
    %c0_2 = arith.constant 0 : index
    %c0_3 = arith.constant 0 : index
    %c0_4 = arith.constant 0 : index
    %2 = vector.load %arg2[%c0_2, %c0_3, %c0_4] : memref<1x4x256xf32, #tpu.memory_space<vmem>>, vector<1x4x256xf32>
    %3 = vector.shape_cast %2 : vector<1x4x256xf32> to vector<4x256xf32>
    %c0_5 = arith.constant 0 : index
    %c0_6 = arith.constant 0 : index
    %4 = vector.load %arg3[%c0_5, %c0_6] : memref<12x4xf32, #tpu.memory_space<vmem>>, vector<12x4xf32>
    %cst = arith.constant dense<0.000000e+00> : vector<12x256xf32>
    %5 = tpu.matmul %4, %1, %cst {dimension_numbers = #tpu.dot_dimension_numbers<[1], [0], [0], [1], [0, 0, 1, 1], [], []>} : vector<12x4xf32>, vector<4x256xf32>, vector<12x256xf32> -> vector<12x256xf32>
    %c0_7 = arith.constant 0 : index
    %c0_8 = arith.constant 0 : index
    %6 = vector.load %arg4[%c0_7, %c0_8] : memref<12x1xf32, #tpu.memory_space<vmem>>, vector<12x1xf32>
    %7 = vector.broadcast %6 : vector<12x1xf32> to vector<12x256xf32>
    %8 = arith.addf %5, %7 : vector<12x256xf32>
    %cst_9 = arith.constant 0.000000e+00 : f32
    %9 = vector.broadcast %cst_9 : f32 to vector<12x256xf32>
    %10 = arith.maximumf %8, %9 : vector<12x256xf32>
    %c0_10 = arith.constant 0 : index
    %c0_11 = arith.constant 0 : index
    %11 = vector.load %arg5[%c0_10, %c0_11] : memref<12x4xf32, #tpu.memory_space<vmem>>, vector<12x4xf32>
    %cst_12 = arith.constant dense<0.000000e+00> : vector<12x256xf32>
    %12 = tpu.matmul %11, %3, %cst_12 {dimension_numbers = #tpu.dot_dimension_numbers<[1], [0], [0], [1], [0, 0, 1, 1], [], []>} : vector<12x4xf32>, vector<4x256xf32>, vector<12x256xf32> -> vector<12x256xf32>
    %c0_13 = arith.constant 0 : index
    %c0_14 = arith.constant 0 : index
    %13 = vector.load %arg6[%c0_13, %c0_14] : memref<12x1xf32, #tpu.memory_space<vmem>>, vector<12x1xf32>
    %14 = vector.broadcast %13 : vector<12x1xf32> to vector<12x256xf32>
    %15 = arith.addf %12, %14 : vector<12x256xf32>
    %cst_15 = arith.constant 0.000000e+00 : f32
    %16 = vector.broadcast %cst_15 : f32 to vector<12x256xf32>
    %17 = arith.maximumf %15, %16 : vector<12x256xf32>
    %18 = vector.extract_strided_slice %10 {offsets = [0, 0], sizes = [4, 256], strides = [1, 1]} : vector<12x256xf32> to vector<4x256xf32>
    %19 = arith.addf %18, %1 : vector<4x256xf32>
    %20 = vector.extract_strided_slice %17 {offsets = [0, 0], sizes = [4, 256], strides = [1, 1]} : vector<12x256xf32> to vector<4x256xf32>
    %21 = arith.addf %20, %3 : vector<4x256xf32>
    %22 = vector.extract_strided_slice %10 {offsets = [4, 0], sizes = [4, 256], strides = [1, 1]} : vector<12x256xf32> to vector<4x256xf32>
    %23 = arith.addf %22, %1 : vector<4x256xf32>
    %c0_16 = arith.constant 0 : index
    %c0_17 = arith.constant 0 : index
    %24 = vector.load %arg11[%c0_16, %c0_17] : memref<4x256xf32, #tpu.memory_space<vmem>>, vector<4x256xf32>
    tpu.vector_store %arg11[%c0_16, %c0_17], %23 {strides = array<i32>} : memref<4x256xf32, #tpu.memory_space<vmem>>, vector<4x256xf32>,
    %25 = vector.extract_strided_slice %17 {offsets = [4, 0], sizes = [4, 256], strides = [1, 1]} : vector<12x256xf32> to vector<4x256xf32>
    %26 = arith.addf %25, %3 : vector<4x256xf32>
    %c0_18 = arith.constant 0 : index
    %c0_19 = arith.constant 0 : index
    %27 = vector.load %arg12[%c0_18, %c0_19] : memref<4x256xf32, #tpu.memory_space<vmem>>, vector<4x256xf32>
    tpu.vector_store %arg12[%c0_18, %c0_19], %26 {strides = array<i32>} : memref<4x256xf32, #tpu.memory_space<vmem>>, vector<4x256xf32>,
    %28 = vector.extract_strided_slice %17 {offsets = [8, 0], sizes = [4, 256], strides = [1, 1]} : vector<12x256xf32> to vector<4x256xf32>
    %29 = arith.addf %28, %3 : vector<4x256xf32>
    %30 = vector.extract_strided_slice %10 {offsets = [8, 0], sizes = [4, 256], strides = [1, 1]} : vector<12x256xf32> to vector<4x256xf32>
    %31 = arith.addf %30, %1 : vector<4x256xf32>
    %32 = tpu.concatenate %29, %31 in 0 : vector<4x256xf32>, vector<4x256xf32> -> vector<8x256xf32>
    %c0_20 = arith.constant 0 : index
    %c0_21 = arith.constant 0 : index
    %33 = vector.load %arg13[%c0_20, %c0_21] : memref<8x256xf32, #tpu.memory_space<vmem>>, vector<8x256xf32>
    tpu.vector_store %arg13[%c0_20, %c0_21], %32 {strides = array<i32>} : memref<8x256xf32, #tpu.memory_space<vmem>>, vector<8x256xf32>,
    %cst_22 = arith.constant 0.000000e+00 : f32
    %34 = vector.broadcast %cst_22 : f32 to vector<8x256xf32>
    %c0_23 = arith.constant 0 : index
    %c0_24 = arith.constant 0 : index
    %35 = vector.load %arg14[%c0_23, %c0_24] : memref<8x256xf32, #tpu.memory_space<vmem>>, vector<8x256xf32>
    tpu.vector_store %arg14[%c0_23, %c0_24], %34 {strides = array<i32>} : memref<8x256xf32, #tpu.memory_space<vmem>>, vector<8x256xf32>,
    %cst_25 = arith.constant 0.000000e+00 : f32
    %36 = vector.broadcast %cst_25 : f32 to vector<1x256xf32>
    %c0_26 = arith.constant 0 : index
    %c0_27 = arith.constant 0 : index
    %37 = vector.load %arg15[%c0_26, %c0_27] : memref<1x256xf32, #tpu.memory_space<vmem>>, vector<1x256xf32>
    tpu.vector_store %arg15[%c0_26, %c0_27], %36 {strides = array<i32>} : memref<1x256xf32, #tpu.memory_space<vmem>>, vector<1x256xf32>,
    %cst_28 = arith.constant 0.000000e+00 : f32
    %38 = vector.broadcast %cst_28 : f32 to vector<1x256xf32>
    %c0_29 = arith.constant 0 : index
    %c0_30 = arith.constant 0 : index
    %39 = vector.load %arg16[%c0_29, %c0_30] : memref<1x256xf32, #tpu.memory_space<vmem>>, vector<1x256xf32>
    tpu.vector_store %arg16[%c0_29, %c0_30], %38 {strides = array<i32>} : memref<1x256xf32, #tpu.memory_space<vmem>>, vector<1x256xf32>,
    %cst_31 = arith.constant 0xFF800000 : f32
    %40 = vector.broadcast %cst_31 : f32 to vector<1x256xf32>
    %c0_32 = arith.constant 0 : index
    %c0_33 = arith.constant 0 : index
    %41 = vector.load %arg17[%c0_32, %c0_33] : memref<1x256xf32, #tpu.memory_space<vmem>>, vector<1x256xf32>
    tpu.vector_store %arg17[%c0_32, %c0_33], %40 {strides = array<i32>} : memref<1x256xf32, #tpu.memory_space<vmem>>, vector<1x256xf32>,
    %cst_34 = arith.constant 0xFF800000 : f32
    %42 = vector.broadcast %cst_34 : f32 to vector<1x256xf32>
    %c0_35 = arith.constant 0 : index
    %c0_36 = arith.constant 0 : index
    %43 = vector.load %arg18[%c0_35, %c0_36] : memref<1x256xf32, #tpu.memory_space<vmem>>, vector<1x256xf32>
    tpu.vector_store %arg18[%c0_35, %c0_36], %42 {strides = array<i32>} : memref<1x256xf32, #tpu.memory_space<vmem>>, vector<1x256xf32>,
    %c0_i32 = arith.constant 0 : i32
    %c2_i32 = arith.constant 2 : i32
    %44 = arith.addi %c0_i32, %c2_i32 : i32
    %c1_i32 = arith.constant 1 : i32
    scf.for %arg19 = %c0_i32 to %44 step %c1_i32  : i32 {
      %c1_i32_74 = arith.constant 1 : i32
      %90 = arith.muli %arg19, %c1_i32_74 : i32
      %c0_i32_75 = arith.constant 0 : i32
      %91 = arith.addi %c0_i32_75, %90 : i32
      %c128_i32 = arith.constant 128 : i32
      %92 = arith.muli %91, %c128_i32 : i32
      %93 = tpu.assume_multiple %92, 128 : i32
      %c0_76 = arith.constant 0 : index
      %94 = arith.index_cast %93 : i32 to index
      %95 = vector.load %arg11[%c0_76, %94] : memref<4x256xf32, #tpu.memory_space<vmem>>, vector<4x128xf32>
      %c0_77 = arith.constant 0 : index
      %96 = arith.index_cast %93 : i32 to index
      %97 = vector.load %arg12[%c0_77, %96] : memref<4x256xf32, #tpu.memory_space<vmem>>, vector<4x128xf32>
      %cst_78 = arith.constant dense<0.000000e+00> : vector<128x256xf32>
      %98 = tpu.matmul %95, %19, %cst_78 {dimension_numbers = #tpu.dot_dimension_numbers<[0], [0], [1], [1], [0, 1, 1, 1], [], []>} : vector<4x128xf32>, vector<4x256xf32>, vector<128x256xf32> -> vector<128x256xf32>
      %cst_79 = arith.constant dense<0.000000e+00> : vector<128x256xf32>
      %99 = tpu.matmul %97, %21, %cst_79 {dimension_numbers = #tpu.dot_dimension_numbers<[0], [0], [1], [1], [0, 1, 1, 1], [], []>} : vector<4x128xf32>, vector<4x256xf32>, vector<128x256xf32> -> vector<128x256xf32>
      %c0_80 = arith.constant 0 : index
      %c0_81 = arith.constant 0 : index
      %100 = vector.load %arg15[%c0_80, %c0_81] : memref<1x256xf32, #tpu.memory_space<vmem>>, vector<1x256xf32>
      %101 = arith.mulf %98, %98 : vector<128x256xf32>
      %cst_82 = arith.constant dense<0.000000e+00> : vector<256xf32>
      %102 = vector.multi_reduction <add>, %101, %cst_82 [0] : vector<128x256xf32> to vector<256xf32>
      %103 = vector.shape_cast %102 : vector<256xf32> to vector<1x256xf32>
      %104 = arith.addf %100, %103 : vector<1x256xf32>
      %c0_83 = arith.constant 0 : index
      %c0_84 = arith.constant 0 : index
      %105 = vector.load %arg15[%c0_83, %c0_84] : memref<1x256xf32, #tpu.memory_space<vmem>>, vector<1x256xf32>
      tpu.vector_store %arg15[%c0_83, %c0_84], %104 {strides = array<i32>} : memref<1x256xf32, #tpu.memory_space<vmem>>, vector<1x256xf32>,
      %c0_85 = arith.constant 0 : index
      %c0_86 = arith.constant 0 : index
      %106 = vector.load %arg16[%c0_85, %c0_86] : memref<1x256xf32, #tpu.memory_space<vmem>>, vector<1x256xf32>
      %107 = arith.mulf %99, %99 : vector<128x256xf32>
      %cst_87 = arith.constant dense<0.000000e+00> : vector<256xf32>
      %108 = vector.multi_reduction <add>, %107, %cst_87 [0] : vector<128x256xf32> to vector<256xf32>
      %109 = vector.shape_cast %108 : vector<256xf32> to vector<1x256xf32>
      %110 = arith.addf %106, %109 : vector<1x256xf32>
      %c0_88 = arith.constant 0 : index
      %c0_89 = arith.constant 0 : index
      %111 = vector.load %arg16[%c0_88, %c0_89] : memref<1x256xf32, #tpu.memory_space<vmem>>, vector<1x256xf32>
      tpu.vector_store %arg16[%c0_88, %c0_89], %110 {strides = array<i32>} : memref<1x256xf32, #tpu.memory_space<vmem>>, vector<1x256xf32>,
      %c0_90 = arith.constant 0 : index
      %c0_91 = arith.constant 0 : index
      %112 = vector.load %arg17[%c0_90, %c0_91] : memref<1x256xf32, #tpu.memory_space<vmem>>, vector<1x256xf32>
      %cst_92 = arith.constant dense<0xFF800000> : vector<256xf32>
      %113 = vector.multi_reduction <maximumf>, %98, %cst_92 [0] : vector<128x256xf32> to vector<256xf32>
      %114 = vector.shape_cast %113 : vector<256xf32> to vector<1x256xf32>
      %115 = arith.maximumf %112, %114 : vector<1x256xf32>
      %c0_93 = arith.constant 0 : index
      %c0_94 = arith.constant 0 : index
      %116 = vector.load %arg17[%c0_93, %c0_94] : memref<1x256xf32, #tpu.memory_space<vmem>>, vector<1x256xf32>
      tpu.vector_store %arg17[%c0_93, %c0_94], %115 {strides = array<i32>} : memref<1x256xf32, #tpu.memory_space<vmem>>, vector<1x256xf32>,
      %c0_95 = arith.constant 0 : index
      %c0_96 = arith.constant 0 : index
      %117 = vector.load %arg18[%c0_95, %c0_96] : memref<1x256xf32, #tpu.memory_space<vmem>>, vector<1x256xf32>
      %cst_97 = arith.constant dense<0xFF800000> : vector<256xf32>
      %118 = vector.multi_reduction <maximumf>, %99, %cst_97 [0] : vector<128x256xf32> to vector<256xf32>
      %119 = vector.shape_cast %118 : vector<256xf32> to vector<1x256xf32>
      %120 = arith.maximumf %117, %119 : vector<1x256xf32>
      %c0_98 = arith.constant 0 : index
      %c0_99 = arith.constant 0 : index
      %121 = vector.load %arg18[%c0_98, %c0_99] : memref<1x256xf32, #tpu.memory_space<vmem>>, vector<1x256xf32>
      tpu.vector_store %arg18[%c0_98, %c0_99], %120 {strides = array<i32>} : memref<1x256xf32, #tpu.memory_space<vmem>>, vector<1x256xf32>,
    }
    %c2_i32_37 = arith.constant 2 : i32
    %c0_38 = arith.constant 0 : index
    %c0_39 = arith.constant 0 : index
    %45 = vector.load %arg15[%c0_38, %c0_39] : memref<1x256xf32, #tpu.memory_space<vmem>>, vector<1x256xf32>
    %cst_40 = arith.constant 4.000000e-06 : f32
    %46 = vector.broadcast %cst_40 : f32 to vector<1x256xf32>
    %47 = arith.addf %45, %46 : vector<1x256xf32>
    %48 = math.rsqrt %47 : vector<1x256xf32>
    %c0_41 = arith.constant 0 : index
    %c0_42 = arith.constant 0 : index
    %49 = vector.load %arg16[%c0_41, %c0_42] : memref<1x256xf32, #tpu.memory_space<vmem>>, vector<1x256xf32>
    %cst_43 = arith.constant 4.000000e-06 : f32
    %50 = vector.broadcast %cst_43 : f32 to vector<1x256xf32>
    %51 = arith.addf %49, %50 : vector<1x256xf32>
    %52 = math.rsqrt %51 : vector<1x256xf32>
    %c0_44 = arith.constant 0 : index
    %c0_45 = arith.constant 0 : index
    %53 = vector.load %arg17[%c0_44, %c0_45] : memref<1x256xf32, #tpu.memory_space<vmem>>, vector<1x256xf32>
    %54 = arith.mulf %53, %48 : vector<1x256xf32>
    %cst_46 = arith.constant 9.99999974E-6 : f32
    %55 = vector.broadcast %cst_46 : f32 to vector<1x256xf32>
    %56 = arith.addf %54, %55 : vector<1x256xf32>
    %57 = tpu.reciprocal %56 : vector<1x256xf32> -> vector<1x256xf32>
    %c0_47 = arith.constant 0 : index
    %c0_48 = arith.constant 0 : index
    %58 = vector.load %arg18[%c0_47, %c0_48] : memref<1x256xf32, #tpu.memory_space<vmem>>, vector<1x256xf32>
    %59 = arith.mulf %58, %52 : vector<1x256xf32>
    %cst_49 = arith.constant 9.99999974E-6 : f32
    %60 = vector.broadcast %cst_49 : f32 to vector<1x256xf32>
    %61 = arith.addf %59, %60 : vector<1x256xf32>
    %62 = tpu.reciprocal %61 : vector<1x256xf32> -> vector<1x256xf32>
    %c0_i32_50 = arith.constant 0 : i32
    %c2_i32_51 = arith.constant 2 : i32
    %63 = arith.addi %c0_i32_50, %c2_i32_51 : i32
    %c1_i32_52 = arith.constant 1 : i32
    scf.for %arg19 = %c0_i32_50 to %63 step %c1_i32_52  : i32 {
      %c1_i32_74 = arith.constant 1 : i32
      %90 = arith.muli %arg19, %c1_i32_74 : i32
      %c0_i32_75 = arith.constant 0 : i32
      %91 = arith.addi %c0_i32_75, %90 : i32
      %c128_i32 = arith.constant 128 : i32
      %92 = arith.muli %91, %c128_i32 : i32
      %93 = tpu.assume_multiple %92, 128 : i32
      %c0_76 = arith.constant 0 : index
      %94 = arith.index_cast %93 : i32 to index
      %95 = vector.load %arg11[%c0_76, %94] : memref<4x256xf32, #tpu.memory_space<vmem>>, vector<4x128xf32>
      %c0_77 = arith.constant 0 : index
      %96 = arith.index_cast %93 : i32 to index
      %97 = vector.load %arg12[%c0_77, %96] : memref<4x256xf32, #tpu.memory_space<vmem>>, vector<4x128xf32>
      %cst_78 = arith.constant dense<0.000000e+00> : vector<128x256xf32>
      %98 = tpu.matmul %95, %19, %cst_78 {dimension_numbers = #tpu.dot_dimension_numbers<[0], [0], [1], [1], [0, 1, 1, 1], [], []>} : vector<4x128xf32>, vector<4x256xf32>, vector<128x256xf32> -> vector<128x256xf32>
      %cst_79 = arith.constant dense<0.000000e+00> : vector<128x256xf32>
      %99 = tpu.matmul %97, %21, %cst_79 {dimension_numbers = #tpu.dot_dimension_numbers<[0], [0], [1], [1], [0, 1, 1, 1], [], []>} : vector<4x128xf32>, vector<4x256xf32>, vector<128x256xf32> -> vector<128x256xf32>
      %100 = vector.broadcast %48 : vector<1x256xf32> to vector<128x256xf32>
      %101 = arith.mulf %98, %100 : vector<128x256xf32>
      %102 = vector.broadcast %52 : vector<1x256xf32> to vector<128x256xf32>
      %103 = arith.mulf %99, %102 : vector<128x256xf32>
      %cst_80 = arith.constant dense<0xFF800000> : vector<128xf32>
      %104 = vector.multi_reduction <maximumf>, %101, %cst_80 [1] : vector<128x256xf32> to vector<128xf32>
      %105 = vector.shape_cast %104 : vector<128xf32> to vector<128x1xf32>
      %cst_81 = arith.constant 9.99999974E-6 : f32
      %106 = vector.broadcast %cst_81 : f32 to vector<128x1xf32>
      %107 = arith.addf %105, %106 : vector<128x1xf32>
      %108 = tpu.reciprocal %107 : vector<128x1xf32> -> vector<128x1xf32>
      %cst_82 = arith.constant dense<0xFF800000> : vector<128xf32>
      %109 = vector.multi_reduction <maximumf>, %103, %cst_82 [1] : vector<128x256xf32> to vector<128xf32>
      %110 = vector.shape_cast %109 : vector<128xf32> to vector<128x1xf32>
      %cst_83 = arith.constant 9.99999974E-6 : f32
      %111 = vector.broadcast %cst_83 : f32 to vector<128x1xf32>
      %112 = arith.addf %110, %111 : vector<128x1xf32>
      %113 = tpu.reciprocal %112 : vector<128x1xf32> -> vector<128x1xf32>
      %114 = arith.mulf %101, %101 : vector<128x256xf32>
      %115 = vector.broadcast %108 : vector<128x1xf32> to vector<128x256xf32>
      %116 = vector.broadcast %57 : vector<1x256xf32> to vector<128x256xf32>
      %117 = arith.mulf %115, %116 : vector<128x256xf32>
      %118 = arith.mulf %114, %117 : vector<128x256xf32>
      %cst_84 = arith.constant 1.000000e+00 : f32
      %119 = vector.broadcast %cst_84 : f32 to vector<128x256xf32>
      %120 = arith.addf %119, %118 : vector<128x256xf32>
      %121 = arith.mulf %101, %120 : vector<128x256xf32>
      %122 = arith.mulf %103, %103 : vector<128x256xf32>
      %123 = vector.broadcast %113 : vector<128x1xf32> to vector<128x256xf32>
      %124 = vector.broadcast %62 : vector<1x256xf32> to vector<128x256xf32>
      %125 = arith.mulf %123, %124 : vector<128x256xf32>
      %126 = arith.mulf %122, %125 : vector<128x256xf32>
      %cst_85 = arith.constant 1.000000e+00 : f32
      %127 = vector.broadcast %cst_85 : f32 to vector<128x256xf32>
      %128 = arith.addf %127, %126 : vector<128x256xf32>
      %129 = arith.mulf %103, %128 : vector<128x256xf32>
      %130 = arith.mulf %121, %129 : vector<128x256xf32>
      %cst_86 = arith.constant dense<0xFF800000> : vector<128xf32>
      %131 = vector.multi_reduction <maximumf>, %130, %cst_86 [1] : vector<128x256xf32> to vector<128xf32>
      %132 = vector.shape_cast %131 : vector<128xf32> to vector<128x1xf32>
      %133 = vector.broadcast %132 : vector<128x1xf32> to vector<128x256xf32>
      %134 = arith.subf %130, %133 : vector<128x256xf32>
      %135 = math.exp %134 : vector<128x256xf32>
      %cst_87 = arith.constant dense<0.000000e+00> : vector<128xf32>
      %136 = vector.multi_reduction <add>, %135, %cst_87 [1] : vector<128x256xf32> to vector<128xf32>
      %137 = vector.shape_cast %136 : vector<128xf32> to vector<128x1xf32>
      %138 = tpu.reciprocal %137 : vector<128x1xf32> -> vector<128x1xf32>
      %139 = vector.broadcast %138 : vector<128x1xf32> to vector<128x256xf32>
      %140 = arith.mulf %135, %139 : vector<128x256xf32>
      %c0_88 = arith.constant 0 : index
      %141 = arith.index_cast %93 : i32 to index
      %142 = vector.load %arg13[%c0_88, %141] : memref<8x256xf32, #tpu.memory_space<vmem>>, vector<8x128xf32>
      %c0_89 = arith.constant 0 : index
      %c0_90 = arith.constant 0 : index
      %143 = vector.load %arg14[%c0_89, %c0_90] : memref<8x256xf32, #tpu.memory_space<vmem>>, vector<8x256xf32>
      %cst_91 = arith.constant dense<0.000000e+00> : vector<8x256xf32>
      %144 = tpu.matmul %142, %140, %cst_91 {dimension_numbers = #tpu.dot_dimension_numbers<[1], [0], [0], [1], [0, 0, 1, 1], [], []>} : vector<8x128xf32>, vector<128x256xf32>, vector<8x256xf32> -> vector<8x256xf32>
      %145 = arith.addf %143, %144 : vector<8x256xf32>
      %c0_92 = arith.constant 0 : index
      %c0_93 = arith.constant 0 : index
      %146 = vector.load %arg14[%c0_92, %c0_93] : memref<8x256xf32, #tpu.memory_space<vmem>>, vector<8x256xf32>
      tpu.vector_store %arg14[%c0_92, %c0_93], %145 {strides = array<i32>} : memref<8x256xf32, #tpu.memory_space<vmem>>, vector<8x256xf32>,
    }
    %c2_i32_53 = arith.constant 2 : i32
    %c0_54 = arith.constant 0 : index
    %c0_55 = arith.constant 0 : index
    %64 = vector.load %arg14[%c0_54, %c0_55] : memref<8x256xf32, #tpu.memory_space<vmem>>, vector<8x256xf32>
    %c0_56 = arith.constant 0 : index
    %c0_57 = arith.constant 0 : index
    %65 = vector.load %arg7[%c0_56, %c0_57] : memref<8x8xf32, #tpu.memory_space<vmem>>, vector<8x8xf32>
    %cst_58 = arith.constant dense<0.000000e+00> : vector<8x256xf32>
    %66 = tpu.matmul %65, %64, %cst_58 {dimension_numbers = #tpu.dot_dimension_numbers<[1], [0], [0], [1], [0, 0, 1, 1], [], []>} : vector<8x8xf32>, vector<8x256xf32>, vector<8x256xf32> -> vector<8x256xf32>
    %c0_59 = arith.constant 0 : index
    %c0_60 = arith.constant 0 : index
    %67 = vector.load %arg8[%c0_59, %c0_60] : memref<8x1xf32, #tpu.memory_space<vmem>>, vector<8x1xf32>
    %68 = vector.broadcast %67 : vector<8x1xf32> to vector<8x256xf32>
    %69 = arith.addf %66, %68 : vector<8x256xf32>
    %70 = arith.negf %69 : vector<8x256xf32>
    %71 = math.exp %70 : vector<8x256xf32>
    %cst_61 = arith.constant 1.000000e+00 : f32
    %72 = vector.broadcast %cst_61 : f32 to vector<8x256xf32>
    %73 = arith.addf %72, %71 : vector<8x256xf32>
    %74 = arith.divf %72, %73 : vector<8x256xf32>
    %75 = arith.mulf %74, %64 : vector<8x256xf32>
    %c0_62 = arith.constant 0 : index
    %c0_63 = arith.constant 0 : index
    %c0_64 = arith.constant 0 : index
    %76 = vector.load %arg2[%c0_62, %c0_63, %c0_64] : memref<1x4x256xf32, #tpu.memory_space<vmem>>, vector<1x4x256xf32>
    %77 = vector.shape_cast %76 : vector<1x4x256xf32> to vector<4x256xf32>
    %78 = vector.extract_strided_slice %75 {offsets = [0, 0], sizes = [4, 256], strides = [1, 1]} : vector<8x256xf32> to vector<4x256xf32>
    %79 = arith.addf %77, %78 : vector<4x256xf32>
    %c0_65 = arith.constant 0 : index
    %c0_66 = arith.constant 0 : index
    %c0_67 = arith.constant 0 : index
    %80 = vector.load %arg9[%c0_65, %c0_66, %c0_67] : memref<1x4x256xf32, #tpu.memory_space<vmem>>, vector<1x4x256xf32>
    %81 = vector.shape_cast %80 : vector<1x4x256xf32> to vector<4x256xf32>
    %82 = vector.shape_cast %79 : vector<4x256xf32> to vector<1x4x256xf32>
    tpu.vector_store %arg9[%c0_65, %c0_66, %c0_67], %82 {strides = array<i32>} : memref<1x4x256xf32, #tpu.memory_space<vmem>>, vector<1x4x256xf32>,
    %c0_68 = arith.constant 0 : index
    %c0_69 = arith.constant 0 : index
    %c0_70 = arith.constant 0 : index
    %83 = vector.load %arg1[%c0_68, %c0_69, %c0_70] : memref<1x4x256xf32, #tpu.memory_space<vmem>>, vector<1x4x256xf32>
    %84 = vector.shape_cast %83 : vector<1x4x256xf32> to vector<4x256xf32>
    %85 = vector.extract_strided_slice %75 {offsets = [4, 0], sizes = [4, 256], strides = [1, 1]} : vector<8x256xf32> to vector<4x256xf32>
    %86 = arith.addf %84, %85 : vector<4x256xf32>
    %c0_71 = arith.constant 0 : index
    %c0_72 = arith.constant 0 : index
    %c0_73 = arith.constant 0 : index
    %87 = vector.load %arg10[%c0_71, %c0_72, %c0_73] : memref<1x4x256xf32, #tpu.memory_space<vmem>>, vector<1x4x256xf32>
    %88 = vector.shape_cast %87 : vector<1x4x256xf32> to vector<4x256xf32>
    %89 = vector.shape_cast %86 : vector<4x256xf32> to vector<1x4x256xf32>
    tpu.vector_store %arg10[%c0_71, %c0_72, %c0_73], %89 {strides = array<i32>} : memref<1x4x256xf32, #tpu.memory_space<vmem>>, vector<1x4x256xf32>,
    return
  }
  func.func @transform_0(%arg0: i32) -> (i32, i32, i32) {
    %c0_i32 = arith.constant 0 : i32
    %c0_i32_0 = arith.constant 0 : i32
    %c0_i32_1 = arith.constant 0 : i32
    return %arg0, %c0_i32, %c0_i32_0 : i32, i32, i32
  }
  func.func @transform_1(%arg0: i32) -> (i32, i32, i32) {
    %c0_i32 = arith.constant 0 : i32
    %c0_i32_0 = arith.constant 0 : i32
    %c0_i32_1 = arith.constant 0 : i32
    return %arg0, %c0_i32, %c0_i32_0 : i32, i32, i32
  }
  func.func @transform_2(%arg0: i32) -> (i32, i32) {
    %c0_i32 = arith.constant 0 : i32
    %c0_i32_0 = arith.constant 0 : i32
    %c0_i32_1 = arith.constant 0 : i32
    return %c0_i32, %c0_i32_0 : i32, i32
  }
  func.func @transform_3(%arg0: i32) -> (i32, i32) {
    %c0_i32 = arith.constant 0 : i32
    %c0_i32_0 = arith.constant 0 : i32
    %c0_i32_1 = arith.constant 0 : i32
    return %c0_i32, %c0_i32_0 : i32, i32
  }
  func.func @transform_4(%arg0: i32) -> (i32, i32) {
    %c0_i32 = arith.constant 0 : i32
    %c0_i32_0 = arith.constant 0 : i32
    %c0_i32_1 = arith.constant 0 : i32
    return %c0_i32, %c0_i32_0 : i32, i32
  }
  func.func @transform_5(%arg0: i32) -> (i32, i32) {
    %c0_i32 = arith.constant 0 : i32
    %c0_i32_0 = arith.constant 0 : i32
    %c0_i32_1 = arith.constant 0 : i32
    return %c0_i32, %c0_i32_0 : i32, i32
  }
  func.func @transform_6(%arg0: i32) -> (i32, i32) {
    %c0_i32 = arith.constant 0 : i32
    %c0_i32_0 = arith.constant 0 : i32
    %c0_i32_1 = arith.constant 0 : i32
    return %c0_i32, %c0_i32_0 : i32, i32
  }
  func.func @transform_7(%arg0: i32) -> (i32, i32) {
    %c0_i32 = arith.constant 0 : i32
    %c0_i32_0 = arith.constant 0 : i32
    %c0_i32_1 = arith.constant 0 : i32
    return %c0_i32, %c0_i32_0 : i32, i32
  }
  func.func @transform_8(%arg0: i32) -> (i32, i32, i32) {
    %c0_i32 = arith.constant 0 : i32
    %c0_i32_0 = arith.constant 0 : i32
    %c0_i32_1 = arith.constant 0 : i32
    return %arg0, %c0_i32, %c0_i32_0 : i32, i32, i32
  }
  func.func @transform_9(%arg0: i32) -> (i32, i32, i32) {
    %c0_i32 = arith.constant 0 : i32
    %c0_i32_0 = arith.constant 0 : i32
    %c0_i32_1 = arith.constant 0 : i32
    return %arg0, %c0_i32, %c0_i32_0 : i32, i32, i32
  }
}

</mosaic_0001>

<bundles_post_ra>
// kernel: tpu_custom_call.1
= control target key start
LH: loop header
LB: loop body
LE: loop exit
PB: predicated region body
PF: predicated region fallthrough
CT: control target
= control target key end

     0   :  { %15 = vsyncpa [#allocation11], 0  ;;  %s5023_s0 = inlined_call_operand.vmem [shape: f32[2,4,256], index: 0, kind: input, shape index: {}]   ;;  %s5024_s1 = inlined_call_operand.vmem [shape: f32[2,4,256], index: 1, kind: input, shape index: {}]   ;;  %s5025_s2 = inlined_call_operand.vmem [shape: f32[12,4], index: 2, kind: input, shape index: {}]   ;;  %s5026_s3 = inlined_call_operand.vmem [shape: f32[12,1], index: 3, kind: input, shape index: {}]   ;;  %s5027_s4 = inlined_call_operand.vmem [shape: f32[12,4], index: 4, kind: input, shape index: {}]   ;;  %s5028_s5 = inlined_call_operand.vmem [shape: f32[12,1], index: 5, kind: input, shape index: {}]   ;;  %s5029_s6 = inlined_call_operand.vmem [shape: f32[8,8], index: 6, kind: input, shape index: {}]   ;;  %s5030_s7 = inlined_call_operand.vmem [shape: f32[8,1], index: 7, kind: input, shape index: {}]   ;;  %s5031_s8 = inlined_call_operand.hbm [shape: f32[2,4,256], index: 8, kind: output, shape index: {0}]   ;;  %s5032_s9 = inlined_call_operand.hbm [shape: f32[2,4,256], index: 9, kind: output, shape index: {1}]  }
   0x1   :  { %17 = vsyncpa [#allocation11 + $0x1], 0 }
   0x2   :  { %18 = vsyncpa [#allocation13], 0 }
   0x3   :  { %20 = vsyncpa [#allocation13 + $0x1], 0  ;;  %s3744_s30 = smov 0   ;;  %s3746_s10 = smov 0  }
   0x4   :  { %s3748_s11 = smov 0   ;;  %s3750_s12 = smov 0  }
   0x5 LB: > { %5104 = sst [smem:[#allocation16_spill]] %s3672_s11  ;;  %s3765_s13 = sadd.s32 4294967295, %s3676_s12   ;;  %s3676_s12 = sphi %s3750_s12, %s5198_s12   ;;  %s3672_s11 = sphi %s3748_s11, %s5195_s11   ;;  %s3668_s10 = sphi %s3746_s10, %s5197_s10   ;;  %s3664_s30 = sphi %s3744_s30, %s5196_s30  }
   0x6   : > { %s3183_s14 = sadd.s32 4294967294, %s3676_s12   ;;  %s3769_s15 = sadd.s32 1, %s3676_s12  }
   0x7   : > { %s211_s16 = sadd.s32 1, %s3672_s11  ;;  %s208_s17 = ssub.s32 %s3676_s12, %s3769_s15 }
   0x8   : > { %p221_p0 = scmp.ne.s32.totalorder %s3672_s11, %s3668_s10  ;;  %p209_p1 = scmp.eq.s32.totalorder %s208_s17, 0 }
   0x9   : > { %p222_p2 = scmp.eq.s32.totalorder %s3765_s13, 1  ;;  %p227_p3 = scmp.ne.s32.totalorder %s3668_s10, %s3664_s30 }
   0xa   : > { %p228_p4 = scmp.eq.s32.totalorder %s3183_s14, 1  ;;  %p3186_p7 = scmp.ge.s32.totalorder %s3676_s12, 1 }
   0xb   : > { %s3780_s18 = scalar_select %p209_p1, %s3672_s11, %s211_s16  }
   0xc   : > { %p3782_p5 = por %p222_p2, %p221_p0  ;;  %p3786_p6 = por %p228_p4, %p227_p3 }
   0xd   : > { %5105 = sst [smem:[#allocation17_spill]] %s3780_s18  ;;  %p306_p8 = scmp.lt.s32.totalorder %s3676_s12, 3 }
   0xf   : > { %p307_p9 = pnand %p3186_p7, %p306_p8 }
  0x11   : > { %310 = sbr.rel (%p307_p9) target bundleno = 2323 (0x913), region = 52 }
  0x18   : > { %s3793_s21 = sand.u32 1, %s3668_s10   ;;  %p352_p10 = scmp.lt.s32.totalorder %s3765_s13, 1  ;;  %v620_v0 = vlaneseq  ;;  %v5035_v1 = vmov 0.0   ;;  %v5034_v3 = vmov 0   ;;  %v475_v4 = vld [vmem:[%s5028_s5] sm:$0xff]  ;;  %v3688_v5 = vmov -inf  }
  0x19   : > { %456 = vmatprep.mubr.f32.mxu0 %v5035_v1  ;;  %618 = vst [vmem:[#allocation5] sm:$0xff] %v5035_v1  ;;  %619 = vst [vmem:[#allocation5 + $0x8] sm:$0xff] %v5035_v1  ;;  %563 = vmatprep.mubr.f32.mxu1 %v5035_v1  ;;  %v367_v6 = vld [vmem:[%s5026_s3 + $0x8] sm:$0xf]  ;;  %v366_v8 = vld [vmem:[%s5026_s3] sm:$0xff]  ;;  %vm387_vm1 = vcmask 1043456  }
  0x1a   : > { %vm3802_vm0 = vcmp.lt.s32.totalorder %v620_v0, 256  ;;  %3393 = vset.pattern.permute.xlu0 %v5034_v3  ;;  %3394 = vset.pattern.permute.xlu1 %v5034_v3  ;;  %s353_s25 = scalar_select %p352_p10, %s3765_s13, 1  ;;  %v476_v7 = vld [vmem:[%s5028_s5 + $0x8] sm:$0xf]  ;;  %v364_v13 = vld [vmem:[%s5025_s2] sm:$0xff]  ;;  %vm380_vm2 = vcmask 31744  }
  0x1b   : > { %624 = vst.msk [vmem:[#allocation6] sm:$0x3] %vm3802_vm0, %v5035_v1  ;;  %625 = vst.msk [vmem:[#allocation7] sm:$0x3] %vm3802_vm0, %v5035_v1  ;;  %479 = vperm.xlu1 %3394, %v475_v4   ;;  %375 = vperm.xlu0 %3393, %v367_v6   ;;  %v473_v14 = vld [vmem:[%s5027_s4] sm:$0xff]  ;;  %s5114_s17 = sshll.u32 %s3793_s21, 3 }
  0x1c   : > { %626 = vst.msk [vmem:[#allocation8] sm:$0x3] %vm3802_vm0, %v3688_v5  ;;  %627 = vst.msk [vmem:[#allocation9] sm:$0x3] %vm3802_vm0, %v3688_v5  ;;  %s3291_s14 = sshll.u32 %s353_s25, 3  ;;  %s3902_s23 = scalar_lea.vmem [#allocation10], %s5114_s17 }
  0x1d   : > { %s3834_s22 = scalar_lea.vmem %s5023_s0, %s3291_s14  ;;  %s3839_s26 = scalar_lea.vmem %s5024_s1, %s3291_s14  ;;  %v365_v15 = vld [vmem:[%s5025_s2 + $0x8] sm:$0xf] }
  0x1e   : > { %v3842_v9 = vld [vmem:[%s3834_s22] sm:$0xff]  ;;  %v474_v16 = vld [vmem:[%s5027_s4 + $0x8] sm:$0xf]  ;;  %s5115_s24 = smov %s5114_s17  ;;  %s3908_s11 = smov 0  }
  0x1f   : > { %v3845_v10 = vld [vmem:[%s3839_s26] sm:$0xff]  ;;  %484 = vperm.xlu1 %3394, %v476_v7   ;;  %v379_v11 = vcombine.high %v3842_v9, %v3842_v9  ;;  %370 = vperm.xlu0 %3393, %v366_v8   ;;  %v586_v23 = vcombine.low %v3842_v9, %v3842_v9  ;;  %s3906_s25 = scalar_lea.vmem [#allocation12], %s5115_s24 }
  0x20   : > { %v3851_v12 = vcombine.high %v3845_v10, %v3845_v10  ;;  %v595_v26 = vcombine.low %v3845_v10, %v3845_v10 }
  0x21   : > { %3193 = vmatprep.subr.msk.mxu0 %vm387_vm1, %v379_v11 }
  0x22   : > { %3197 = vmatprep.subr.msk.mxu1 %vm387_vm1, %v3851_v12  ;;  %3194 = vmatpush1.msk.msra.mxu0 %vm387_vm1, %v3842_v9 }
  0x23   : > { %3198 = vmatpush1.msk.msra.mxu1 %vm387_vm1, %v3845_v10  ;;  %3195 = vmatmul.mubr.msk.f32.vlgmr.msra.gmra.mrb[0].mxu0 %vm380_vm2, %v364_v13 }
  0x24   : > { %3199 = vmatmul.mubr.msk.f32.vlgmr.msra.gmra.mrb[0].mxu1 %vm380_vm2, %v473_v14  ;;  %462 = vmatprep.mubr.f32.mxu0 %v5035_v1 }
  0x25   : > { %569 = vmatprep.mubr.f32.mxu1 %v5035_v1 }
  0x27   : > { %3196 = vmatmul.mubr.msk.f32.gmra.mrb[2].mxu0 %vm380_vm2, %v365_v15 }
  0x28   : > { %3200 = vmatmul.mubr.msk.f32.gmra.mrb[2].mxu1 %vm380_vm2, %v474_v16 }
  0x9a   : > { %v376_v17 = vpop.permute.xlu0 %375  ;;  %v480_v18 = vpop.permute.xlu1 %479 }
  0x9e   : > { %v371_v19 = vpop.permute.xlu0 %370  ;;  %v485_v32 = vpop.permute.xlu1 %484 }
  0xf6   : > { %v458_v20 = vpop.f32.mrb[0].mxu0 }
  0xf7   : > { %v565_v21 = vpop.f32.mrb[0].mxu1  ;;  %v459_v22 = vadd.f32 %v458_v20, %v371_v19  ;;  %v460_v24 = vpop.f32.mrb[1].mxu0 }
  0xf8   : > { %v566_v25 = vadd.f32 %v565_v21, %v480_v18  ;;  %v567_v27 = vpop.f32.mrb[1].mxu1  ;;  %v461_v28 = vadd.f32 %v460_v24, %v371_v19 }
  0xf9   : > { %v568_v29 = vadd.f32 %v567_v27, %v480_v18  ;;  %v469_v30 = vmax.f32 %v459_v22, 0.0 }
  0xfa   : > { %v576_v31 = vmax.f32 %v566_v25, 0.0  ;;  %v470_v33 = vmax.f32 %v461_v28, 0.0  ;;  %v464_v35 = vpop.f32.mrb[2].mxu0 }
  0xfb   : > { %v577_v34 = vmax.f32 %v568_v29, 0.0  ;;  %v571_v36 = vpop.f32.mrb[2].mxu1  ;;  %v3883_v37 = vadd.f32 %v469_v30, %v3842_v9  ;;  %v588_v38 = vadd.f32 %v586_v23, %v469_v30  ;;  %v466_v41 = vpop.f32.mrb[3].mxu0  ;;  %v465_v47 = vadd.f32 %v464_v35, %v376_v17 }
  0xfc   : > { %v3886_v39 = vadd.f32 %v576_v31, %v3845_v10  ;;  %v597_v40 = vadd.f32 %v595_v26, %v576_v31  ;;  %v573_v42 = vpop.f32.mrb[3].mxu1  ;;  %v3888_v43 = vadd.f32 %v470_v33, %v379_v11  ;;  %v589_v44 = vadd.f32 %v470_v33, %v3842_v9 }
  0xfd   : > { %5110 = vst [vmem:[#allocation18_spill] sm:$0xff] %v3883_v37  ;;  %v3892_v45 = vadd.f32 %v577_v34, %v3851_v12  ;;  %v598_v46 = vadd.f32 %v577_v34, %v3845_v10  ;;  %v572_v48 = vadd.f32 %v571_v36, %v485_v32  ;;  %v467_v49 = vadd.f32 %v466_v41, %v376_v17 }
  0xfe   : > { %5111 = vst [vmem:[#allocation19_spill] sm:$0xff] %v3886_v39  ;;  %5112 = vst [vmem:[#allocation20_spill] sm:$0xff] %v3888_v43  ;;  %v574_v50 = vadd.f32 %v573_v42, %v485_v32  ;;  %v592_v51 = vcombine.high %v588_v38, %v589_v44  ;;  %v471_v53 = vmax.f32 %v465_v47, 0.0 }
  0xff   : > { %5113 = vst [vmem:[#allocation21_spill] sm:$0xff] %v3892_v45  ;;  %v601_v52 = vcombine.high %v597_v40, %v598_v46  ;;  %v578_v54 = vmax.f32 %v572_v48, 0.0  ;;  %v472_v55 = vmax.f32 %v467_v49, 0.0 }
 0x100   : > { %v579_v56 = vmax.f32 %v574_v50, 0.0  ;;  %594 = vst [vmem:[#allocation2] sm:$0xff] %v592_v51  ;;  %v606_v57 = vadd.f32 %v471_v53, %v3842_v9 }
 0x101   : > { %603 = vst [vmem:[#allocation3] sm:$0xff] %v601_v52  ;;  %v607_v58 = vadd.f32 %v472_v55, %v379_v11  ;;  %v604_v60 = vadd.f32 %v578_v54, %v3845_v10 }
 0x102   : > { %v610_v59 = vrot.slane %v606_v57, 4  ;;  %v605_v62 = vadd.f32 %v579_v56, %v3851_v12 }
 0x103   : > { %v611_v61 = vrot.slane %v607_v58, 4 }
 0x104   : > { %v614_v63 = vsel %vm387_vm1, %v604_v60, %v610_v59 }
 0x105   : > { %v615_v4 = vsel %vm387_vm1, %v605_v62, %v611_v61  ;;  %616 = vst [vmem:[#allocation4] sm:$0xff] %v614_v63 }
 0x106   : > { %617 = vst [vmem:[#allocation4 + $0x8] sm:$0xff] %v615_v4 }
 0x107 LB: >> { %3204 = vmatprep.subr.msk.mxu0 %vm387_vm1, %v3888_v43  ;;  %3222 = vmatprep.subr.msk.mxu1 %vm387_vm1, %v3892_v45  ;;  %v3689_v5 = vmov 0.0   ;;  %s3201_s18 = sshll.u32 %s3680_s11, 7  ;;  %s633_s11 = sadd.s32 1, %s3680_s11   ;;  %s3680_s11 = sphi %s3908_s11, %s633_s11  }
 0x108   : >> { %3205 = vmatpush1.msk.msra.mxu0 %vm387_vm1, %v3883_v37  ;;  %793 = vmatprep.mubr.f32.mxu0 %v3689_v5  ;;  %s635_s27 = sshra.s32 %s3201_s18, 7  ;;  %p630_p11 = scmp.ge.s32.totalorder %s633_s11, 2  }
 0x109   : >> { %3223 = vmatpush1.msk.msra.mxu1 %vm387_vm1, %v3886_v39  ;;  %1040 = vmatprep.mubr.f32.mxu1 %v3689_v5  ;;  %s3202_s28 = sshll.u32 %s635_s27, 2  ;;  %s4041_s16 = smov (%p630_p11), 0  }
 0x10a   : >> { %s638_s29 = scalar_lea.vmem [#allocation2], %s3202_s28  ;;  %s641_s14 = scalar_lea.vmem [#allocation3], %s3202_s28 }
 0x10b   : >> { %v639_v6 = vld [vmem:[%s638_s29] sm:$0xf] }
 0x10c   : >> { %643 = vxpose.xlu0.b32.start.end [1/1] (short) %v639_v6, 128  ;;  %v642_v7 = vld [vmem:[%s641_s14] sm:$0xf] }
 0x149   : >> { %890 = vxpose.xlu0.b32.start.end [1/1] (short) %v642_v7, 128 }
 0x18c   : >> { %v659_v8 = vpop.trf.xlu0 }
 0x18d   : >> { %3206 = vmatmul.mubr.msk.f32.vlgmr.msra.gmra.mrb[0].mxu0 %vm380_vm2, %v659_v8 }
 0x18e   : >> { %799 = vmatprep.mubr.f32.mxu0 %v3689_v5 }
 0x190   : >> { %v660_v9 = vpop.trf.xlu0 }
 0x191   : >> { %3207 = vmatmul.mubr.msk.f32.gmra.mrb[2].mxu0 %vm380_vm2, %v660_v9 }
 0x192   : >> { %805 = vmatprep.mubr.f32.mxu0 %v3689_v5 }
 0x194   : >> { %v661_v10 = vpop.trf.xlu0 }
 0x195   : >> { %3208 = vmatmul.mubr.msk.f32.gmra.mrb[4].mxu0 %vm380_vm2, %v661_v10 }
 0x196   : >> { %811 = vmatprep.mubr.f32.mxu0 %v3689_v5 }
 0x198   : >> { %v662_v11 = vpop.trf.xlu0 }
 0x199   : >> { %3209 = vmatmul.mubr.msk.f32.gmra.mrb[6].mxu0 %vm380_vm2, %v662_v11 }
 0x19a   : >> { %817 = vmatprep.mubr.f32.mxu0 %v3689_v5 }
 0x19c   : >> { %v663_v12 = vpop.trf.xlu0 }
 0x19d   : >> { %3210 = vmatmul.mubr.msk.f32.gmra.mrb[8].mxu0 %vm380_vm2, %v663_v12 }
 0x19e   : >> { %823 = vmatprep.mubr.f32.mxu0 %v3689_v5 }
 0x1a0   : >> { %v664_v13 = vpop.trf.xlu0 }
 0x1a1   : >> { %3211 = vmatmul.mubr.msk.f32.gmra.mrb[10].mxu0 %vm380_vm2, %v664_v13 }
 0x1a2   : >> { %829 = vmatprep.mubr.f32.mxu0 %v3689_v5 }
 0x1a4   : >> { %v665_v14 = vpop.trf.xlu0 }
 0x1a5   : >> { %3212 = vmatmul.mubr.msk.f32.gmra.mrb[12].mxu0 %vm380_vm2, %v665_v14 }
 0x1a6   : >> { %835 = vmatprep.mubr.f32.mxu0 %v3689_v5 }
 0x1a8   : >> { %v666_v15 = vpop.trf.xlu0 }
 0x1a9   : >> { %3213 = vmatmul.mubr.msk.f32.gmra.mrb[14].mxu0 %vm380_vm2, %v666_v15 }
 0x1aa   : >> { %841 = vmatprep.mubr.f32.mxu0 %v3689_v5 }
 0x1ac   : >> { %v667_v16 = vpop.trf.xlu0 }
 0x1ad   : >> { %3214 = vmatmul.mubr.msk.f32.gmra.mrb[16].mxu0 %vm380_vm2, %v667_v16 }
 0x1ae   : >> { %847 = vmatprep.mubr.f32.mxu0 %v3689_v5 }
 0x1b0   : >> { %v668_v17 = vpop.trf.xlu0 }
 0x1b1   : >> { %3215 = vmatmul.mubr.msk.f32.gmra.mrb[18].mxu0 %vm380_vm2, %v668_v17 }
 0x1b2   : >> { %853 = vmatprep.mubr.f32.mxu0 %v3689_v5 }
 0x1b4   : >> { %v669_v18 = vpop.trf.xlu0 }
 0x1b5   : >> { %3216 = vmatmul.mubr.msk.f32.gmra.mrb[20].mxu0 %vm380_vm2, %v669_v18 }
 0x1b6   : >> { %859 = vmatprep.mubr.f32.mxu0 %v3689_v5 }
 0x1b8   : >> { %v670_v19 = vpop.trf.xlu0 }
 0x1b9   : >> { %3217 = vmatmul.mubr.msk.f32.gmra.mrb[22].mxu0 %vm380_vm2, %v670_v19 }
 0x1ba   : >> { %865 = vmatprep.mubr.f32.mxu0 %v3689_v5 }
 0x1bc   : >> { %v671_v20 = vpop.trf.xlu0 }
 0x1bd   : >> { %3218 = vmatmul.mubr.msk.f32.gmra.mrb[24].mxu0 %vm380_vm2, %v671_v20 }
 0x1be   : >> { %871 = vmatprep.mubr.f32.mxu0 %v3689_v5 }
 0x1c0   : >> { %v672_v21 = vpop.trf.xlu0 }
 0x1c1   : >> { %3219 = vmatmul.mubr.msk.f32.gmra.mrb[26].mxu0 %vm380_vm2, %v672_v21 }
 0x1c2   : >> { %877 = vmatprep.mubr.f32.mxu0 %v3689_v5 }
 0x1c4   : >> { %v673_v22 = vpop.trf.xlu0 }
 0x1c5   : >> { %3220 = vmatmul.mubr.msk.f32.gmra.mrb[28].mxu0 %vm380_vm2, %v673_v22 }
 0x1c6   : >> { %883 = vmatprep.mubr.f32.mxu0 %v3689_v5 }
 0x1c8   : >> { %v674_v23 = vpop.trf.xlu0 }
 0x1c9   : >> { %3221 = vmatmul.mubr.msk.f32.gmra.mrb[30].mxu0 %vm380_vm2, %v674_v23 }
 0x1cc   : >> { %v906_v24 = vpop.trf.xlu0 }
 0x1cd   : >> { %3224 = vmatmul.mubr.msk.f32.vlgmr.msra.gmra.mrb[0].mxu1 %vm380_vm2, %v906_v24 }
 0x1ce   : >> { %1046 = vmatprep.mubr.f32.mxu1 %v3689_v5 }
 0x1d0   : >> { %v907_v25 = vpop.trf.xlu0 }
 0x1d1   : >> { %3225 = vmatmul.mubr.msk.f32.gmra.mrb[2].mxu1 %vm380_vm2, %v907_v25 }
 0x1d2   : >> { %1052 = vmatprep.mubr.f32.mxu1 %v3689_v5 }
 0x1d4   : >> { %v908_v26 = vpop.trf.xlu0 }
 0x1d5   : >> { %3226 = vmatmul.mubr.msk.f32.gmra.mrb[4].mxu1 %vm380_vm2, %v908_v26 }
 0x1d6   : >> { %1058 = vmatprep.mubr.f32.mxu1 %v3689_v5 }
 0x1d8   : >> { %v909_v27 = vpop.trf.xlu0 }
 0x1d9   : >> { %3227 = vmatmul.mubr.msk.f32.gmra.mrb[6].mxu1 %vm380_vm2, %v909_v27 }
 0x1da   : >> { %1064 = vmatprep.mubr.f32.mxu1 %v3689_v5 }
 0x1dc   : >> { %v910_v28 = vpop.trf.xlu0 }
 0x1dd   : >> { %3228 = vmatmul.mubr.msk.f32.gmra.mrb[8].mxu1 %vm380_vm2, %v910_v28 }
 0x1de   : >> { %1070 = vmatprep.mubr.f32.mxu1 %v3689_v5 }
 0x1e0   : >> { %v911_v29 = vpop.trf.xlu0 }
 0x1e1   : >> { %3229 = vmatmul.mubr.msk.f32.gmra.mrb[10].mxu1 %vm380_vm2, %v911_v29 }
 0x1e2   : >> { %1076 = vmatprep.mubr.f32.mxu1 %v3689_v5 }
 0x1e4   : >> { %v912_v30 = vpop.trf.xlu0 }
 0x1e5   : >> { %3230 = vmatmul.mubr.msk.f32.gmra.mrb[12].mxu1 %vm380_vm2, %v912_v30 }
 0x1e6   : >> { %1082 = vmatprep.mubr.f32.mxu1 %v3689_v5 }
 0x1e8   : >> { %v913_v31 = vpop.trf.xlu0 }
 0x1e9   : >> { %3231 = vmatmul.mubr.msk.f32.gmra.mrb[14].mxu1 %vm380_vm2, %v913_v31 }
 0x1ea   : >> { %1088 = vmatprep.mubr.f32.mxu1 %v3689_v5 }
 0x1ec   : >> { %v914_v32 = vpop.trf.xlu0 }
 0x1ed   : >> { %3232 = vmatmul.mubr.msk.f32.gmra.mrb[16].mxu1 %vm380_vm2, %v914_v32 }
 0x1ee   : >> { %1094 = vmatprep.mubr.f32.mxu1 %v3689_v5 }
 0x1f0   : >> { %v915_v33 = vpop.trf.xlu0 }
 0x1f1   : >> { %3233 = vmatmul.mubr.msk.f32.gmra.mrb[18].mxu1 %vm380_vm2, %v915_v33 }
 0x1f2   : >> { %1100 = vmatprep.mubr.f32.mxu1 %v3689_v5 }
 0x1f4   : >> { %v916_v34 = vpop.trf.xlu0 }
 0x1f5   : >> { %3234 = vmatmul.mubr.msk.f32.gmra.mrb[20].mxu1 %vm380_vm2, %v916_v34 }
 0x1f6   : >> { %1106 = vmatprep.mubr.f32.mxu1 %v3689_v5 }
 0x1f8   : >> { %v917_v35 = vpop.trf.xlu0 }
 0x1f9   : >> { %3235 = vmatmul.mubr.msk.f32.gmra.mrb[22].mxu1 %vm380_vm2, %v917_v35 }
 0x1fa   : >> { %1112 = vmatprep.mubr.f32.mxu1 %v3689_v5 }
 0x1fc   : >> { %v918_v36 = vpop.trf.xlu0 }
 0x1fd   : >> { %3236 = vmatmul.mubr.msk.f32.gmra.mrb[24].mxu1 %vm380_vm2, %v918_v36 }
 0x1fe   : >> { %1118 = vmatprep.mubr.f32.mxu1 %v3689_v5 }
 0x200   : >> { %v919_v38 = vpop.trf.xlu0 }
 0x201   : >> { %3237 = vmatmul.mubr.msk.f32.gmra.mrb[26].mxu1 %vm380_vm2, %v919_v38 }
 0x202   : >> { %1124 = vmatprep.mubr.f32.mxu1 %v3689_v5 }
 0x204   : >> { %v920_v40 = vpop.trf.xlu0 }
 0x205   : >> { %3238 = vmatmul.mubr.msk.f32.gmra.mrb[28].mxu1 %vm380_vm2, %v920_v40 }
 0x206   : >> { %1130 = vmatprep.mubr.f32.mxu1 %v3689_v5 }
 0x208   : >> { %v921_v41 = vpop.trf.xlu0 }
 0x209   : >> { %3239 = vmatmul.mubr.msk.f32.gmra.mrb[30].mxu1 %vm380_vm2, %v921_v41 }
 0x260   : >> { %v795_v42 = vpop.f32.mrb[0].mxu0 }
 0x261   : >> { %v797_v44 = vpop.f32.mrb[1].mxu0  ;;  %v1138_v47 = vmul.f32 %v795_v42, %v795_v42 }
 0x262   : >> { %v1139_v50 = vmul.f32 %v797_v44, %v797_v44 }
 0x264   : >> { %v801_v46 = vpop.f32.mrb[2].mxu0 }
 0x265   : >> { %v1140_v48 = vmul.f32 %v801_v46, %v801_v46  ;;  %v803_v49 = vpop.f32.mrb[3].mxu0 }
 0x266   : >> { %v1141_v51 = vmul.f32 %v803_v49, %v803_v49 }
 0x267   : >> { %v1170_v52 = vadd.f32 %v1140_v48, %v1138_v47 }
 0x268   : >> { %v1191_v53 = vadd.f32 %v1141_v51, %v1139_v50  ;;  %v807_v54 = vpop.f32.mrb[4].mxu0 }
 0x269   : >> { %v1142_v55 = vmul.f32 %v807_v54, %v807_v54  ;;  %v1328_v56 = vmax.f32 %v795_v42, %v807_v54  ;;  %v809_v57 = vpop.f32.mrb[5].mxu0 }
 0x26a   : >> { %v1143_v58 = vmul.f32 %v809_v57, %v809_v57  ;;  %v1349_v59 = vmax.f32 %v797_v44, %v809_v57 }
 0x26b   : >> { %v1171_v60 = vadd.f32 %v1170_v52, %v1142_v55 }
 0x26c   : >> { %v1192_v61 = vadd.f32 %v1191_v53, %v1143_v58  ;;  %v813_v62 = vpop.f32.mrb[6].mxu0 }
 0x26d   : >> { %v1144_v63 = vmul.f32 %v813_v62, %v813_v62  ;;  %v1329_v4 = vmax.f32 %v801_v46, %v813_v62  ;;  %v815_v5 = vpop.f32.mrb[7].mxu0 }
 0x26e   : >> { %v1145_v6 = vmul.f32 %v815_v5, %v815_v5  ;;  %v1350_v7 = vmax.f32 %v803_v49, %v815_v5 }
 0x26f   : >> { %v1172_v8 = vadd.f32 %v1171_v60, %v1144_v63 }
 0x270   : >> { %v1193_v9 = vadd.f32 %v1192_v61, %v1145_v6  ;;  %v819_v10 = vpop.f32.mrb[8].mxu0 }
 0x271   : >> { %v1146_v11 = vmul.f32 %v819_v10, %v819_v10  ;;  %v1330_v12 = vmax.f32 %v1328_v56, %v819_v10  ;;  %v821_v13 = vpop.f32.mrb[9].mxu0 }
 0x272   : >> { %v1147_v14 = vmul.f32 %v821_v13, %v821_v13  ;;  %v1351_v15 = vmax.f32 %v1349_v59, %v821_v13 }
 0x273   : >> { %v1173_v16 = vadd.f32 %v1172_v8, %v1146_v11 }
 0x274   : >> { %v1194_v17 = vadd.f32 %v1193_v9, %v1147_v14  ;;  %v825_v18 = vpop.f32.mrb[10].mxu0 }
 0x275   : >> { %v1148_v19 = vmul.f32 %v825_v18, %v825_v18  ;;  %v1331_v20 = vmax.f32 %v1329_v4, %v825_v18  ;;  %v827_v21 = vpop.f32.mrb[11].mxu0 }
 0x276   : >> { %v1149_v22 = vmul.f32 %v827_v21, %v827_v21  ;;  %v1352_v23 = vmax.f32 %v1350_v7, %v827_v21 }
 0x277   : >> { %v1174_v24 = vadd.f32 %v1173_v16, %v1148_v19 }
 0x278   : >> { %v1195_v25 = vadd.f32 %v1194_v17, %v1149_v22  ;;  %v831_v26 = vpop.f32.mrb[12].mxu0 }
 0x279   : >> { %v1150_v27 = vmul.f32 %v831_v26, %v831_v26  ;;  %v1332_v28 = vmax.f32 %v1330_v12, %v831_v26  ;;  %v833_v29 = vpop.f32.mrb[13].mxu0 }
 0x27a   : >> { %v1151_v30 = vmul.f32 %v833_v29, %v833_v29  ;;  %v1353_v31 = vmax.f32 %v1351_v15, %v833_v29 }
 0x27b   : >> { %v1175_v32 = vadd.f32 %v1174_v24, %v1150_v27 }
 0x27c   : >> { %v1196_v33 = vadd.f32 %v1195_v25, %v1151_v30  ;;  %v837_v34 = vpop.f32.mrb[14].mxu0 }
 0x27d   : >> { %v1152_v35 = vmul.f32 %v837_v34, %v837_v34  ;;  %v1333_v36 = vmax.f32 %v1331_v20, %v837_v34  ;;  %v839_v38 = vpop.f32.mrb[15].mxu0 }
 0x27e   : >> { %v1153_v40 = vmul.f32 %v839_v38, %v839_v38  ;;  %v1354_v41 = vmax.f32 %v1352_v23, %v839_v38 }
 0x27f   : >> { %v1176_v42 = vadd.f32 %v1175_v32, %v1152_v35 }
 0x280   : >> { %v1197_v44 = vadd.f32 %v1196_v33, %v1153_v40  ;;  %v843_v46 = vpop.f32.mrb[16].mxu0 }
 0x281   : >> { %v1154_v47 = vmul.f32 %v843_v46, %v843_v46  ;;  %v1334_v48 = vmax.f32 %v1332_v28, %v843_v46  ;;  %v845_v49 = vpop.f32.mrb[17].mxu0 }
 0x282   : >> { %v1155_v50 = vmul.f32 %v845_v49, %v845_v49  ;;  %v1355_v51 = vmax.f32 %v1353_v31, %v845_v49 }
 0x283   : >> { %v1177_v52 = vadd.f32 %v1176_v42, %v1154_v47 }
 0x284   : >> { %v1198_v53 = vadd.f32 %v1197_v44, %v1155_v50  ;;  %v849_v54 = vpop.f32.mrb[18].mxu0 }
 0x285   : >> { %v1156_v55 = vmul.f32 %v849_v54, %v849_v54  ;;  %v1335_v56 = vmax.f32 %v1333_v36, %v849_v54  ;;  %v851_v57 = vpop.f32.mrb[19].mxu0 }
 0x286   : >> { %v1157_v58 = vmul.f32 %v851_v57, %v851_v57  ;;  %v1356_v59 = vmax.f32 %v1354_v41, %v851_v57 }
 0x287   : >> { %v1178_v60 = vadd.f32 %v1177_v52, %v1156_v55 }
 0x288   : >> { %v1199_v61 = vadd.f32 %v1198_v53, %v1157_v58  ;;  %v855_v62 = vpop.f32.mrb[20].mxu0 }
 0x289   : >> { %v1158_v63 = vmul.f32 %v855_v62, %v855_v62  ;;  %v1336_v4 = vmax.f32 %v1334_v48, %v855_v62  ;;  %v857_v5 = vpop.f32.mrb[21].mxu0 }
 0x28a   : >> { %v1159_v6 = vmul.f32 %v857_v5, %v857_v5  ;;  %v1357_v7 = vmax.f32 %v1355_v51, %v857_v5 }
 0x28b   : >> { %v1179_v8 = vadd.f32 %v1178_v60, %v1158_v63 }
 0x28c   : >> { %v1200_v9 = vadd.f32 %v1199_v61, %v1159_v6  ;;  %v861_v10 = vpop.f32.mrb[22].mxu0 }
 0x28d   : >> { %v1160_v11 = vmul.f32 %v861_v10, %v861_v10  ;;  %v1337_v12 = vmax.f32 %v1335_v56, %v861_v10  ;;  %v863_v13 = vpop.f32.mrb[23].mxu0 }
 0x28e   : >> { %v1161_v14 = vmul.f32 %v863_v13, %v863_v13  ;;  %v1358_v15 = vmax.f32 %v1356_v59, %v863_v13 }
 0x28f   : >> { %v1180_v16 = vadd.f32 %v1179_v8, %v1160_v11 }
 0x290   : >> { %v1201_v17 = vadd.f32 %v1200_v9, %v1161_v14  ;;  %v867_v18 = vpop.f32.mrb[24].mxu0 }
 0x291   : >> { %v1162_v19 = vmul.f32 %v867_v18, %v867_v18  ;;  %v1338_v20 = vmax.f32 %v1336_v4, %v867_v18  ;;  %v869_v21 = vpop.f32.mrb[25].mxu0  ;;  %v3690_v4 = vmov 1966171168  }
 0x292   : >> { %v1163_v22 = vmul.f32 %v869_v21, %v869_v21  ;;  %v1359_v23 = vmax.f32 %v1357_v7, %v869_v21  ;;  %v1216_v5 = vunpack.c.l.s4 %v3690_v4 }
 0x293   : >> { %v1181_v24 = vadd.f32 %v1180_v16, %v1162_v19 }
 0x294   : >> { %v1202_v25 = vadd.f32 %v1201_v17, %v1163_v22  ;;  %v873_v26 = vpop.f32.mrb[26].mxu0 }
 0x295   : >> { %v1164_v27 = vmul.f32 %v873_v26, %v873_v26  ;;  %v1339_v28 = vmax.f32 %v1337_v12, %v873_v26  ;;  %v875_v29 = vpop.f32.mrb[27].mxu0 }
 0x296   : >> { %v1165_v30 = vmul.f32 %v875_v29, %v875_v29  ;;  %v1360_v31 = vmax.f32 %v1358_v15, %v875_v29 }
 0x297   : >> { %v1182_v32 = vadd.f32 %v1181_v24, %v1164_v27 }
 0x298   : >> { %v1203_v33 = vadd.f32 %v1202_v25, %v1165_v30  ;;  %v879_v34 = vpop.f32.mrb[28].mxu0 }
 0x299   : >> { %v1166_v35 = vmul.f32 %v879_v34, %v879_v34  ;;  %v1340_v36 = vmax.f32 %v1338_v20, %v879_v34  ;;  %v881_v38 = vpop.f32.mrb[29].mxu0  ;;  %v1217_v20 = vunpack.c.0.s8 %v1216_v5 }
 0x29a   : >> { %v1167_v40 = vmul.f32 %v881_v38, %v881_v38  ;;  %v1361_v41 = vmax.f32 %v1359_v23, %v881_v38  ;;  %v4003_v23 = vshrl.u32 %v620_v0, 7 }
 0x29b   : >> { %v1183_v42 = vadd.f32 %v1182_v32, %v1166_v35 }
 0x29c   : >> { %v1204_v44 = vadd.f32 %v1203_v33, %v1167_v40  ;;  %v885_v46 = vpop.f32.mrb[30].mxu0  ;;  %5116 = vst [vmem:[#allocation22_spill] sm:$0xff] %v4003_v23 }
 0x29d   : >> { %v1168_v47 = vmul.f32 %v885_v46, %v885_v46  ;;  %v1341_v48 = vmax.f32 %v1339_v28, %v885_v46  ;;  %v887_v49 = vpop.f32.mrb[31].mxu0 }
 0x29e   : >> { %v1169_v50 = vmul.f32 %v887_v49, %v887_v49  ;;  %v1362_v51 = vmax.f32 %v1360_v31, %v887_v49 }
 0x29f   : >> { %v1184_v52 = vadd.f32 %v1183_v42, %v1168_v47  ;;  %v1342_v53 = vmax.f32 %v1340_v36, %v1341_v48  ;;  %v4008_v42 = vsub.s32 %v1217_v20, %v4003_v23 }
 0x2a0   : >> { %v1205_v54 = vadd.f32 %v1204_v44, %v1169_v50  ;;  %v1363_v55 = vmax.f32 %v1361_v41, %v1362_v51  ;;  %v3986_v56 = vpop.f32.mrb[0].mxu1 }
 0x2a1   : >> { %v1185_v57 = vrot.slane %v1184_v52, 4  ;;  %v1343_v58 = vrot.slane %v1342_v53, 4  ;;  %v3988_v59 = vpop.f32.mrb[1].mxu1  ;;  %v1233_v11 = vmul.f32 %v3986_v56, %v3986_v56 }
 0x2a2   : >> { %v1206_v60 = vrot.slane %v1205_v54, 4  ;;  %v1364_v61 = vrot.slane %v1363_v55, 4  ;;  %v1234_v16 = vmul.f32 %v3988_v59, %v3988_v59 }
 0x2a3   : >> { %v1186_v62 = vadd.f32 %v1185_v57, %v1184_v52  ;;  %v1344_v63 = vmax.f32 %v1342_v53, %v1343_v58 }
 0x2a4   : >> { %v1207_v6 = vadd.f32 %v1206_v60, %v1205_v54  ;;  %v1365_v7 = vmax.f32 %v1363_v55, %v1364_v61  ;;  %v3990_v8 = vpop.f32.mrb[2].mxu1  ;;  %v1137_v60 = vld [vmem:[#allocation6] sm:$0x3]  ;;  %v1327_v61 = vld [vmem:[#allocation8] sm:$0x3] }
 0x2a5   : >> { %v1187_v9 = vrot.slane %v1186_v62, 2  ;;  %v1345_v10 = vrot.slane %v1344_v63, 2  ;;  %v1235_v12 = vmul.f32 %v3990_v8, %v3990_v8  ;;  %v3996_v13 = vpop.f32.mrb[3].mxu1 }
 0x2a6   : >> { %v1208_v14 = vrot.slane %v1207_v6, 2  ;;  %v1366_v15 = vrot.slane %v1365_v7, 2  ;;  %v1236_v17 = vmul.f32 %v3996_v13, %v3996_v13 }
 0x2a7   : >> { %v1188_v18 = vadd.f32 %v1187_v9, %v1186_v62  ;;  %v1346_v19 = vmax.f32 %v1344_v63, %v1345_v10  ;;  %v1265_v21 = vadd.f32 %v1235_v12, %v1233_v11 }
 0x2a8   : >> { %v1209_v22 = vadd.f32 %v1208_v14, %v1207_v6  ;;  %v1367_v24 = vmax.f32 %v1365_v7, %v1366_v15  ;;  %v1286_v25 = vadd.f32 %v1236_v17, %v1234_v16  ;;  %v1054_v26 = vpop.f32.mrb[4].mxu1 }
 0x2a9   : >> { %v1189_v27 = vrot.slane %v1188_v18, 1  ;;  %v1347_v28 = vrot.slane %v1346_v19, 1  ;;  %v1237_v29 = vmul.f32 %v1054_v26, %v1054_v26  ;;  %v1391_v30 = vmax.f32 %v3986_v56, %v1054_v26  ;;  %v1056_v31 = vpop.f32.mrb[5].mxu1 }
 0x2aa   : >> { %v1210_v32 = vrot.slane %v1209_v22, 1  ;;  %v1368_v33 = vrot.slane %v1367_v24, 1  ;;  %v1238_v34 = vmul.f32 %v1056_v31, %v1056_v31  ;;  %v1412_v35 = vmax.f32 %v3988_v59, %v1056_v31 }
 0x2ab   : >> { %v1190_v36 = vadd.f32 %v1189_v27, %v1188_v18  ;;  %v1348_v38 = vmax.f32 %v1346_v19, %v1347_v28  ;;  %v1266_v40 = vadd.f32 %v1265_v21, %v1237_v29 }
 0x2ac   : >> { %v1211_v41 = vadd.f32 %v1210_v32, %v1209_v22  ;;  %v1369_v44 = vmax.f32 %v1367_v24, %v1368_v33  ;;  %v1287_v46 = vadd.f32 %v1286_v25, %v1238_v34  ;;  %v1060_v47 = vpop.f32.mrb[6].mxu1 }
 0x2ad   : >> { %v1239_v48 = vmul.f32 %v1060_v47, %v1060_v47  ;;  %v1392_v49 = vmax.f32 %v3990_v8, %v1060_v47  ;;  %v1062_v50 = vpop.f32.mrb[7].mxu1 }
 0x2ae   : >> { %v1214_v51 = vcombine.low %v1190_v36, %v1211_v41  ;;  %v1372_v52 = vcombine.low %v1348_v38, %v1369_v44  ;;  %v1240_v53 = vmul.f32 %v1062_v50, %v1062_v50  ;;  %v1413_v54 = vmax.f32 %v3996_v13, %v1062_v50 }
 0x2af   : >> { %v1267_v55 = vadd.f32 %v1266_v40, %v1239_v48 }
 0x2b0   : >> { %v1221_v56 = vrot.slane %v1214_v51, %v4008_v42  ;;  %v1379_v57 = vrot.slane %v1372_v52, %v4008_v42  ;;  %v1288_v58 = vadd.f32 %v1287_v46, %v1240_v53  ;;  %v1066_v59 = vpop.f32.mrb[8].mxu1 }
 0x2b1   : >> { %v1241_v62 = vmul.f32 %v1066_v59, %v1066_v59  ;;  %v1393_v63 = vmax.f32 %v1391_v30, %v1066_v59  ;;  %v1068_v4 = vpop.f32.mrb[9].mxu1 }
 0x2b2   : >> { %v1228_v5 = vrot.slane %v1221_v56, %v4008_v42  ;;  %v1386_v6 = vrot.slane %v1379_v57, %v4008_v42  ;;  %v1242_v7 = vmul.f32 %v1068_v4, %v1068_v4  ;;  %v1414_v8 = vmax.f32 %v1412_v35, %v1068_v4 }
 0x2b3   : >> { %v1268_v9 = vadd.f32 %v1267_v55, %v1241_v62 }
 0x2b4   : >> { %v1230_v10 = vadd.f32 %v1228_v5, %v1137_v60  ;;  %v1388_v11 = vmax.f32 %v1327_v61, %v1386_v6  ;;  %v1289_v12 = vadd.f32 %v1288_v58, %v1242_v7  ;;  %v1072_v13 = vpop.f32.mrb[10].mxu1 }
 0x2b5   : >> { %v1243_v14 = vmul.f32 %v1072_v13, %v1072_v13  ;;  %v1394_v15 = vmax.f32 %v1392_v49, %v1072_v13  ;;  %v1074_v16 = vpop.f32.mrb[11].mxu1 }
 0x2b6   : >> { %1231 = vst.msk [vmem:[#allocation6] sm:$0x3] %vm3802_vm0, %v1230_v10  ;;  %1389 = vst.msk [vmem:[#allocation8] sm:$0x3] %vm3802_vm0, %v1388_v11  ;;  %v1244_v17 = vmul.f32 %v1074_v16, %v1074_v16  ;;  %v1415_v18 = vmax.f32 %v1413_v54, %v1074_v16 }
 0x2b7   : >> { %v1269_v19 = vadd.f32 %v1268_v9, %v1243_v14 }
 0x2b8   : >> { %v1290_v20 = vadd.f32 %v1289_v12, %v1244_v17  ;;  %v1078_v21 = vpop.f32.mrb[12].mxu1 }
 0x2b9   : >> { %v1245_v22 = vmul.f32 %v1078_v21, %v1078_v21  ;;  %v1395_v24 = vmax.f32 %v1393_v63, %v1078_v21  ;;  %v1080_v25 = vpop.f32.mrb[13].mxu1 }
 0x2ba   : >> { %v1246_v26 = vmul.f32 %v1080_v25, %v1080_v25  ;;  %v1416_v27 = vmax.f32 %v1414_v8, %v1080_v25 }
 0x2bb   : >> { %v1270_v28 = vadd.f32 %v1269_v19, %v1245_v22 }
 0x2bc   : >> { %v1291_v29 = vadd.f32 %v1290_v20, %v1246_v26  ;;  %v1084_v30 = vpop.f32.mrb[14].mxu1 }
 0x2bd   : >> { %v1247_v31 = vmul.f32 %v1084_v30, %v1084_v30  ;;  %v1396_v32 = vmax.f32 %v1394_v15, %v1084_v30  ;;  %v1086_v33 = vpop.f32.mrb[15].mxu1 }
 0x2be   : >> { %v1248_v34 = vmul.f32 %v1086_v33, %v1086_v33  ;;  %v1417_v35 = vmax.f32 %v1415_v18, %v1086_v33 }
 0x2bf   : >> { %v1271_v36 = vadd.f32 %v1270_v28, %v1247_v31 }
 0x2c0   : >> { %v1292_v38 = vadd.f32 %v1291_v29, %v1248_v34  ;;  %v1090_v40 = vpop.f32.mrb[16].mxu1 }
 0x2c1   : >> { %v1249_v41 = vmul.f32 %v1090_v40, %v1090_v40  ;;  %v1397_v44 = vmax.f32 %v1395_v24, %v1090_v40  ;;  %v1092_v46 = vpop.f32.mrb[17].mxu1 }
 0x2c2   : >> { %v1250_v47 = vmul.f32 %v1092_v46, %v1092_v46  ;;  %v1418_v48 = vmax.f32 %v1416_v27, %v1092_v46 }
 0x2c3   : >> { %v1272_v49 = vadd.f32 %v1271_v36, %v1249_v41 }
 0x2c4   : >> { %v1293_v50 = vadd.f32 %v1292_v38, %v1250_v47  ;;  %v1096_v51 = vpop.f32.mrb[18].mxu1 }
 0x2c5   : >> { %v1251_v52 = vmul.f32 %v1096_v51, %v1096_v51  ;;  %v1398_v53 = vmax.f32 %v1396_v32, %v1096_v51  ;;  %v1098_v54 = vpop.f32.mrb[19].mxu1 }
 0x2c6   : >> { %v1252_v55 = vmul.f32 %v1098_v54, %v1098_v54  ;;  %v1419_v56 = vmax.f32 %v1417_v35, %v1098_v54 }
 0x2c7   : >> { %v1273_v57 = vadd.f32 %v1272_v49, %v1251_v52 }
 0x2c8   : >> { %v1294_v58 = vadd.f32 %v1293_v50, %v1252_v55  ;;  %v1102_v59 = vpop.f32.mrb[20].mxu1 }
 0x2c9   : >> { %v1253_v60 = vmul.f32 %v1102_v59, %v1102_v59  ;;  %v1399_v61 = vmax.f32 %v1397_v44, %v1102_v59  ;;  %v1104_v62 = vpop.f32.mrb[21].mxu1 }
 0x2ca   : >> { %v1254_v63 = vmul.f32 %v1104_v62, %v1104_v62  ;;  %v1420_v4 = vmax.f32 %v1418_v48, %v1104_v62 }
 0x2cb   : >> { %v1274_v5 = vadd.f32 %v1273_v57, %v1253_v60 }
 0x2cc   : >> { %v1295_v6 = vadd.f32 %v1294_v58, %v1254_v63  ;;  %v1108_v7 = vpop.f32.mrb[22].mxu1 }
 0x2cd   : >> { %v1255_v8 = vmul.f32 %v1108_v7, %v1108_v7  ;;  %v1400_v9 = vmax.f32 %v1398_v53, %v1108_v7  ;;  %v1110_v10 = vpop.f32.mrb[23].mxu1 }
 0x2ce   : >> { %v1256_v11 = vmul.f32 %v1110_v10, %v1110_v10  ;;  %v1421_v12 = vmax.f32 %v1419_v56, %v1110_v10 }
 0x2cf   : >> { %v1275_v13 = vadd.f32 %v1274_v5, %v1255_v8 }
 0x2d0   : >> { %v1296_v14 = vadd.f32 %v1295_v6, %v1256_v11  ;;  %v1114_v15 = vpop.f32.mrb[24].mxu1 }
 0x2d1   : >> { %v1257_v16 = vmul.f32 %v1114_v15, %v1114_v15  ;;  %v1401_v17 = vmax.f32 %v1399_v61, %v1114_v15  ;;  %v1116_v18 = vpop.f32.mrb[25].mxu1 }
 0x2d2   : >> { %v1258_v19 = vmul.f32 %v1116_v18, %v1116_v18  ;;  %v1422_v20 = vmax.f32 %v1420_v4, %v1116_v18 }
 0x2d3   : >> { %v1276_v21 = vadd.f32 %v1275_v13, %v1257_v16 }
 0x2d4   : >> { %v1297_v22 = vadd.f32 %v1296_v14, %v1258_v19  ;;  %v1120_v24 = vpop.f32.mrb[26].mxu1 }
 0x2d5   : >> { %v1259_v25 = vmul.f32 %v1120_v24, %v1120_v24  ;;  %v1402_v26 = vmax.f32 %v1400_v9, %v1120_v24  ;;  %v1122_v27 = vpop.f32.mrb[27].mxu1  ;;  %v1232_v24 = vld [vmem:[#allocation7] sm:$0x3] }
 0x2d6   : >> { %v1260_v28 = vmul.f32 %v1122_v27, %v1122_v27  ;;  %v1423_v29 = vmax.f32 %v1421_v12, %v1122_v27 }
 0x2d7   : >> { %v1277_v30 = vadd.f32 %v1276_v21, %v1259_v25  ;;  %v1390_v25 = vld [vmem:[#allocation9] sm:$0x3] }
 0x2d8   : >> { %v1298_v31 = vadd.f32 %v1297_v22, %v1260_v28  ;;  %v1126_v32 = vpop.f32.mrb[28].mxu1 }
 0x2d9   : >> { %v1261_v33 = vmul.f32 %v1126_v32, %v1126_v32  ;;  %v1403_v34 = vmax.f32 %v1401_v17, %v1126_v32  ;;  %v1128_v35 = vpop.f32.mrb[29].mxu1 }
 0x2da   : >> { %v1262_v36 = vmul.f32 %v1128_v35, %v1128_v35  ;;  %v1424_v38 = vmax.f32 %v1422_v20, %v1128_v35 }
 0x2db   : >> { %v1278_v40 = vadd.f32 %v1277_v30, %v1261_v33  ;;  %v1453_v30 = vld [vmem:[#allocation6] sm:$0x3] (%p630_p11) }
 0x2dc   : >> { %v1299_v41 = vadd.f32 %v1298_v31, %v1262_v36  ;;  %v1132_v44 = vpop.f32.mrb[30].mxu1  ;;  %v1454_v32 = vadd.f32 (%p630_p11), 4e-06, %v1453_v30 }
 0x2dd   : >> { %v1263_v46 = vmul.f32 %v1132_v44, %v1132_v44  ;;  %v1404_v47 = vmax.f32 %v1402_v26, %v1132_v44  ;;  %v1134_v48 = vpop.f32.mrb[31].mxu1 }
 0x2de   : >> { %v1264_v49 = vmul.f32 %v1134_v48, %v1134_v48  ;;  %v1425_v50 = vmax.f32 %v1423_v29, %v1134_v48  ;;  %3397 = vrsqrt.f32 (%p630_p11), %v1454_v32 }
 0x2df   : >> { %v1279_v51 = vadd.f32 %v1278_v40, %v1263_v46  ;;  %v1405_v52 = vmax.f32 %v1403_v34, %v1404_v47 }
 0x2e0   : >> { %v1300_v53 = vadd.f32 %v1299_v41, %v1264_v49  ;;  %v1426_v54 = vmax.f32 %v1424_v38, %v1425_v50 }
 0x2e1   : >> { %v1280_v55 = vrot.slane %v1279_v51, 4  ;;  %v1406_v56 = vrot.slane %v1405_v52, 4 }
 0x2e2   : >> { %v1301_v57 = vrot.slane %v1300_v53, 4  ;;  %v1427_v58 = vrot.slane %v1426_v54, 4 }
 0x2e3   : >> { %v1281_v59 = vadd.f32 %v1280_v55, %v1279_v51  ;;  %v1407_v60 = vmax.f32 %v1405_v52, %v1406_v56 }
 0x2e4   : >> { %v1302_v61 = vadd.f32 %v1301_v57, %v1300_v53  ;;  %v1428_v62 = vmax.f32 %v1426_v54, %v1427_v58 }
 0x2e5   : >> { %v1282_v63 = vrot.slane %v1281_v59, 2  ;;  %v1408_v4 = vrot.slane %v1407_v60, 2 }
 0x2e6   : >> { %v1303_v5 = vrot.slane %v1302_v61, 2  ;;  %v1429_v6 = vrot.slane %v1428_v62, 2 }
 0x2e7   : >> { %v1283_v7 = vadd.f32 %v1282_v63, %v1281_v59  ;;  %v1409_v8 = vmax.f32 %v1407_v60, %v1408_v4 }
 0x2e8   : >> { %v1304_v9 = vadd.f32 %v1303_v5, %v1302_v61  ;;  %v1430_v10 = vmax.f32 %v1428_v62, %v1429_v6  ;;  %v4031_v35 = vpop.eup (%p630_p11), %3397 }
 0x2e9   : >> { %v1284_v11 = vrot.slane %v1283_v7, 1  ;;  %v1410_v12 = vrot.slane %v1409_v8, 1  ;;  %5117 = vst [vmem:[#allocation23_spill] sm:$0xff] (%p630_p11), %v4031_v35 }
 0x2ea   : >> { %v1305_v13 = vrot.slane %v1304_v9, 1  ;;  %v1431_v14 = vrot.slane %v1430_v10, 1 }
 0x2eb   : >> { %v1285_v15 = vadd.f32 %v1284_v11, %v1283_v7  ;;  %v1411_v16 = vmax.f32 %v1409_v8, %v1410_v12 }
 0x2ec   : >> { %v1306_v17 = vadd.f32 %v1305_v13, %v1304_v9  ;;  %v1432_v18 = vmax.f32 %v1430_v10, %v1431_v14 }
 0x2ee   : >> { %v1309_v19 = vcombine.low %v1285_v15, %v1306_v17  ;;  %v1435_v20 = vcombine.low %v1411_v16, %v1432_v18 }
 0x2f0   : >> { %v1316_v21 = vrot.slane %v1309_v19, %v4008_v42  ;;  %v1442_v22 = vrot.slane %v1435_v20, %v4008_v42  ;;  %632 = sbr.rel (!%p630_p11) target bundleno = 263 (0x107), region = 126 }
 0x2f2   : >> { %v1323_v26 = vrot.slane %v1316_v21, %v4008_v42  ;;  %v1449_v27 = vrot.slane %v1442_v22, %v4008_v42  ;;  %v1459_v42 = vld [vmem:[#allocation8] sm:$0x3] (%p630_p11) }
 0x2f3   : > { %v1460_v38 = vmul.f32 (%p630_p11), %v4031_v35, %v1459_v42 }
 0x2f4   : >> { %v1325_v28 = vadd.f32 %v1323_v26, %v1232_v24  ;;  %v1451_v29 = vmax.f32 %v1390_v25, %v1449_v27 }
 0x2f5   : > { %v1461_v41 = vadd.f32 (%p630_p11), 1e-05, %v1460_v38 }
 0x2f6   : >> { %1326 = vst.msk [vmem:[#allocation7] sm:$0x3] %vm3802_vm0, %v1325_v28  ;;  %1452 = vst.msk [vmem:[#allocation9] sm:$0x3] %vm3802_vm0, %v1451_v29 }
 0x2fd   : > { %v1456_v31 = vld [vmem:[#allocation7] sm:$0x3]  ;;  %v1463_v34 = vld [vmem:[#allocation9] sm:$0x3] }
 0x2fe   : > { %v1457_v33 = vadd.f32 4e-06, %v1456_v31 }
 0x300   : > { %3399 = vrsqrt.f32 %v1457_v33 }
 0x301   : > { %3401 = vrcp.f32 %v1461_v41 }
 0x30a   : > { %v4033_v36 = vpop.eup %3399 }
 0x30b   : > { %5118 = vst [vmem:[#allocation24_spill] sm:$0xff] %v4033_v36  ;;  %v1464_v40 = vmul.f32 %v4033_v36, %v1463_v34  ;;  %v4037_v0 = vpop.eup %3401 }
 0x30c   : > { %5119 = vst [vmem:[#allocation25_spill] sm:$0xff] %v4037_v0 }
 0x30d   : > { %v1465_v44 = vadd.f32 1e-05, %v1464_v40 }
 0x30f   : > { %3403 = vrcp.f32 %v1465_v44 }
 0x319   : > { %v4039_v2 = vpop.eup %3403 }
 0x31a   : > { %5120 = vst [vmem:[#allocation26_spill] sm:$0xff] %v4039_v2 }
 0x31b LB: >> { %v5122_v0 = vld [vmem:[#allocation25_spill] sm:$0xff]  ;;  %v5123_v36 = vld [vmem:[#allocation24_spill] sm:$0xff]  ;;  %v5124_v35 = vld [vmem:[#allocation23_spill] sm:$0xff]  ;;  %v3691_v46 = vmov 0.0   ;;  %s3240_s17 = sshll.u32 %s3684_s16, 7  ;;  %s1472_s16 = sadd.s32 1, %s3684_s16   ;;  %s3684_s16 = sphi %s4041_s16, %s1472_s16  }
 0x31c   : >> { %v5125_v23 = vld [vmem:[#allocation22_spill] sm:$0xff]  ;;  %v5126_v43 = vld [vmem:[#allocation20_spill] sm:$0xff]  ;;  %v5127_v45 = vld [vmem:[#allocation21_spill] sm:$0xff]  ;;  %1632 = vmatprep.mubr.f32.mxu0 %v3691_v46  ;;  %1879 = vmatprep.mubr.f32.mxu1 %v3691_v46  ;;  %s4057_s24 = sshra.s32 %s3240_s17, 7  ;;  %p1469_p12 = scmp.ge.s32.totalorder %s1472_s16, 2  }
 0x31d   : >> { %3243 = vmatprep.subr.msk.mxu0 %vm387_vm1, %v5126_v43  ;;  %3261 = vmatprep.subr.msk.mxu1 %vm387_vm1, %v5127_v45  ;;  %v5128_v37 = vld [vmem:[#allocation18_spill] sm:$0xff]  ;;  %v5129_v39 = vld [vmem:[#allocation19_spill] sm:$0xff]  ;;  %s3241_s11 = sshll.u32 %s4057_s24, 2  ;;  %v4124_v21 = vsub.s32 0, %v5125_v23  ;;  %v4127_v22 = vsub.s32 1, %v5125_v23  ;;  %s3279_s28 = sshll.u32 %s4057_s24, 3 }
 0x31e   : >> { %3244 = vmatpush1.msk.msra.mxu0 %vm387_vm1, %v5128_v37  ;;  %3262 = vmatpush1.msk.msra.mxu1 %vm387_vm1, %v5129_v39  ;;  %s1477_s18 = scalar_lea.vmem [#allocation2], %s3241_s11  ;;  %s1480_s27 = scalar_lea.vmem [#allocation3], %s3241_s11  ;;  %vm2925_vm3 = vcmask (%p1469_p12), 64512  }
 0x31f   : >> { %v1478_v47 = vld [vmem:[%s1477_s18] sm:$0xf]  ;;  %v4131_v24 = vrot.slane %v5124_v35, %v4124_v21  ;;  %v4135_v25 = vrot.slane %v5124_v35, %v4127_v22  ;;  %s2837_s29 = scalar_lea.vmem [#allocation4], %s3279_s28  ;;  %s3293_s16 = sshll.u32 (%p1469_p12), %s3765_s13, 7 }
 0x320   : >> { %1482 = vxpose.xlu0.b32.start.end [1/1] (short) %v1478_v47, 128  ;;  %v1481_v48 = vld [vmem:[%s1480_s27] sm:$0xf]  ;;  %s3046_s18 = sshll.u32 (%p1469_p12), %s3902_s23, 4  ;;  %s3060_s27 = sshll.u32 (%p1469_p12), %s3906_s25, 4  ;;  %s4951_s18 = int_to_ptr.vmem [resolvable:$true] %s3046_s18  ;;  %s4958_s27 = int_to_ptr.vmem [resolvable:$true] %s3060_s27 }
 0x321   : >> { %v5121_v2 = vld [vmem:[#allocation26_spill] sm:$0xff]  ;;  %s4949_s14 = scalar_lea.hbm (%p1469_p12), %s5031_s8, %s3293_s16  ;;  %s4956_s17 = scalar_lea.hbm (%p1469_p12), %s5032_s9, %s3293_s16 }
 0x322   : > { %s3574_s24 = scalar_lea.vmem (%p1469_p12), %s4951_s18, 128  ;;  %s3692_s11 = smov (%p1469_p12), [#allocation10]  }
 0x323   : > { %p3575_p13 = scmp.ne.s32.totalorder (%p1469_p12), %s4951_s18, %s3574_s24  ;;  %s3578_s28 = sshll.u32 (%p1469_p12), %s3692_s11, 4  ;;  %s3579_s28 = int_to_ptr.vmem [resolvable:$false] %s3578_s28 }
 0x324   : > { %p3581_p2 = scmp.lt.s32.totalorder (%p1469_p12), %s4951_s18, %s3579_s28 }
 0x325   : > { %p3576_p0 = pnand (%p1469_p12), %p3575_p13, %p3782_p5 }
 0x327   : > { %p3577_p1 = pneg (%p1469_p12), %p3576_p0 }
 0x35d   : >> { %1729 = vxpose.xlu0.b32.start.end [1/1] (short) %v1481_v48, 128 }
 0x3a0   : >> { %v1498_v49 = vpop.trf.xlu0 }
 0x3a1   : >> { %3245 = vmatmul.mubr.msk.f32.vlgmr.msra.gmra.mrb[0].mxu0 %vm380_vm2, %v1498_v49 }
 0x3a2   : >> { %1638 = vmatprep.mubr.f32.mxu0 %v3691_v46 }
 0x3a4   : >> { %v1499_v50 = vpop.trf.xlu0 }
 0x3a5   : >> { %3246 = vmatmul.mubr.msk.f32.gmra.mrb[2].mxu0 %vm380_vm2, %v1499_v50 }
 0x3a6   : >> { %1644 = vmatprep.mubr.f32.mxu0 %v3691_v46 }
 0x3a8   : >> { %v1500_v51 = vpop.trf.xlu0 }
 0x3a9   : >> { %3247 = vmatmul.mubr.msk.f32.gmra.mrb[4].mxu0 %vm380_vm2, %v1500_v51 }
 0x3aa   : >> { %1650 = vmatprep.mubr.f32.mxu0 %v3691_v46 }
 0x3ac   : >> { %v1501_v52 = vpop.trf.xlu0 }
 0x3ad   : >> { %3248 = vmatmul.mubr.msk.f32.gmra.mrb[6].mxu0 %vm380_vm2, %v1501_v52 }
 0x3ae   : >> { %1656 = vmatprep.mubr.f32.mxu0 %v3691_v46 }
 0x3b0   : >> { %v1502_v53 = vpop.trf.xlu0 }
 0x3b1   : >> { %3249 = vmatmul.mubr.msk.f32.gmra.mrb[8].mxu0 %vm380_vm2, %v1502_v53 }
 0x3b2   : >> { %1662 = vmatprep.mubr.f32.mxu0 %v3691_v46 }
 0x3b4   : >> { %v1503_v54 = vpop.trf.xlu0 }
 0x3b5   : >> { %3250 = vmatmul.mubr.msk.f32.gmra.mrb[10].mxu0 %vm380_vm2, %v1503_v54 }
 0x3b6   : >> { %1668 = vmatprep.mubr.f32.mxu0 %v3691_v46 }
 0x3b8   : >> { %v1504_v55 = vpop.trf.xlu0 }
 0x3b9   : >> { %3251 = vmatmul.mubr.msk.f32.gmra.mrb[12].mxu0 %vm380_vm2, %v1504_v55 }
 0x3ba   : >> { %1674 = vmatprep.mubr.f32.mxu0 %v3691_v46 }
 0x3bc   : >> { %v1505_v56 = vpop.trf.xlu0 }
 0x3bd   : >> { %3252 = vmatmul.mubr.msk.f32.gmra.mrb[14].mxu0 %vm380_vm2, %v1505_v56 }
 0x3be   : >> { %1680 = vmatprep.mubr.f32.mxu0 %v3691_v46 }
 0x3c0   : >> { %v1506_v57 = vpop.trf.xlu0 }
 0x3c1   : >> { %3253 = vmatmul.mubr.msk.f32.gmra.mrb[16].mxu0 %vm380_vm2, %v1506_v57 }
 0x3c2   : >> { %1686 = vmatprep.mubr.f32.mxu0 %v3691_v46 }
 0x3c4   : >> { %v1507_v58 = vpop.trf.xlu0 }
 0x3c5   : >> { %3254 = vmatmul.mubr.msk.f32.gmra.mrb[18].mxu0 %vm380_vm2, %v1507_v58 }
 0x3c6   : >> { %1692 = vmatprep.mubr.f32.mxu0 %v3691_v46 }
 0x3c8   : >> { %v1508_v59 = vpop.trf.xlu0 }
 0x3c9   : >> { %3255 = vmatmul.mubr.msk.f32.gmra.mrb[20].mxu0 %vm380_vm2, %v1508_v59 }
 0x3ca   : >> { %1698 = vmatprep.mubr.f32.mxu0 %v3691_v46 }
 0x3cc   : >> { %v1509_v60 = vpop.trf.xlu0 }
 0x3cd   : >> { %3256 = vmatmul.mubr.msk.f32.gmra.mrb[22].mxu0 %vm380_vm2, %v1509_v60 }
 0x3ce   : >> { %1704 = vmatprep.mubr.f32.mxu0 %v3691_v46 }
 0x3d0   : >> { %v1510_v61 = vpop.trf.xlu0 }
 0x3d1   : >> { %3257 = vmatmul.mubr.msk.f32.gmra.mrb[24].mxu0 %vm380_vm2, %v1510_v61 }
 0x3d2   : >> { %1710 = vmatprep.mubr.f32.mxu0 %v3691_v46 }
 0x3d4   : >> { %v1511_v62 = vpop.trf.xlu0 }
 0x3d5   : >> { %3258 = vmatmul.mubr.msk.f32.gmra.mrb[26].mxu0 %vm380_vm2, %v1511_v62 }
 0x3d6   : >> { %1716 = vmatprep.mubr.f32.mxu0 %v3691_v46 }
 0x3d8   : >> { %v1512_v63 = vpop.trf.xlu0 }
 0x3d9   : >> { %3259 = vmatmul.mubr.msk.f32.gmra.mrb[28].mxu0 %vm380_vm2, %v1512_v63 }
 0x3da   : >> { %1722 = vmatprep.mubr.f32.mxu0 %v3691_v46 }
 0x3dc   : >> { %v1513_v4 = vpop.trf.xlu0 }
 0x3dd   : >> { %3260 = vmatmul.mubr.msk.f32.gmra.mrb[30].mxu0 %vm380_vm2, %v1513_v4 }
 0x3de   : >> { %2905 = vmatprep.mubr.f32.mxu0 %v3691_v46 }
 0x3e0   : >> { %v1745_v5 = vpop.trf.xlu0 }
 0x3e1   : >> { %3263 = vmatmul.mubr.msk.f32.vlgmr.msra.gmra.mrb[0].mxu1 %vm380_vm2, %v1745_v5 }
 0x3e2   : >> { %1885 = vmatprep.mubr.f32.mxu1 %v3691_v46 }
 0x3e4   : >> { %v1746_v6 = vpop.trf.xlu0 }
 0x3e5   : >> { %3264 = vmatmul.mubr.msk.f32.gmra.mrb[2].mxu1 %vm380_vm2, %v1746_v6 }
 0x3e6   : >> { %1891 = vmatprep.mubr.f32.mxu1 %v3691_v46 }
 0x3e8   : >> { %v1747_v7 = vpop.trf.xlu0 }
 0x3e9   : >> { %3265 = vmatmul.mubr.msk.f32.gmra.mrb[4].mxu1 %vm380_vm2, %v1747_v7 }
 0x3ea   : >> { %1897 = vmatprep.mubr.f32.mxu1 %v3691_v46 }
 0x3ec   : >> { %v1748_v8 = vpop.trf.xlu0 }
 0x3ed   : >> { %3266 = vmatmul.mubr.msk.f32.gmra.mrb[6].mxu1 %vm380_vm2, %v1748_v8 }
 0x3ee   : >> { %1903 = vmatprep.mubr.f32.mxu1 %v3691_v46 }
 0x3f0   : >> { %v1749_v9 = vpop.trf.xlu0 }
 0x3f1   : >> { %3267 = vmatmul.mubr.msk.f32.gmra.mrb[8].mxu1 %vm380_vm2, %v1749_v9 }
 0x3f2   : >> { %1909 = vmatprep.mubr.f32.mxu1 %v3691_v46 }
 0x3f4   : >> { %v1750_v10 = vpop.trf.xlu0 }
 0x3f5   : >> { %3268 = vmatmul.mubr.msk.f32.gmra.mrb[10].mxu1 %vm380_vm2, %v1750_v10 }
 0x3f6   : >> { %1915 = vmatprep.mubr.f32.mxu1 %v3691_v46 }
 0x3f8   : >> { %v1751_v11 = vpop.trf.xlu0 }
 0x3f9   : >> { %3269 = vmatmul.mubr.msk.f32.gmra.mrb[12].mxu1 %vm380_vm2, %v1751_v11 }
 0x3fa   : >> { %1921 = vmatprep.mubr.f32.mxu1 %v3691_v46 }
 0x3fc   : >> { %v1752_v12 = vpop.trf.xlu0 }
 0x3fd   : >> { %3270 = vmatmul.mubr.msk.f32.gmra.mrb[14].mxu1 %vm380_vm2, %v1752_v12 }
 0x3fe   : >> { %1927 = vmatprep.mubr.f32.mxu1 %v3691_v46 }
 0x400   : >> { %v1753_v13 = vpop.trf.xlu0 }
 0x401   : >> { %3271 = vmatmul.mubr.msk.f32.gmra.mrb[16].mxu1 %vm380_vm2, %v1753_v13 }
 0x402   : >> { %1933 = vmatprep.mubr.f32.mxu1 %v3691_v46 }
 0x404   : >> { %v1754_v14 = vpop.trf.xlu0 }
 0x405   : >> { %3272 = vmatmul.mubr.msk.f32.gmra.mrb[18].mxu1 %vm380_vm2, %v1754_v14 }
 0x406   : >> { %1939 = vmatprep.mubr.f32.mxu1 %v3691_v46 }
 0x408   : >> { %v1755_v15 = vpop.trf.xlu0 }
 0x409   : >> { %3273 = vmatmul.mubr.msk.f32.gmra.mrb[20].mxu1 %vm380_vm2, %v1755_v15 }
 0x40a   : >> { %1945 = vmatprep.mubr.f32.mxu1 %v3691_v46 }
 0x40c   : >> { %v1756_v16 = vpop.trf.xlu0 }
 0x40d   : >> { %3274 = vmatmul.mubr.msk.f32.gmra.mrb[22].mxu1 %vm380_vm2, %v1756_v16 }
 0x40e   : >> { %1951 = vmatprep.mubr.f32.mxu1 %v3691_v46 }
 0x410   : >> { %v1757_v17 = vpop.trf.xlu0 }
 0x411   : >> { %3275 = vmatmul.mubr.msk.f32.gmra.mrb[24].mxu1 %vm380_vm2, %v1757_v17 }
 0x412   : >> { %1957 = vmatprep.mubr.f32.mxu1 %v3691_v46 }
 0x414   : >> { %v1758_v18 = vpop.trf.xlu0 }
 0x415   : >> { %3276 = vmatmul.mubr.msk.f32.gmra.mrb[26].mxu1 %vm380_vm2, %v1758_v18 }
 0x416   : >> { %1963 = vmatprep.mubr.f32.mxu1 %v3691_v46 }
 0x418   : >> { %v1759_v19 = vpop.trf.xlu0 }
 0x419   : >> { %3277 = vmatmul.mubr.msk.f32.gmra.mrb[28].mxu1 %vm380_vm2, %v1759_v19 }
 0x41a   : >> { %1969 = vmatprep.mubr.f32.mxu1 %v3691_v46 }
 0x41c   : >> { %v1760_v20 = vpop.trf.xlu0 }
 0x41d   : >> { %3278 = vmatmul.mubr.msk.f32.gmra.mrb[30].mxu1 %vm380_vm2, %v1760_v20 }
 0x474   : >> { %v1634_v26 = vpop.f32.mrb[0].mxu0 }
 0x475   : >> { %v4138_v27 = vmul.f32 %v4131_v24, %v1634_v26  ;;  %v1636_v28 = vpop.f32.mrb[1].mxu0 }
 0x476   : >> { %v4141_v29 = vmul.f32 %v4135_v25, %v1636_v28 }
 0x478   : >> { %v1640_v30 = vpop.f32.mrb[2].mxu0  ;;  %v2062_v31 = vmax.f32 %v4138_v27, %v4141_v29 }
 0x479   : >> { %v4146_v32 = vmul.f32 %v4131_v24, %v1640_v30  ;;  %v1642_v33 = vpop.f32.mrb[3].mxu0 }
 0x47a   : >> { %v4149_v42 = vmul.f32 %v4135_v25, %v1642_v33  ;;  %2063 = vmax.xlane.f32.xlu1 %v2062_v31 }
 0x47c   : >> { %v1646_v34 = vpop.f32.mrb[4].mxu0 }
 0x47d   : >> { %v4152_v38 = vmul.f32 %v4131_v24, %v1646_v34  ;;  %v1648_v40 = vpop.f32.mrb[5].mxu0 }
 0x47e   : >> { %v4155_v41 = vmul.f32 %v4135_v25, %v1648_v40 }
 0x480   : >> { %v1652_v44 = vpop.f32.mrb[6].mxu0 }
 0x481   : >> { %v4158_v46 = vmul.f32 %v4131_v24, %v1652_v44  ;;  %v1654_v47 = vpop.f32.mrb[7].mxu0 }
 0x482   : >> { %v4161_v48 = vmul.f32 %v4135_v25, %v1654_v47 }
 0x484   : >> { %v1658_v49 = vpop.f32.mrb[8].mxu0 }
 0x485   : >> { %v4164_v50 = vmul.f32 %v4131_v24, %v1658_v49  ;;  %v1660_v51 = vpop.f32.mrb[9].mxu0 }
 0x486   : >> { %v4167_v52 = vmul.f32 %v4135_v25, %v1660_v51 }
 0x488   : >> { %v1664_v53 = vpop.f32.mrb[10].mxu0 }
 0x489   : >> { %v4170_v54 = vmul.f32 %v4131_v24, %v1664_v53  ;;  %v1666_v55 = vpop.f32.mrb[11].mxu0 }
 0x48a   : >> { %v4173_v56 = vmul.f32 %v4135_v25, %v1666_v55 }
 0x48b   : >> { %5130 = vst [vmem:[#allocation27_spill] sm:$0xff] %v4170_v54 }
 0x48c   : >> { %5131 = vst [vmem:[#allocation28_spill] sm:$0xff] %v4173_v56  ;;  %v1670_v57 = vpop.f32.mrb[12].mxu0 }
 0x48d   : >> { %v4176_v58 = vmul.f32 %v4131_v24, %v1670_v57  ;;  %v1672_v59 = vpop.f32.mrb[13].mxu0 }
 0x48e   : >> { %v4179_v60 = vmul.f32 %v4135_v25, %v1672_v59 }
 0x48f   : >> { %5132 = vst [vmem:[#allocation29_spill] sm:$0xff] %v4176_v58 }
 0x490   : >> { %5133 = vst [vmem:[#allocation30_spill] sm:$0xff] %v4179_v60  ;;  %v1676_v61 = vpop.f32.mrb[14].mxu0 }
 0x491   : >> { %v4182_v62 = vmul.f32 %v4131_v24, %v1676_v61  ;;  %v1678_v63 = vpop.f32.mrb[15].mxu0 }
 0x492   : >> { %v4185_v4 = vmul.f32 %v4135_v25, %v1678_v63  ;;  %v4236_v63 = vrot.slane %v5123_v36, %v4124_v21 }
 0x494   : >> { %5134 = vst [vmem:[#allocation31_spill] sm:$0xff] %v4185_v4  ;;  %v1682_v5 = vpop.f32.mrb[16].mxu0 }
 0x495   : >> { %v4188_v6 = vmul.f32 %v4131_v24, %v1682_v5  ;;  %v1684_v7 = vpop.f32.mrb[17].mxu0 }
 0x496   : >> { %v4191_v8 = vmul.f32 %v4135_v25, %v1684_v7  ;;  %v4243_v7 = vrot.slane %v5123_v36, %v4127_v22 }
 0x498   : >> { %v1688_v9 = vpop.f32.mrb[18].mxu0 }
 0x499   : >> { %v4194_v10 = vmul.f32 %v4131_v24, %v1688_v9  ;;  %v1690_v11 = vpop.f32.mrb[19].mxu0 }
 0x49a   : >> { %v4197_v12 = vmul.f32 %v4135_v25, %v1690_v11 }
 0x49b   : >> { %5135 = vst [vmem:[#allocation32_spill] sm:$0xff] %v4194_v10 }
 0x49c   : >> { %5136 = vst [vmem:[#allocation33_spill] sm:$0xff] %v4197_v12  ;;  %v1694_v13 = vpop.f32.mrb[20].mxu0  ;;  %v2089_v14 = vmax.f32 %v4194_v10, %v4197_v12  ;;  %v2077_v12 = vmax.f32 %v4170_v54, %v4173_v56 }
 0x49d   : >> { %v4202_v15 = vmul.f32 %v4131_v24, %v1694_v13  ;;  %v1696_v16 = vpop.f32.mrb[21].mxu0 }
 0x49e   : >> { %v4205_v17 = vmul.f32 %v4135_v25, %v1696_v16  ;;  %2090 = vmax.xlane.f32.xlu0 %v2089_v14 }
 0x4a0   : >> { %v1700_v18 = vpop.f32.mrb[22].mxu0 }
 0x4a1   : >> { %v4208_v19 = vmul.f32 %v4131_v24, %v1700_v18  ;;  %v1702_v20 = vpop.f32.mrb[23].mxu0 }
 0x4a2   : >> { %v4211_v26 = vmul.f32 %v4135_v25, %v1702_v20 }
 0x4a4   : >> { %v1706_v28 = vpop.f32.mrb[24].mxu0 }
 0x4a5   : >> { %v4214_v30 = vmul.f32 %v4131_v24, %v1706_v28  ;;  %v1708_v31 = vpop.f32.mrb[25].mxu0  ;;  %v2065_v28 = vmax.f32 %v4146_v32, %v4149_v42 }
 0x4a6   : >> { %v4217_v33 = vmul.f32 %v4135_v25, %v1708_v31 }
 0x4a8   : >> { %v1712_v34 = vpop.f32.mrb[26].mxu0 }
 0x4a9   : >> { %v4220_v40 = vmul.f32 %v4131_v24, %v1712_v34  ;;  %v1714_v44 = vpop.f32.mrb[27].mxu0 }
 0x4aa   : >> { %v4223_v47 = vmul.f32 %v4135_v25, %v1714_v44 }
 0x4ab   : >> { %5137 = vst [vmem:[#allocation34_spill] sm:$0xff] %v4220_v40 }
 0x4ac   : >> { %5138 = vst [vmem:[#allocation35_spill] sm:$0xff] %v4223_v47  ;;  %v1718_v49 = vpop.f32.mrb[28].mxu0 }
 0x4ad   : >> { %v4226_v51 = vmul.f32 %v4131_v24, %v1718_v49  ;;  %v1720_v53 = vpop.f32.mrb[29].mxu0 }
 0x4ae   : >> { %v4229_v55 = vmul.f32 %v4135_v25, %v1720_v53 }
 0x4af   : >> { %5139 = vst [vmem:[#allocation36_spill] sm:$0xff] %v4226_v51 }
 0x4b0   : >> { %5140 = vst [vmem:[#allocation37_spill] sm:$0xff] %v4229_v55  ;;  %v1724_v57 = vpop.f32.mrb[30].mxu0 }
 0x4b1   : >> { %v4232_v59 = vmul.f32 %v4131_v24, %v1724_v57  ;;  %v1726_v61 = vpop.f32.mrb[31].mxu0 }
 0x4b2   : >> { %v4239_v5 = vmul.f32 %v4135_v25, %v1726_v61 }
 0x4b3   : >> { %5141 = vst [vmem:[#allocation38_spill] sm:$0xff] %v4232_v59 }
 0x4b4   : >> { %5142 = vst [vmem:[#allocation39_spill] sm:$0xff] %v4239_v5  ;;  %v1881_v9 = vpop.f32.mrb[0].mxu1 }
 0x4b5   : >> { %v4246_v11 = vmul.f32 %v4236_v63, %v1881_v9  ;;  %v1883_v13 = vpop.f32.mrb[1].mxu1  ;;  %v2068_v9 = vmax.f32 %v4152_v38, %v4155_v41 }
 0x4b6   : >> { %v4249_v24 = vmul.f32 %v4243_v7, %v1883_v13 }
 0x4b8   : >> { %v2142_v14 = vmax.f32 %v4246_v11, %v4249_v24  ;;  %v1887_v16 = vpop.f32.mrb[2].mxu1 }
 0x4b9   : >> { %v1889_v18 = vpop.f32.mrb[3].mxu1  ;;  %v4254_v25 = vmul.f32 %v4236_v63, %v1887_v16 }
 0x4ba   : >> { %2143 = vmax.xlane.f32.xlu1 %v2142_v14  ;;  %v4257_v20 = vmul.f32 %v4243_v7, %v1889_v18 }
 0x4bc   : >> { %v1893_v31 = vpop.f32.mrb[4].mxu1  ;;  %v2145_v44 = vmax.f32 %v4254_v25, %v4257_v20 }
 0x4bd   : >> { %v1895_v34 = vpop.f32.mrb[5].mxu1  ;;  %v4264_v57 = vmul.f32 %v4236_v63, %v1893_v31 }
 0x4be   : >> { %2066 = vmax.xlane.f32.xlu1 %v2065_v28  ;;  %v4267_v61 = vmul.f32 %v4243_v7, %v1895_v34  ;;  %v2071_v34 = vmax.f32 %v4158_v46, %v4161_v48 }
 0x4c0   : >> { %v1899_v49 = vpop.f32.mrb[6].mxu1  ;;  %v2148_v16 = vmax.f32 %v4264_v57, %v4267_v61 }
 0x4c1   : >> { %v1901_v53 = vpop.f32.mrb[7].mxu1 }
 0x4c2   : >> { %2146 = vmax.xlane.f32.xlu1 %v2145_v44  ;;  %v4274_v44 = vmul.f32 %v4236_v63, %v1899_v49  ;;  %v4277_v31 = vmul.f32 %v4243_v7, %v1901_v53  ;;  %v2074_v53 = vmax.f32 %v4164_v50, %v4167_v52 }
 0x4c4   : >> { %v1905_v13 = vpop.f32.mrb[8].mxu1 }
 0x4c5   : >> { %v1907_v14 = vpop.f32.mrb[9].mxu1 }
 0x4c6   : >> { %2069 = vmax.xlane.f32.xlu1 %v2068_v9  ;;  %v2151_v9 = vmax.f32 %v4274_v44, %v4277_v31  ;;  %v4287_v49 = vmul.f32 %v4243_v7, %v1907_v14 }
 0x4c8   : >> { %v1911_v18 = vpop.f32.mrb[10].mxu1  ;;  %5143 = vst [vmem:[#allocation40_spill] sm:$0xff] %v4287_v49 }
 0x4c9   : >> { %v1913_v28 = vpop.f32.mrb[11].mxu1  ;;  %v4303_v45 = vmul.f32 %v4236_v63, %v1911_v18 }
 0x4ca   : >> { %2149 = vmax.xlane.f32.xlu1 %v2148_v16  ;;  %v4284_v16 = vmul.f32 %v4236_v63, %v1905_v13 }
 0x4cb   : >> { %5144 = vst [vmem:[#allocation41_spill] sm:$0xff] %v4303_v45 }
 0x4cc   : >> { %v1917_v3 = vpop.f32.mrb[12].mxu1  ;;  %v2154_v39 = vmax.f32 %v4284_v16, %v4287_v49 }
 0x4cd   : >> { %v1919_v1 = vpop.f32.mrb[13].mxu1  ;;  %v4325_v56 = vmul.f32 %v4236_v63, %v1917_v3 }
 0x4ce   : >> { %2072 = vmax.xlane.f32.xlu1 %v2071_v34 }
 0x4cf   : >> { %5146 = vst [vmem:[#allocation43_spill] sm:$0xff] %v4325_v56 }
 0x4d0   : >> { %v1923_v23 = vpop.f32.mrb[14].mxu1 }
 0x4d1   : >> { %v1925_v35 = vpop.f32.mrb[15].mxu1 }
 0x4d2   : >> { %2152 = vmax.xlane.f32.xlu1 %v2151_v9 }
 0x4d4   : >> { %v1929_v36 = vpop.f32.mrb[16].mxu1 }
 0x4d5   : >> { %v4292_v37 = vmul.f32 %v4236_v63, %v1929_v36  ;;  %v1931_v34 = vpop.f32.mrb[17].mxu1  ;;  %v4306_v36 = vmul.f32 %v4243_v7, %v1913_v28 }
 0x4d6   : >> { %2075 = vmax.xlane.f32.xlu1 %v2074_v53  ;;  %v4297_v9 = vmul.f32 %v4243_v7, %v1931_v34 }
 0x4d7   : >> { %5145 = vst [vmem:[#allocation42_spill] sm:$0xff] %v4306_v36 }
 0x4d8   : >> { %v1935_v13 = vpop.f32.mrb[18].mxu1 }
 0x4d9   : >> { %v4300_v43 = vmul.f32 %v4236_v63, %v1935_v13  ;;  %v1937_v14 = vpop.f32.mrb[19].mxu1 }
 0x4da   : >> { %2155 = vmax.xlane.f32.xlu1 %v2154_v39  ;;  %v4309_v53 = vmul.f32 %v4243_v7, %v1937_v14  ;;  %v2157_v39 = vmax.f32 %v4303_v45, %v4306_v36  ;;  %v2080_v36 = vmax.f32 %v4176_v58, %v4179_v60  ;;  %v4347_v60 = vmul.f32 %v4236_v63, %v1923_v23 }
 0x4dc   : >> { %v1941_v34 = vpop.f32.mrb[20].mxu1 }
 0x4dd   : >> { %v4314_v10 = vmul.f32 %v4236_v63, %v1941_v34  ;;  %v1943_v13 = vpop.f32.mrb[21].mxu1  ;;  %v4328_v34 = vmul.f32 %v4243_v7, %v1919_v1 }
 0x4de   : >> { %2078 = vmax.xlane.f32.xlu1 %v2077_v12  ;;  %v4319_v18 = vmul.f32 %v4243_v7, %v1943_v13 }
 0x4df   : >> { %5147 = vst [vmem:[#allocation44_spill] sm:$0xff] %v4328_v34 }
 0x4e0   : >> { %v1947_v28 = vpop.f32.mrb[22].mxu1 }
 0x4e1   : >> { %v4322_v49 = vmul.f32 %v4236_v63, %v1947_v28  ;;  %v1949_v14 = vpop.f32.mrb[23].mxu1 }
 0x4e2   : >> { %2158 = vmax.xlane.f32.xlu1 %v2157_v39  ;;  %v4331_v12 = vmul.f32 %v4243_v7, %v1949_v14  ;;  %v2160_v39 = vmax.f32 %v4325_v56, %v4328_v34  ;;  %v2083_v34 = vmax.f32 %v4182_v62, %v4185_v4 }
 0x4e4   : >> { %v1953_v13 = vpop.f32.mrb[24].mxu1 }
 0x4e5   : >> { %v4336_v45 = vmul.f32 %v4236_v63, %v1953_v13  ;;  %v1955_v28 = vpop.f32.mrb[25].mxu1  ;;  %v4350_v13 = vmul.f32 %v4243_v7, %v1925_v35 }
 0x4e6   : >> { %2081 = vmax.xlane.f32.xlu1 %v2080_v36  ;;  %v4341_v3 = vmul.f32 %v4243_v7, %v1955_v28 }
 0x4e8   : >> { %5148 = vst [vmem:[#allocation45_spill] sm:$0xff] %v4341_v3  ;;  %v1959_v1 = vpop.f32.mrb[26].mxu1 }
 0x4e9   : >> { %v4344_v54 = vmul.f32 %v4236_v63, %v1959_v1  ;;  %v1961_v14 = vpop.f32.mrb[27].mxu1 }
 0x4ea   : >> { %2161 = vmax.xlane.f32.xlu1 %v2160_v39  ;;  %v4353_v36 = vmul.f32 %v4243_v7, %v1961_v14  ;;  %v2163_v39 = vmax.f32 %v4347_v60, %v4350_v13 }
 0x4eb   : >> { %5149 = vst [vmem:[#allocation46_spill] sm:$0xff] %v4344_v54 }
 0x4ec   : >> { %5150 = vst [vmem:[#allocation47_spill] sm:$0xff] %v4353_v36  ;;  %v1965_v28 = vpop.f32.mrb[28].mxu1 }
 0x4ed   : >> { %v4358_v56 = vmul.f32 %v4236_v63, %v1965_v28  ;;  %v1967_v1 = vpop.f32.mrb[29].mxu1  ;;  %v2086_v28 = vmax.f32 %v4188_v6, %v4191_v8 }
 0x4ee   : >> { %2084 = vmax.xlane.f32.xlu1 %v2083_v34  ;;  %v4363_v23 = vmul.f32 %v4243_v7, %v1967_v1  ;;  %v2166_v34 = vmax.f32 %v4292_v37, %v4297_v9  ;;  %v2169_v1 = vmax.f32 %v4300_v43, %v4309_v53 }
 0x4ef   : >> { %5151 = vst [vmem:[#allocation48_spill] sm:$0xff] %v4358_v56 }
 0x4f0   : >> { %5152 = vst [vmem:[#allocation49_spill] sm:$0xff] %v4363_v23  ;;  %v1971_v35 = vpop.f32.mrb[30].mxu1 }
 0x4f1   : >> { %v4366_v58 = vmul.f32 %v4236_v63, %v1971_v35  ;;  %v1973_v14 = vpop.f32.mrb[31].mxu1  ;;  %v2092_v63 = vmax.f32 %v4202_v15, %v4205_v17  ;;  %v2175_v35 = vmax.f32 %v4322_v49, %v4331_v12 }
 0x4f2   : >> { %2164 = vmax.xlane.f32.xlu1 %v2163_v39  ;;  %v4369_v4 = vmul.f32 %v4243_v7, %v1973_v14  ;;  %v2172_v7 = vmax.f32 %v4314_v10, %v4319_v18  ;;  %v2095_v39 = vmax.f32 %v4208_v19, %v4211_v26  ;;  %v2098_v14 = vmax.f32 %v4214_v30, %v4217_v33 }
 0x4f3   : >> { %5153 = vst [vmem:[#allocation50_spill] sm:$0xff] %v4366_v58 }
 0x4f4   : >> { %5154 = vst [vmem:[#allocation51_spill] sm:$0xff] %v4369_v4 }
 0x4f6   : >> { %2087 = vmax.xlane.f32.xlu1 %v2086_v28  ;;  %v2178_v28 = vmax.f32 %v4336_v45, %v4341_v3 }
 0x4fa   : >> { %2167 = vmax.xlane.f32.xlu1 %v2166_v34  ;;  %v2101_v34 = vmax.f32 %v4220_v40, %v4223_v47 }
 0x4fe   : >> { %2170 = vmax.xlane.f32.xlu1 %v2169_v1  ;;  %v2181_v1 = vmax.f32 %v4344_v54, %v4353_v36 }
 0x502   : >> { %2093 = vmax.xlane.f32.xlu1 %v2092_v63  ;;  %v2104_v63 = vmax.f32 %v4226_v51, %v4229_v55  ;;  %v2394_v55 = vmul.f32 %v4249_v24, %v4249_v24 }
 0x506   : >> { %2173 = vmax.xlane.f32.xlu1 %v2172_v7  ;;  %v2184_v7 = vmax.f32 %v4358_v56, %v4363_v23 }
 0x50a   : >> { %2096 = vmax.xlane.f32.xlu1 %v2095_v39  ;;  %v2107_v39 = vmax.f32 %v4232_v59, %v4239_v5  ;;  %v4407_v5 = vrot.slane %v5122_v0, %v4127_v22 }
 0x50e   : >> { %2176 = vmax.xlane.f32.xlu1 %v2175_v35  ;;  %v2187_v35 = vmax.f32 %v4366_v58, %v4369_v4  ;;  %v4417_v58 = vrot.slane %v5121_v2, %v4124_v21 }
 0x512   : >> { %2099 = vmax.xlane.f32.xlu1 %v2098_v14  ;;  %v2064_v14 = vpop.xlane.xlu1 %2063 }
 0x516   : >> { %2179 = vmax.xlane.f32.xlu1 %v2178_v28  ;;  %v2110_v28 = vadd.f32 1e-05, %v2064_v14 }
 0x518   : >> { %3405 = vrcp.f32 %v2110_v28  ;;  %v2222_v28 = vmul.f32 %v4138_v27, %v4138_v27 }
 0x51a   : >> { %2102 = vmax.xlane.f32.xlu1 %v2101_v34 }
 0x51e   : >> { %2182 = vmax.xlane.f32.xlu1 %v2181_v1 }
 0x522   : >> { %2105 = vmax.xlane.f32.xlu1 %v2104_v63  ;;  %v4403_v63 = vrot.slane %v5122_v0, %v4124_v21  ;;  %v3406_v23 = vpop.eup %3405 }
 0x523   : >> { %v2266_v14 = vmul.f32 %v3406_v23, %v4407_v5 }
 0x526   : >> { %2185 = vmax.xlane.f32.xlu1 %v2184_v7 }
 0x52a   : >> { %2108 = vmax.xlane.f32.xlu1 %v2107_v39 }
 0x52e   : >> { %2188 = vmax.xlane.f32.xlu1 %v2187_v35  ;;  %v2265_v35 = vmul.f32 %v3406_v23, %v4403_v63 }
 0x547   : >> { %v2144_v34 = vpop.xlane.xlu1 %2143 }
 0x548   : >> { %v2190_v1 = vadd.f32 1e-05, %v2144_v34 }
 0x54a   : >> { %3407 = vrcp.f32 %v2190_v1  ;;  %v2223_v1 = vmul.f32 %v4141_v29, %v4141_v29 }
 0x54b   : >> { %v2067_v7 = vpop.xlane.xlu1 %2066 }
 0x54c   : >> { %v2111_v39 = vadd.f32 1e-05, %v2067_v7  ;;  %v4421_v7 = vrot.slane %v5121_v2, %v4127_v22  ;;  %v2298_v59 = vmul.f32 %v2266_v14, %v2223_v1 }
 0x54e   : >> { %3409 = vrcp.f32 %v2111_v39  ;;  %v2297_v39 = vmul.f32 %v2265_v35, %v2222_v28  ;;  %v2330_v2 = vadd.f32 1.0, %v2298_v59 }
 0x54f   : >> { %v2147_v4 = vpop.xlane.xlu1 %2146 }
 0x550   : >> { %v2191_v34 = vadd.f32 1e-05, %v2147_v4  ;;  %v2393_v4 = vmul.f32 %v4246_v11, %v4246_v11  ;;  %v2329_v36 = vadd.f32 1.0, %v2297_v39 }
 0x552   : >> { %3411 = vrcp.f32 %v2191_v34 }
 0x553   : >> { %v2070_v0 = vpop.xlane.xlu1 %2069 }
 0x554   : >> { %v3408_v23 = vpop.eup %3407  ;;  %v2112_v56 = vadd.f32 1e-05, %v2070_v0  ;;  %v2224_v0 = vmul.f32 %v4146_v32, %v4146_v32 }
 0x555   : >> { %v2436_v51 = vmul.f32 %v3408_v23, %v4417_v58  ;;  %v2437_v21 = vmul.f32 %v3408_v23, %v4421_v7  ;;  %v2225_v23 = vmul.f32 %v4149_v42, %v4149_v42 }
 0x556   : >> { %3413 = vrcp.f32 %v2112_v56  ;;  %v2361_v56 = vmul.f32 %v2329_v36, %v4138_v27  ;;  %v2396_v27 = vmul.f32 %v4257_v20, %v4257_v20 }
 0x557   : >> { %v2150_v22 = vpop.xlane.xlu1 %2149  ;;  %v2468_v34 = vmul.f32 %v2436_v51, %v2393_v4  ;;  %v2469_v35 = vmul.f32 %v2437_v21, %v2394_v55  ;;  %v2362_v51 = vmul.f32 %v2330_v2, %v4141_v29 }
 0x558   : >> { %v3410_v28 = vpop.eup %3409  ;;  %v2192_v14 = vadd.f32 1e-05, %v2150_v22 }
 0x559   : >> { %v2500_v1 = vadd.f32 1.0, %v2468_v34  ;;  %v2501_v54 = vadd.f32 1.0, %v2469_v35  ;;  %v2267_v47 = vmul.f32 %v3410_v28, %v4403_v63  ;;  %v2268_v40 = vmul.f32 %v3410_v28, %v4407_v5 }
 0x55a   : >> { %3415 = vrcp.f32 %v2192_v14  ;;  %v2395_v35 = vmul.f32 %v4254_v25, %v4254_v25 }
 0x55b   : >> { %v2073_v59 = vpop.xlane.xlu1 %2072  ;;  %v2532_v55 = vmul.f32 %v2500_v1, %v4246_v11  ;;  %v2533_v39 = vmul.f32 %v2501_v54, %v4249_v24  ;;  %v2299_v4 = vmul.f32 %v2267_v47, %v2224_v0  ;;  %v2300_v34 = vmul.f32 %v2268_v40, %v2225_v23 }
 0x55c   : >> { %v3412_v21 = vpop.eup %3411  ;;  %v2113_v22 = vadd.f32 1e-05, %v2073_v59  ;;  %v2226_v1 = vmul.f32 %v4152_v38, %v4152_v38  ;;  %v2227_v23 = vmul.f32 %v4155_v41, %v4155_v41 }
 0x55d   : >> { %v4441_v28 = vmul.f32 %v2532_v55, %v2361_v56  ;;  %v4443_v3 = vmul.f32 %v2533_v39, %v2362_v51  ;;  %v2438_v2 = vmul.f32 %v3412_v21, %v4417_v58  ;;  %v2439_v29 = vmul.f32 %v3412_v21, %v4421_v7 }
 0x55e   : >> { %3417 = vrcp.f32 %v2113_v22  ;;  %v2331_v40 = vadd.f32 1.0, %v2299_v4  ;;  %v2332_v36 = vadd.f32 1.0, %v2300_v34 }
 0x55f   : >> { %v2153_v54 = vpop.xlane.xlu1 %2152  ;;  %v2596_v47 = vmax.f32 %v4441_v28, %v4443_v3  ;;  %v2470_v0 = vmul.f32 %v2438_v2, %v2395_v35  ;;  %v2471_v14 = vmul.f32 %v2439_v29, %v2396_v27 }
 0x560   : >> { %v3414_v11 = vpop.eup %3413  ;;  %v2193_v24 = vadd.f32 1e-05, %v2153_v54  ;;  %v2363_v4 = vmul.f32 %v2331_v40, %v4146_v32  ;;  %v2364_v27 = vmul.f32 %v2332_v36, %v4149_v42  ;;  %v2397_v54 = vmul.f32 %v4264_v57, %v4264_v57 }
 0x561   : >> { %2597 = vmax.xlane.f32.xlu1 %v2596_v47  ;;  %v2269_v56 = vmul.f32 %v3414_v11, %v4403_v63  ;;  %v2270_v59 = vmul.f32 %v3414_v11, %v4407_v5  ;;  %v2502_v51 = vadd.f32 1.0, %v2470_v0  ;;  %v2503_v55 = vadd.f32 1.0, %v2471_v14 }
 0x562   : >> { %3419 = vrcp.f32 %v2193_v24  ;;  %v2398_v47 = vmul.f32 %v4267_v61, %v4267_v61 }
 0x563   : >> { %v2076_v39 = vpop.xlane.xlu1 %2075  ;;  %v2301_v21 = vmul.f32 %v2269_v56, %v2226_v1  ;;  %v2302_v22 = vmul.f32 %v2270_v59, %v2227_v23  ;;  %v2534_v2 = vmul.f32 %v2502_v51, %v4254_v25  ;;  %v2535_v29 = vmul.f32 %v2503_v55, %v4257_v20 }
 0x564   : >> { %v3416_v34 = vpop.eup %3415  ;;  %v2114_v35 = vadd.f32 1e-05, %v2076_v39  ;;  %v2228_v1 = vmul.f32 %v4158_v46, %v4158_v46 }
 0x565   : >> { %v2440_v11 = vmul.f32 %v3416_v34, %v4417_v58  ;;  %v2441_v32 = vmul.f32 %v3416_v34, %v4421_v7  ;;  %v4467_v40 = vmul.f32 %v2534_v2, %v2363_v4  ;;  %v4469_v24 = vmul.f32 %v2535_v29, %v2364_v27 }
 0x566   : >> { %3421 = vrcp.f32 %v2114_v35  ;;  %v2333_v42 = vadd.f32 1.0, %v2301_v21  ;;  %v2334_v25 = vadd.f32 1.0, %v2302_v22  ;;  %v2229_v4 = vmul.f32 %v4161_v48, %v4161_v48 }
 0x567   : >> { %v2156_v36 = vpop.xlane.xlu1 %2155  ;;  %v2472_v0 = vmul.f32 %v2440_v11, %v2397_v54  ;;  %v2473_v20 = vmul.f32 %v2441_v32, %v2398_v47  ;;  %v2599_v56 = vmax.f32 %v4467_v40, %v4469_v24  ;;  %v2399_v11 = vmul.f32 %v4274_v44, %v4274_v44 }
 0x568   : >> { %v3418_v14 = vpop.eup %3417  ;;  %v2194_v23 = vadd.f32 1e-05, %v2156_v36  ;;  %v2365_v21 = vmul.f32 %v2333_v42, %v4152_v38  ;;  %v2366_v34 = vmul.f32 %v2334_v25, %v4155_v41  ;;  %v2400_v38 = vmul.f32 %v4277_v31, %v4277_v31 }
 0x569   : >> { %v2504_v59 = vadd.f32 1.0, %v2472_v0  ;;  %v2505_v51 = vadd.f32 1.0, %v2473_v20  ;;  %v2271_v55 = vmul.f32 %v3418_v14, %v4403_v63  ;;  %v2272_v39 = vmul.f32 %v3418_v14, %v4407_v5  ;;  %2600 = vmax.xlane.f32.xlu1 %v2599_v56 }
 0x56a   : >> { %3423 = vrcp.f32 %v2194_v23  ;;  %v2230_v56 = vmul.f32 %v4164_v50, %v4164_v50 }
 0x56b   : >> { %v2079_v22 = vpop.xlane.xlu1 %2078  ;;  %v2536_v35 = vmul.f32 %v2504_v59, %v4264_v57  ;;  %v2537_v27 = vmul.f32 %v2505_v51, %v4267_v61  ;;  %v2303_v2 = vmul.f32 %v2271_v55, %v2228_v1  ;;  %v2304_v47 = vmul.f32 %v2272_v39, %v2229_v4 }
 0x56c   : >> { %v3420_v29 = vpop.eup %3419  ;;  %v2115_v54 = vadd.f32 1e-05, %v2079_v22  ;;  %v2231_v59 = vmul.f32 %v4167_v52, %v4167_v52 }
 0x56d   : >> { %v4485_v32 = vmul.f32 %v2536_v35, %v2365_v21  ;;  %v4487_v36 = vmul.f32 %v2537_v27, %v2366_v34  ;;  %v2442_v41 = vmul.f32 %v3420_v29, %v4417_v58  ;;  %v2443_v57 = vmul.f32 %v3420_v29, %v4421_v7 }
 0x56e   : >> { %3425 = vrcp.f32 %v2115_v54  ;;  %v2335_v25 = vadd.f32 1.0, %v2303_v2  ;;  %v2336_v14 = vadd.f32 1.0, %v2304_v47 }
 0x56f   : >> { %v2159_v61 = vpop.xlane.xlu1 %2158  ;;  %v2602_v42 = vmax.f32 %v4485_v32, %v4487_v36  ;;  %v2474_v1 = vmul.f32 %v2442_v41, %v2399_v11  ;;  %v2475_v23 = vmul.f32 %v2443_v57, %v2400_v38  ;;  %v2401_v11 = vmul.f32 %v4284_v16, %v4284_v16  ;;  %v5155_v38 = vld [vmem:[#allocation40_spill] sm:$0xff] }
 0x570   : >> { %v3422_v0 = vpop.eup %3421  ;;  %v2195_v20 = vadd.f32 1e-05, %v2159_v61  ;;  %v2367_v22 = vmul.f32 %v2335_v25, %v4158_v46  ;;  %v2368_v29 = vmul.f32 %v2336_v14, %v4161_v48  ;;  %v2402_v41 = vmul.f32 %v5155_v38, %v5155_v38  ;;  %v5156_v14 = vld [vmem:[#allocation27_spill] sm:$0xff] }
 0x571   : >> { %2603 = vmax.xlane.f32.xlu1 %v2602_v42  ;;  %v2273_v51 = vmul.f32 %v3422_v0, %v4403_v63  ;;  %v2274_v55 = vmul.f32 %v3422_v0, %v4407_v5  ;;  %v2506_v39 = vadd.f32 1.0, %v2474_v1  ;;  %v2507_v4 = vadd.f32 1.0, %v2475_v23 }
 0x572   : >> { %3427 = vrcp.f32 %v2195_v20  ;;  %v2232_v1 = vmul.f32 %v5156_v14, %v5156_v14 }
 0x573   : >> { %v2082_v21 = vpop.xlane.xlu1 %2081  ;;  %v2305_v34 = vmul.f32 %v2273_v51, %v2230_v56  ;;  %v2306_v35 = vmul.f32 %v2274_v55, %v2231_v59  ;;  %v2538_v54 = vmul.f32 %v2506_v39, %v4274_v44  ;;  %v2539_v47 = vmul.f32 %v2507_v4, %v4277_v31  ;;  %v5157_v4 = vld [vmem:[#allocation28_spill] sm:$0xff] }
 0x574   : >> { %v3424_v27 = vpop.eup %3423  ;;  %v2116_v2 = vadd.f32 1e-05, %v2082_v21  ;;  %v2233_v21 = vmul.f32 %v5157_v4, %v5157_v4 }
 0x575   : >> { %v2444_v57 = vmul.f32 %v3424_v27, %v4417_v58  ;;  %v2445_v46 = vmul.f32 %v3424_v27, %v4421_v7  ;;  %v4511_v61 = vmul.f32 %v2538_v54, %v2367_v22  ;;  %v4513_v42 = vmul.f32 %v2539_v47, %v2368_v29  ;;  %v2091_v22 = vpop.xlane.xlu0 %2090 }
 0x576   : >> { %3429 = vrcp.f32 %v2116_v2  ;;  %v2337_v48 = vadd.f32 1.0, %v2305_v34  ;;  %v2338_v44 = vadd.f32 1.0, %v2306_v35 }
 0x577   : >> { %v2162_v25 = vpop.xlane.xlu1 %2161  ;;  %v2476_v0 = vmul.f32 %v2444_v57, %v2401_v11  ;;  %v2477_v31 = vmul.f32 %v2445_v46, %v2402_v41  ;;  %v2605_v56 = vmax.f32 %v4511_v61, %v4513_v42  ;;  %v5158_v57 = vld [vmem:[#allocation41_spill] sm:$0xff] }
 0x578   : >> { %v3426_v20 = vpop.eup %3425  ;;  %v2196_v23 = vadd.f32 1e-05, %v2162_v25  ;;  %v2369_v34 = vmul.f32 %v2337_v48, %v4164_v50  ;;  %v2370_v27 = vmul.f32 %v2338_v44, %v4167_v52  ;;  %v2403_v46 = vmul.f32 %v5158_v57, %v5158_v57  ;;  %v5161_v50 = vld [vmem:[#allocation42_spill] sm:$0xff] }
 0x579   : >> { %v2508_v59 = vadd.f32 1.0, %v2476_v0  ;;  %v2509_v51 = vadd.f32 1.0, %v2477_v31  ;;  %v2275_v55 = vmul.f32 %v3426_v20, %v4403_v63  ;;  %v2276_v39 = vmul.f32 %v3426_v20, %v4407_v5  ;;  %2606 = vmax.xlane.f32.xlu1 %v2605_v56 }
 0x57a   : >> { %3431 = vrcp.f32 %v2196_v23  ;;  %v2119_v25 = vadd.f32 1e-05, %v2091_v22  ;;  %v2404_v48 = vmul.f32 %v5161_v50, %v5161_v50 }
 0x57b   : >> { %v2085_v35 = vpop.xlane.xlu1 %2084  ;;  %v2540_v2 = vmul.f32 %v2508_v59, %v4284_v16  ;;  %v2541_v29 = vmul.f32 %v2509_v51, %v5155_v38  ;;  %v2307_v54 = vmul.f32 %v2275_v55, %v2232_v1  ;;  %v2308_v41 = vmul.f32 %v2276_v39, %v2233_v21  ;;  %v5162_v38 = vld [vmem:[#allocation29_spill] sm:$0xff]  ;;  %v5163_v21 = vld [vmem:[#allocation30_spill] sm:$0xff] }
 0x57c   : >> { %v3428_v47 = vpop.eup %3427  ;;  %v2117_v11 = vadd.f32 1e-05, %v2085_v35  ;;  %v2234_v44 = vmul.f32 %v5162_v38, %v5162_v38  ;;  %v2235_v22 = vmul.f32 %v5163_v21, %v5163_v21 }
 0x57d   : >> { %v4529_v0 = vmul.f32 %v2540_v2, %v2369_v34  ;;  %v4531_v31 = vmul.f32 %v2541_v29, %v2370_v27  ;;  %v2446_v52 = vmul.f32 %v3428_v47, %v4417_v58  ;;  %v2447_v16 = vmul.f32 %v3428_v47, %v4421_v7 }
 0x57e   : >> { %3433 = vrcp.f32 %v2117_v11  ;;  %v2339_v23 = vadd.f32 1.0, %v2307_v54  ;;  %v2340_v51 = vadd.f32 1.0, %v2308_v41 }
 0x57f   : >> { %5159 = vst [vmem:[#allocation40_spill] sm:$0xff] %v4529_v0  ;;  %5160 = vst [vmem:[#allocation27_spill] sm:$0xff] %v4531_v31  ;;  %v2165_v20 = vpop.xlane.xlu1 %2164  ;;  %v2608_v1 = vmax.f32 %v4529_v0, %v4531_v31  ;;  %v2478_v55 = vmul.f32 %v2446_v52, %v2403_v46  ;;  %v2479_v39 = vmul.f32 %v2447_v16, %v2404_v48  ;;  %3435 = vrcp.f32 %v2119_v25  ;;  %v5164_v16 = vld [vmem:[#allocation43_spill] sm:$0xff] }
 0x580   : >> { %v3430_v56 = vpop.eup %3429  ;;  %v2197_v59 = vadd.f32 1e-05, %v2165_v20  ;;  %v2371_v54 = vmul.f32 %v2339_v23, %v5156_v14  ;;  %v2372_v48 = vmul.f32 %v2340_v51, %v5157_v4  ;;  %v2405_v20 = vmul.f32 %v5164_v16, %v5164_v16 }
 0x581   : >> { %2609 = vmax.xlane.f32.xlu1 %v2608_v1  ;;  %v2277_v34 = vmul.f32 %v3430_v56, %v4403_v63  ;;  %v2278_v35 = vmul.f32 %v3430_v56, %v4407_v5  ;;  %v2510_v27 = vadd.f32 1.0, %v2478_v55  ;;  %v2511_v2 = vadd.f32 1.0, %v2479_v39  ;;  %v5165_v1 = vld [vmem:[#allocation44_spill] sm:$0xff] }
 0x582   : >> { %3437 = vrcp.f32 %v2197_v59  ;;  %v2406_v56 = vmul.f32 %v5165_v1, %v5165_v1 }
 0x583   : >> { %v2088_v29 = vpop.xlane.xlu1 %2087  ;;  %v2309_v47 = vmul.f32 %v2277_v34, %v2234_v44  ;;  %v2310_v11 = vmul.f32 %v2278_v35, %v2235_v22  ;;  %v2542_v52 = vmul.f32 %v2510_v27, %v5158_v57  ;;  %v2543_v25 = vmul.f32 %v2511_v2, %v5161_v50 }
 0x584   : >> { %v3432_v41 = vpop.eup %3431  ;;  %v2118_v46 = vadd.f32 1e-05, %v2088_v29  ;;  %v2236_v22 = vmul.f32 %v4182_v62, %v4182_v62 }
 0x585   : >> { %v2448_v59 = vmul.f32 %v3432_v41, %v4417_v58  ;;  %v2449_v14 = vmul.f32 %v3432_v41, %v4421_v7  ;;  %v4555_v44 = vmul.f32 %v2542_v52, %v2371_v54  ;;  %v4557_v23 = vmul.f32 %v2543_v25, %v2372_v48  ;;  %v5168_v41 = vld [vmem:[#allocation31_spill] sm:$0xff] }
 0x586   : >> { %3439 = vrcp.f32 %v2118_v46  ;;  %v2341_v4 = vadd.f32 1.0, %v2309_v47  ;;  %v2342_v57 = vadd.f32 1.0, %v2310_v11  ;;  %v2237_v47 = vmul.f32 %v5168_v41, %v5168_v41 }
 0x587   : >> { %5166 = vst [vmem:[#allocation28_spill] sm:$0xff] %v4555_v44  ;;  %5167 = vst [vmem:[#allocation41_spill] sm:$0xff] %v4557_v23  ;;  %v2168_v51 = vpop.xlane.xlu1 %2167  ;;  %v2480_v55 = vmul.f32 %v2448_v59, %v2405_v20  ;;  %v2481_v50 = vmul.f32 %v2449_v14, %v2406_v56  ;;  %v2611_v35 = vmax.f32 %v4555_v44, %v4557_v23 }
 0x588   : >> { %v3434_v39 = vpop.eup %3433  ;;  %v2198_v34 = vadd.f32 1e-05, %v2168_v51  ;;  %v2373_v11 = vmul.f32 %v2341_v4, %v5162_v38  ;;  %v2374_v52 = vmul.f32 %v2342_v57, %v5163_v21  ;;  %v2238_v14 = vmul.f32 %v4188_v6, %v4188_v6 }
 0x589   : >> { %v2512_v27 = vadd.f32 1.0, %v2480_v55  ;;  %v2513_v2 = vadd.f32 1.0, %v2481_v50  ;;  %v2279_v29 = vmul.f32 %v3434_v39, %v4403_v63  ;;  %v2280_v54 = vmul.f32 %v3434_v39, %v4407_v5  ;;  %2612 = vmax.xlane.f32.xlu1 %v2611_v35  ;;  %v3436_v46 = vpop.eup %3435  ;;  %v5169_v39 = vld [vmem:[#allocation32_spill] sm:$0xff] }
 0x58a   : >> { %3441 = vrcp.f32 %v2198_v34  ;;  %v2239_v51 = vmul.f32 %v4191_v8, %v4191_v8  ;;  %v2240_v38 = vmul.f32 %v5169_v39, %v5169_v39  ;;  %v2407_v21 = vmul.f32 %v4347_v60, %v4347_v60  ;;  %v5172_v34 = vld [vmem:[#allocation33_spill] sm:$0xff] }
 0x58b   : >> { %v2171_v48 = vpop.xlane.xlu1 %2170  ;;  %v2544_v25 = vmul.f32 %v2512_v27, %v5164_v16  ;;  %v2545_v20 = vmul.f32 %v2513_v2, %v5165_v1  ;;  %v2311_v56 = vmul.f32 %v2279_v29, %v2236_v22  ;;  %v2312_v50 = vmul.f32 %v2280_v54, %v2237_v47 }
 0x58c   : >> { %v3438_v59 = vpop.eup %3437  ;;  %v2199_v55 = vadd.f32 1e-05, %v2171_v48  ;;  %v2408_v1 = vmul.f32 %v4350_v13, %v4350_v13  ;;  %v2241_v35 = vmul.f32 %v5172_v34, %v5172_v34  ;;  %v2283_v54 = vmul.f32 %v3436_v46, %v4403_v63 }
 0x58d   : >> { %v4579_v4 = vmul.f32 %v2544_v25, %v2373_v11  ;;  %v4581_v16 = vmul.f32 %v2545_v20, %v2374_v52  ;;  %v2450_v57 = vmul.f32 %v3438_v59, %v4417_v58  ;;  %v2451_v22 = vmul.f32 %v3438_v59, %v4421_v7 }
 0x58e   : >> { %3443 = vrcp.f32 %v2199_v55  ;;  %v2343_v29 = vadd.f32 1.0, %v2311_v56  ;;  %v2344_v48 = vadd.f32 1.0, %v2312_v50  ;;  %v2409_v20 = vmul.f32 %v4292_v37, %v4292_v37 }
 0x58f   : >> { %5170 = vst [vmem:[#allocation42_spill] sm:$0xff] %v4579_v4  ;;  %5171 = vst [vmem:[#allocation29_spill] sm:$0xff] %v4581_v16  ;;  %v2094_v27 = vpop.xlane.xlu1 %2093  ;;  %v2614_v2 = vmax.f32 %v4579_v4, %v4581_v16  ;;  %v2482_v52 = vmul.f32 %v2450_v57, %v2407_v21  ;;  %v2483_v25 = vmul.f32 %v2451_v22, %v2408_v1 }
 0x590   : >> { %v3440_v47 = vpop.eup %3439  ;;  %v2120_v11 = vadd.f32 1e-05, %v2094_v27  ;;  %v2284_v23 = vmul.f32 %v3436_v46, %v4407_v5  ;;  %v2410_v56 = vmul.f32 %v4297_v9, %v4297_v9  ;;  %v2375_v50 = vmul.f32 %v2343_v29, %v4182_v62 }
 0x591   : >> { %2615 = vmax.xlane.f32.xlu1 %v2614_v2  ;;  %v2281_v59 = vmul.f32 %v3440_v47, %v4403_v63  ;;  %v2282_v55 = vmul.f32 %v3440_v47, %v4407_v5  ;;  %v2514_v16 = vadd.f32 1.0, %v2482_v52  ;;  %v2515_v4 = vadd.f32 1.0, %v2483_v25 }
 0x592   : >> { %3445 = vrcp.f32 %v2120_v11  ;;  %v2315_v57 = vmul.f32 %v2283_v54, %v2240_v38  ;;  %v2376_v44 = vmul.f32 %v2344_v48, %v5168_v41  ;;  %v2316_v52 = vmul.f32 %v2284_v23, %v2241_v35 }
 0x593   : >> { %v2174_v27 = vpop.xlane.xlu1 %2173  ;;  %v2313_v21 = vmul.f32 %v2281_v59, %v2238_v14  ;;  %v2314_v1 = vmul.f32 %v2282_v55, %v2239_v51  ;;  %v2546_v47 = vmul.f32 %v2514_v16, %v4347_v60  ;;  %v2547_v46 = vmul.f32 %v2515_v4, %v4350_v13 }
 0x594   : >> { %v3442_v22 = vpop.eup %3441  ;;  %v2200_v2 = vadd.f32 1e-05, %v2174_v27  ;;  %v2411_v51 = vmul.f32 %v4300_v43, %v4300_v43  ;;  %v2412_v13 = vmul.f32 %v4309_v53, %v4309_v53  ;;  %v2347_v35 = vadd.f32 1.0, %v2315_v57 }
 0x595   : >> { %v2345_v31 = vadd.f32 1.0, %v2313_v21  ;;  %v2452_v0 = vmul.f32 %v3442_v22, %v4417_v58  ;;  %v2453_v11 = vmul.f32 %v3442_v22, %v4421_v7  ;;  %v4605_v25 = vmul.f32 %v2546_v47, %v2375_v50 }
 0x596   : >> { %3447 = vrcp.f32 %v2200_v2  ;;  %v4607_v62 = vmul.f32 %v2547_v46, %v2376_v44  ;;  %v2346_v14 = vadd.f32 1.0, %v2314_v1  ;;  %v2348_v59 = vadd.f32 1.0, %v2316_v52 }
 0x597   : >> { %v2097_v41 = vpop.xlane.xlu1 %2096  ;;  %v2484_v38 = vmul.f32 %v2452_v0, %v2409_v20  ;;  %v2485_v60 = vmul.f32 %v2453_v11, %v2410_v56  ;;  %v2377_v0 = vmul.f32 %v2345_v31, %v4188_v6  ;;  %v2242_v57 = vmul.f32 %v4202_v15, %v4202_v15 }
 0x598   : >> { %v3444_v16 = vpop.eup %3443  ;;  %v2121_v4 = vadd.f32 1e-05, %v2097_v41  ;;  %v2617_v23 = vmax.f32 %v4605_v25, %v4607_v62  ;;  %v2378_v20 = vmul.f32 %v2346_v14, %v4191_v8  ;;  %v2243_v22 = vmul.f32 %v4205_v17, %v4205_v17 }
 0x599   : >> { %v2516_v29 = vadd.f32 1.0, %v2484_v38  ;;  %v2517_v54 = vadd.f32 1.0, %v2485_v60  ;;  %v2454_v44 = vmul.f32 %v3444_v16, %v4417_v58  ;;  %v2455_v48 = vmul.f32 %v3444_v16, %v4421_v7 }
 0x59a   : >> { %3449 = vrcp.f32 %v2121_v4  ;;  %2618 = vmax.xlane.f32.xlu1 %v2617_v23  ;;  %v2413_v6 = vmul.f32 %v4314_v10, %v4314_v10  ;;  %v2414_v16 = vmul.f32 %v4319_v18, %v4319_v18 }
 0x59b   : >> { %v2177_v55 = vpop.xlane.xlu1 %2176  ;;  %v2548_v56 = vmul.f32 %v2516_v29, %v4292_v37  ;;  %v2549_v27 = vmul.f32 %v2517_v54, %v4297_v9  ;;  %v2486_v50 = vmul.f32 %v2454_v44, %v2411_v51  ;;  %v2487_v21 = vmul.f32 %v2455_v48, %v2412_v13 }
 0x59c   : >> { %v3446_v1 = vpop.eup %3445  ;;  %v2201_v31 = vadd.f32 1e-05, %v2177_v55  ;;  %v2379_v9 = vmul.f32 %v2347_v35, %v5169_v39  ;;  %v2380_v51 = vmul.f32 %v2348_v59, %v5172_v34  ;;  %v2244_v59 = vmul.f32 %v4208_v19, %v4208_v19 }
 0x59d   : >> { %v4627_v8 = vmul.f32 %v2548_v56, %v2377_v0  ;;  %v4629_v2 = vmul.f32 %v2549_v27, %v2378_v20  ;;  %v2518_v37 = vadd.f32 1.0, %v2486_v50  ;;  %v2519_v47 = vadd.f32 1.0, %v2487_v21 }
 0x59e   : >> { %3451 = vrcp.f32 %v2201_v31  ;;  %v2285_v46 = vmul.f32 %v3446_v1, %v4403_v63  ;;  %v2286_v11 = vmul.f32 %v3446_v1, %v4407_v5  ;;  %v2245_v1 = vmul.f32 %v4211_v26, %v4211_v26 }
 0x59f   : >> { %v2100_v52 = vpop.xlane.xlu1 %2099  ;;  %v2620_v14 = vmax.f32 %v4627_v8, %v4629_v2  ;;  %v2550_v41 = vmul.f32 %v2518_v37, %v4300_v43  ;;  %v2551_v38 = vmul.f32 %v2519_v47, %v4309_v53 }
 0x5a0   : >> { %v3448_v60 = vpop.eup %3447  ;;  %v2122_v13 = vadd.f32 1e-05, %v2100_v52  ;;  %v2317_v39 = vmul.f32 %v2285_v46, %v2242_v57  ;;  %v2318_v4 = vmul.f32 %v2286_v11, %v2243_v22  ;;  %v2415_v52 = vmul.f32 %v4322_v49, %v4322_v49 }
 0x5a1   : >> { %2621 = vmax.xlane.f32.xlu1 %v2620_v14  ;;  %v4641_v23 = vmul.f32 %v2550_v41, %v2379_v9  ;;  %v4643_v35 = vmul.f32 %v2551_v38, %v2380_v51  ;;  %v2456_v29 = vmul.f32 %v3448_v60, %v4417_v58  ;;  %v2457_v34 = vmul.f32 %v3448_v60, %v4421_v7 }
 0x5a2   : >> { %3453 = vrcp.f32 %v2122_v13  ;;  %v2349_v43 = vadd.f32 1.0, %v2317_v39  ;;  %v2350_v44 = vadd.f32 1.0, %v2318_v4 }
 0x5a3   : >> { %v2180_v54 = vpop.xlane.xlu1 %2179  ;;  %v2623_v53 = vmax.f32 %v4641_v23, %v4643_v35  ;;  %v2488_v48 = vmul.f32 %v2456_v29, %v2413_v6  ;;  %v2489_v0 = vmul.f32 %v2457_v34, %v2414_v16  ;;  %v2246_v29 = vmul.f32 %v4214_v30, %v4214_v30 }
 0x5a4   : >> { %v3450_v20 = vpop.eup %3449  ;;  %v2202_v55 = vadd.f32 1e-05, %v2180_v54  ;;  %v2381_v57 = vmul.f32 %v2349_v43, %v4202_v15  ;;  %v2382_v6 = vmul.f32 %v2350_v44, %v4205_v17  ;;  %v2416_v15 = vmul.f32 %v4331_v12, %v4331_v12 }
 0x5a5   : >> { %2624 = vmax.xlane.f32.xlu1 %v2623_v53  ;;  %v2520_v56 = vadd.f32 1.0, %v2488_v48  ;;  %v2521_v27 = vadd.f32 1.0, %v2489_v0  ;;  %v2287_v50 = vmul.f32 %v3450_v20, %v4403_v63  ;;  %v2288_v21 = vmul.f32 %v3450_v20, %v4407_v5 }
 0x5a6   : >> { %3455 = vrcp.f32 %v2202_v55  ;;  %v2247_v34 = vmul.f32 %v4217_v33, %v4217_v33 }
 0x5a7   : >> { %v2103_v22 = vpop.xlane.xlu1 %2102  ;;  %v2552_v31 = vmul.f32 %v2520_v56, %v4314_v10  ;;  %v2553_v37 = vmul.f32 %v2521_v27, %v4319_v18  ;;  %v2319_v47 = vmul.f32 %v2287_v50, %v2244_v59  ;;  %v2320_v11 = vmul.f32 %v2288_v21, %v2245_v1 }
 0x5a8   : >> { %v3452_v9 = vpop.eup %3451  ;;  %v2123_v46 = vadd.f32 1e-05, %v2103_v22  ;;  %v2417_v1 = vmul.f32 %v4336_v45, %v4336_v45 }
 0x5a9   : >> { %v4661_v14 = vmul.f32 %v2552_v31, %v2381_v57  ;;  %v4663_v51 = vmul.f32 %v2553_v37, %v2382_v6  ;;  %v2458_v17 = vmul.f32 %v3452_v9, %v4417_v58  ;;  %v2459_v10 = vmul.f32 %v3452_v9, %v4421_v7  ;;  %v5173_v57 = vld [vmem:[#allocation45_spill] sm:$0xff] }
 0x5aa   : >> { %3457 = vrcp.f32 %v2123_v46  ;;  %v2351_v38 = vadd.f32 1.0, %v2319_v47  ;;  %v2352_v13 = vadd.f32 1.0, %v2320_v11  ;;  %v2418_v22 = vmul.f32 %v5173_v57, %v5173_v57  ;;  %v5174_v11 = vld [vmem:[#allocation34_spill] sm:$0xff] }
 0x5ab   : >> { %v2183_v18 = vpop.xlane.xlu1 %2182  ;;  %v2626_v41 = vmax.f32 %v4661_v14, %v4663_v51  ;;  %v2490_v39 = vmul.f32 %v2458_v17, %v2415_v52  ;;  %v2491_v4 = vmul.f32 %v2459_v10, %v2416_v15  ;;  %v2248_v52 = vmul.f32 %v5174_v11, %v5174_v11 }
 0x5ac   : >> { %v3454_v60 = vpop.eup %3453  ;;  %v2203_v16 = vadd.f32 1e-05, %v2183_v18  ;;  %v2383_v0 = vmul.f32 %v2351_v38, %v4208_v19  ;;  %v2384_v27 = vmul.f32 %v2352_v13, %v4211_v26 }
 0x5ad   : >> { %2627 = vmax.xlane.f32.xlu1 %v2626_v41  ;;  %v2289_v43 = vmul.f32 %v3454_v60, %v4403_v63  ;;  %v2290_v54 = vmul.f32 %v3454_v60, %v4407_v5  ;;  %v2522_v53 = vadd.f32 1.0, %v2490_v39  ;;  %v2523_v44 = vadd.f32 1.0, %v2491_v4  ;;  %v5175_v60 = vld [vmem:[#allocation35_spill] sm:$0xff] }
 0x5ae   : >> { %3459 = vrcp.f32 %v2203_v16  ;;  %v2249_v16 = vmul.f32 %v5175_v60, %v5175_v60 }
 0x5af   : >> { %v2106_v48 = vpop.xlane.xlu1 %2105  ;;  %v2321_v20 = vmul.f32 %v2289_v43, %v2246_v29  ;;  %v2322_v59 = vmul.f32 %v2290_v54, %v2247_v34  ;;  %v2554_v50 = vmul.f32 %v2522_v53, %v4322_v49  ;;  %v2555_v21 = vmul.f32 %v2523_v44, %v4331_v12 }
 0x5b0   : >> { %v3456_v55 = vpop.eup %3455  ;;  %v2124_v56 = vadd.f32 1e-05, %v2106_v48  ;;  %v5176_v48 = vld [vmem:[#allocation46_spill] sm:$0xff] }
 0x5b1   : >> { %v2460_v6 = vmul.f32 %v3456_v55, %v4417_v58  ;;  %v2461_v19 = vmul.f32 %v3456_v55, %v4421_v7  ;;  %v4687_v31 = vmul.f32 %v2554_v50, %v2383_v0  ;;  %v4689_v37 = vmul.f32 %v2555_v21, %v2384_v27  ;;  %v5177_v55 = vld [vmem:[#allocation47_spill] sm:$0xff] }
 0x5b2   : >> { %3461 = vrcp.f32 %v2124_v56  ;;  %v2353_v26 = vadd.f32 1.0, %v2321_v20  ;;  %v2354_v49 = vadd.f32 1.0, %v2322_v59  ;;  %v2419_v0 = vmul.f32 %v5176_v48, %v5176_v48 }
 0x5b3   : >> { %v2186_v47 = vpop.xlane.xlu1 %2185  ;;  %v2492_v9 = vmul.f32 %v2460_v6, %v2417_v1  ;;  %v2493_v12 = vmul.f32 %v2461_v19, %v2418_v22  ;;  %v2629_v17 = vmax.f32 %v4687_v31, %v4689_v37  ;;  %v5178_v19 = vld [vmem:[#allocation36_spill] sm:$0xff] }
 0x5b4   : >> { %v3458_v46 = vpop.eup %3457  ;;  %v2204_v15 = vadd.f32 1e-05, %v2186_v47  ;;  %v2385_v13 = vmul.f32 %v2353_v26, %v4214_v30  ;;  %v2386_v4 = vmul.f32 %v2354_v49, %v4217_v33  ;;  %v2420_v30 = vmul.f32 %v5177_v55, %v5177_v55  ;;  %v5179_v47 = vld [vmem:[#allocation37_spill] sm:$0xff] }
 0x5b5   : >> { %v2524_v10 = vadd.f32 1.0, %v2492_v9  ;;  %v2525_v18 = vadd.f32 1.0, %v2493_v12  ;;  %v2291_v41 = vmul.f32 %v3458_v46, %v4403_v63  ;;  %v2292_v38 = vmul.f32 %v3458_v46, %v4407_v5  ;;  %2630 = vmax.xlane.f32.xlu1 %v2629_v17 }
 0x5b6   : >> { %3463 = vrcp.f32 %v2204_v15  ;;  %v2250_v26 = vmul.f32 %v5178_v19, %v5178_v19  ;;  %v2251_v49 = vmul.f32 %v5179_v47, %v5179_v47 }
 0x5b7   : >> { %v2109_v39 = vpop.xlane.xlu1 %2108  ;;  %v2556_v29 = vmul.f32 %v2524_v10, %v4336_v45  ;;  %v2557_v34 = vmul.f32 %v2525_v18, %v5173_v57  ;;  %v2323_v43 = vmul.f32 %v2291_v41, %v2248_v52  ;;  %v2324_v44 = vmul.f32 %v2292_v38, %v2249_v16 }
 0x5b8   : >> { %v3460_v54 = vpop.eup %3459  ;;  %v2125_v53 = vadd.f32 1e-05, %v2109_v39 }
 0x5b9   : >> { %v4705_v20 = vmul.f32 %v2556_v29, %v2385_v13  ;;  %v4707_v59 = vmul.f32 %v2557_v34, %v2386_v4  ;;  %v2462_v33 = vmul.f32 %v3460_v54, %v4417_v58  ;;  %v2463_v45 = vmul.f32 %v3460_v54, %v4421_v7  ;;  %v5180_v13 = vld [vmem:[#allocation48_spill] sm:$0xff]  ;;  %v5181_v4 = vld [vmem:[#allocation49_spill] sm:$0xff] }
 0x5ba   : >> { %3465 = vrcp.f32 %v2125_v53  ;;  %v2355_v50 = vadd.f32 1.0, %v2323_v43  ;;  %v2356_v57 = vadd.f32 1.0, %v2324_v44  ;;  %v2421_v39 = vmul.f32 %v5180_v13, %v5180_v13 }
 0x5bb   : >> { %v2189_v56 = vpop.xlane.xlu1 %2188  ;;  %v2632_v27 = vmax.f32 %v4705_v20, %v4707_v59  ;;  %v2494_v22 = vmul.f32 %v2462_v33, %v2419_v0  ;;  %v2495_v6 = vmul.f32 %v2463_v45, %v2420_v30  ;;  %v2422_v29 = vmul.f32 %v5181_v4, %v5181_v4 }
 0x5bc   : >> { %v3462_v21 = vpop.eup %3461  ;;  %v2205_v1 = vadd.f32 1e-05, %v2189_v56  ;;  %v2387_v18 = vmul.f32 %v2355_v50, %v5174_v11  ;;  %v2388_v41 = vmul.f32 %v2356_v57, %v5175_v60 }
 0x5bd   : >> { %2633 = vmax.xlane.f32.xlu0 %v2632_v27  ;;  %v2293_v9 = vmul.f32 %v3462_v21, %v4403_v63  ;;  %v2294_v12 = vmul.f32 %v3462_v21, %v4407_v5  ;;  %v2526_v46 = vadd.f32 1.0, %v2494_v22  ;;  %v2527_v52 = vadd.f32 1.0, %v2495_v6  ;;  %v5182_v27 = vld [vmem:[#allocation38_spill] sm:$0xff]  ;;  %v5183_v21 = vld [vmem:[#allocation39_spill] sm:$0xff] }
 0x5be   : >> { %3467 = vrcp.f32 %v2205_v1  ;;  %v2252_v50 = vmul.f32 %v5182_v27, %v5182_v27  ;;  %v2253_v1 = vmul.f32 %v5183_v21, %v5183_v21 }
 0x5bf   : >> { %v2325_v15 = vmul.f32 %v2293_v9, %v2250_v26  ;;  %v2326_v17 = vmul.f32 %v2294_v12, %v2251_v49  ;;  %v2558_v38 = vmul.f32 %v2526_v46, %v5176_v48  ;;  %v2559_v16 = vmul.f32 %v2527_v52, %v5177_v55  ;;  %v5184_v46 = vld [vmem:[#allocation50_spill] sm:$0xff] }
 0x5c0   : >> { %v3464_v10 = vpop.eup %3463  ;;  %v2423_v52 = vmul.f32 %v5184_v46, %v5184_v46 }
 0x5c1   : >> { %v2464_v34 = vmul.f32 %v3464_v10, %v4417_v58  ;;  %v2465_v43 = vmul.f32 %v3464_v10, %v4421_v7  ;;  %v4731_v54 = vmul.f32 %v2558_v38, %v2387_v18  ;;  %v4733_v53 = vmul.f32 %v2559_v16, %v2388_v41 }
 0x5c2   : >> { %v2357_v11 = vadd.f32 1.0, %v2325_v15  ;;  %v2358_v60 = vadd.f32 1.0, %v2326_v17  ;;  %v5185_v15 = vld [vmem:[#allocation51_spill] sm:$0xff] }
 0x5c3   : >> { %v2496_v44 = vmul.f32 %v2464_v34, %v2421_v39  ;;  %v2497_v48 = vmul.f32 %v2465_v43, %v2422_v29  ;;  %v2635_v55 = vmax.f32 %v4731_v54, %v4733_v53  ;;  %v2424_v17 = vmul.f32 %v5185_v15, %v5185_v15 }
 0x5c4   : >> { %v3466_v0 = vpop.eup %3465  ;;  %v2389_v57 = vmul.f32 %v2357_v11, %v5178_v19  ;;  %v2390_v22 = vmul.f32 %v2358_v60, %v5179_v47 }
 0x5c5   : >> { %v2528_v30 = vadd.f32 1.0, %v2496_v44  ;;  %v2529_v33 = vadd.f32 1.0, %v2497_v48  ;;  %v2295_v45 = vmul.f32 %v3466_v0, %v4403_v63  ;;  %v2296_v56 = vmul.f32 %v3466_v0, %v4407_v5  ;;  %2636 = vmax.xlane.f32.xlu1 %v2635_v55 }
 0x5c7   : >> { %v2560_v6 = vmul.f32 %v2528_v30, %v5180_v13  ;;  %v2561_v26 = vmul.f32 %v2529_v33, %v5181_v4  ;;  %v2327_v9 = vmul.f32 %v2295_v45, %v2252_v50  ;;  %v2328_v63 = vmul.f32 %v2296_v56, %v2253_v1 }
 0x5c8   : >> { %v3468_v49 = vpop.eup %3467 }
 0x5c9   : >> { %v4747_v12 = vmul.f32 %v2560_v6, %v2389_v57  ;;  %v4749_v5 = vmul.f32 %v2561_v26, %v2390_v22  ;;  %v2466_v19 = vmul.f32 %v3468_v49, %v4417_v58  ;;  %v2467_v47 = vmul.f32 %v3468_v49, %v4421_v7 }
 0x5ca   : >> { %v2359_v18 = vadd.f32 1.0, %v2327_v9  ;;  %v2360_v41 = vadd.f32 1.0, %v2328_v63 }
 0x5cb   : >> { %v2638_v10 = vmax.f32 %v4747_v12, %v4749_v5  ;;  %v2498_v38 = vmul.f32 %v2466_v19, %v2423_v52  ;;  %v2499_v16 = vmul.f32 %v2467_v47, %v2424_v17  ;;  %v5186_v17 = vld [vmem:[#allocation40_spill] sm:$0xff]  ;;  %v5187_v47 = vld [vmem:[#allocation27_spill] sm:$0xff] }
 0x5cc   : >> { %v2391_v4 = vmul.f32 %v2359_v18, %v5182_v27  ;;  %v2392_v29 = vmul.f32 %v2360_v41, %v5183_v21 }
 0x5cd   : >> { %2639 = vmax.xlane.f32.xlu0 %v2638_v10  ;;  %v2530_v13 = vadd.f32 1.0, %v2498_v38  ;;  %v2531_v39 = vadd.f32 1.0, %v2499_v16 }
 0x5cf   : >> { %v2562_v34 = vmul.f32 %v2530_v13, %v5184_v46  ;;  %v2563_v58 = vmul.f32 %v2531_v39, %v5185_v15  ;;  %v5188_v13 = vld [vmem:[#allocation28_spill] sm:$0xff] }
 0x5d1   : >> { %v4763_v43 = vmul.f32 %v2562_v34, %v2391_v4  ;;  %v4765_v7 = vmul.f32 %v2563_v58, %v2392_v29  ;;  %v5189_v4 = vld [vmem:[#allocation41_spill] sm:$0xff] }
 0x5d3   : >> { %v2641_v11 = vmax.f32 %v4763_v43, %v4765_v7 }
 0x5d5   : >> { %2642 = vmax.xlane.f32.xlu1 %v2641_v11 }
 0x5ee   : >> { %v2598_v60 = vpop.xlane.xlu1 %2597 }
 0x5ef   : >> { %v2644_v44 = vsub.f32 %v4441_v28, %v2598_v60  ;;  %v2645_v48 = vsub.f32 %v4443_v3, %v2598_v60 }
 0x5f1   : >> { %v2676_v0 = vmul.f32 1.442695, %v2644_v44  ;;  %v2678_v55 = vmul.f32 1.442695, %v2645_v48 }
 0x5f3   : >> { %3469 = vpow2.f32 %v2676_v0  ;;  %v5190_v0 = vld [vmem:[#allocation42_spill] sm:$0xff] }
 0x5f4   : >> { %3471 = vpow2.f32 %v2678_v55 }
 0x5f6   : >> { %v2601_v30 = vpop.xlane.xlu1 %2600 }
 0x5f7   : >> { %v2646_v33 = vsub.f32 %v4467_v40, %v2601_v30  ;;  %v2647_v45 = vsub.f32 %v4469_v24, %v2601_v30  ;;  %v5191_v30 = vld [vmem:[#allocation29_spill] sm:$0xff] }
 0x5f9   : >> { %v2680_v56 = vmul.f32 1.442695, %v2646_v33  ;;  %v2682_v27 = vmul.f32 1.442695, %v2647_v45 }
 0x5fb   : >> { %3473 = vpow2.f32 %v2680_v56 }
 0x5fc   : >> { %3475 = vpow2.f32 %v2682_v27 }
 0x5fd   : >> { %v4773_v50 = vpop.eup %3469 }
 0x5fe   : >> { %v4775_v21 = vpop.eup %3471  ;;  %v2604_v28 = vpop.xlane.xlu1 %2603 }
 0x5ff   : >> { %v2648_v3 = vsub.f32 %v4485_v32, %v2604_v28  ;;  %v2649_v1 = vsub.f32 %v4487_v36, %v2604_v28  ;;  %v2740_v57 = vadd.f32 %v4775_v21, %v4773_v50 }
 0x601   : >> { %v2684_v22 = vmul.f32 1.442695, %v2648_v3  ;;  %v2686_v40 = vmul.f32 1.442695, %v2649_v1  ;;  %2741 = vadd.xlane.f32.xlu0 %v2740_v57 }
 0x603   : >> { %3477 = vpow2.f32 %v2684_v22 }
 0x604   : >> { %3479 = vpow2.f32 %v2686_v40 }
 0x605   : >> { %v4781_v24 = vpop.eup %3473 }
 0x606   : >> { %v4783_v6 = vpop.eup %3475  ;;  %v2607_v26 = vpop.xlane.xlu1 %2606 }
 0x607   : >> { %v2650_v49 = vsub.f32 %v4511_v61, %v2607_v26  ;;  %v2651_v9 = vsub.f32 %v4513_v42, %v2607_v26  ;;  %v2743_v32 = vadd.f32 %v4783_v6, %v4781_v24 }
 0x609   : >> { %v2688_v36 = vmul.f32 1.442695, %v2650_v49  ;;  %v2690_v63 = vmul.f32 1.442695, %v2651_v9  ;;  %2744 = vadd.xlane.f32.xlu1 %v2743_v32 }
 0x60b   : >> { %3481 = vpow2.f32 %v2688_v36 }
 0x60c   : >> { %3483 = vpow2.f32 %v2690_v63 }
 0x60d   : >> { %v4789_v46 = vpop.eup %3477 }
 0x60e   : >> { %v4791_v52 = vpop.eup %3479  ;;  %v2610_v15 = vpop.xlane.xlu1 %2609 }
 0x60f   : >> { %v2652_v19 = vsub.f32 %v5186_v17, %v2610_v15  ;;  %v2653_v10 = vsub.f32 %v5187_v47, %v2610_v15  ;;  %v2746_v61 = vadd.f32 %v4791_v52, %v4789_v46 }
 0x611   : >> { %v2692_v42 = vmul.f32 1.442695, %v2652_v19  ;;  %v2694_v18 = vmul.f32 1.442695, %v2653_v10  ;;  %2747 = vadd.xlane.f32.xlu0 %v2746_v61 }
 0x613   : >> { %3485 = vpow2.f32 %v2692_v42 }
 0x614   : >> { %3487 = vpow2.f32 %v2694_v18 }
 0x615   : >> { %v4797_v41 = vpop.eup %3481 }
 0x616   : >> { %v4799_v38 = vpop.eup %3483  ;;  %v2613_v16 = vpop.xlane.xlu1 %2612 }
 0x617   : >> { %v2654_v39 = vsub.f32 %v5188_v13, %v2613_v16  ;;  %v2655_v29 = vsub.f32 %v5189_v4, %v2613_v16  ;;  %v2749_v34 = vadd.f32 %v4799_v38, %v4797_v41 }
 0x619   : >> { %v2696_v58 = vmul.f32 1.442695, %v2654_v39  ;;  %v2698_v11 = vmul.f32 1.442695, %v2655_v29  ;;  %2750 = vadd.xlane.f32.xlu1 %v2749_v34 }
 0x61b   : >> { %3489 = vpow2.f32 %v2696_v58 }
 0x61c   : >> { %3491 = vpow2.f32 %v2698_v11 }
 0x61d   : >> { %v4805_v60 = vpop.eup %3485 }
 0x61e   : >> { %v4807_v44 = vpop.eup %3487  ;;  %v2616_v48 = vpop.xlane.xlu1 %2615 }
 0x61f   : >> { %v2656_v55 = vsub.f32 %v5190_v0, %v2616_v48  ;;  %v2657_v33 = vsub.f32 %v5191_v30, %v2616_v48  ;;  %v2752_v45 = vadd.f32 %v4807_v44, %v4805_v60 }
 0x621   : >> { %v2700_v56 = vmul.f32 1.442695, %v2656_v55  ;;  %v2702_v27 = vmul.f32 1.442695, %v2657_v33  ;;  %2753 = vadd.xlane.f32.xlu0 %v2752_v45 }
 0x623   : >> { %3493 = vpow2.f32 %v2700_v56 }
 0x624   : >> { %3495 = vpow2.f32 %v2702_v27 }
 0x625   : >> { %v4813_v28 = vpop.eup %3489 }
 0x626   : >> { %v4815_v3 = vpop.eup %3491 }
 0x627   : >> { %v2619_v1 = vpop.xlane.xlu1 %2618  ;;  %v2755_v40 = vadd.f32 %v4815_v3, %v4813_v28 }
 0x628   : >> { %v2658_v57 = vsub.f32 %v4605_v25, %v2619_v1  ;;  %v2659_v22 = vsub.f32 %v4607_v62, %v2619_v1 }
 0x629   : >> { %2756 = vadd.xlane.f32.xlu1 %v2755_v40 }
 0x62a   : >> { %v2704_v26 = vmul.f32 1.442695, %v2658_v57  ;;  %v2706_v49 = vmul.f32 1.442695, %v2659_v22 }
 0x62c   : >> { %3497 = vpow2.f32 %v2704_v26 }
 0x62d   : >> { %v4821_v9 = vpop.eup %3493  ;;  %3499 = vpow2.f32 %v2706_v49 }
 0x62e   : >> { %v4823_v32 = vpop.eup %3495  ;;  %v2622_v36 = vpop.xlane.xlu1 %2621 }
 0x62f   : >> { %v2660_v63 = vsub.f32 %v4627_v8, %v2622_v36  ;;  %v2661_v15 = vsub.f32 %v4629_v2, %v2622_v36  ;;  %v2758_v25 = vadd.f32 %v4823_v32, %v4821_v9 }
 0x631   : >> { %v2708_v62 = vmul.f32 1.442695, %v2660_v63  ;;  %v2710_v17 = vmul.f32 1.442695, %v2661_v15  ;;  %2759 = vadd.xlane.f32.xlu0 %v2758_v25 }
 0x632   : >> { %v2625_v19 = vpop.xlane.xlu1 %2624 }
 0x633   : >> { %3501 = vpow2.f32 %v2708_v62  ;;  %v2662_v47 = vsub.f32 %v4641_v23, %v2625_v19  ;;  %v2663_v10 = vsub.f32 %v4643_v35, %v2625_v19 }
 0x634   : >> { %3503 = vpow2.f32 %v2710_v17 }
 0x635   : >> { %v2712_v61 = vmul.f32 1.442695, %v2662_v47  ;;  %v2714_v42 = vmul.f32 1.442695, %v2663_v10 }
 0x636   : >> { %v4831_v18 = vpop.eup %3497 }
 0x637   : >> { %v4833_v8 = vpop.eup %3499  ;;  %3505 = vpow2.f32 %v2712_v61 }
 0x638   : >> { %3507 = vpow2.f32 %v2714_v42  ;;  %v2761_v2 = vadd.f32 %v4833_v8, %v4831_v18 }
 0x63a   : >> { %2762 = vadd.xlane.f32.xlu1 %v2761_v2  ;;  %v2628_v16 = vpop.xlane.xlu1 %2627 }
 0x63b   : >> { %v2664_v13 = vsub.f32 %v4661_v14, %v2628_v16  ;;  %v2665_v23 = vsub.f32 %v4663_v51, %v2628_v16 }
 0x63d   : >> { %v4839_v39 = vpop.eup %3501  ;;  %v2716_v35 = vmul.f32 1.442695, %v2664_v13  ;;  %v2718_v4 = vmul.f32 1.442695, %v2665_v23 }
 0x63e   : >> { %v4841_v29 = vpop.eup %3503 }
 0x63f   : >> { %3509 = vpow2.f32 %v2716_v35  ;;  %v2764_v34 = vadd.f32 %v4841_v29, %v4839_v39 }
 0x640   : >> { %3511 = vpow2.f32 %v2718_v4 }
 0x641   : >> { %v4845_v58 = vpop.eup %3505  ;;  %2765 = vadd.xlane.f32.xlu0 %v2764_v34 }
 0x642   : >> { %v4847_v11 = vpop.eup %3507  ;;  %v2631_v48 = vpop.xlane.xlu1 %2630 }
 0x643   : >> { %v2767_v14 = vadd.f32 %v4847_v11, %v4845_v58  ;;  %v2666_v51 = vsub.f32 %v4687_v31, %v2631_v48  ;;  %v2667_v0 = vsub.f32 %v4689_v37, %v2631_v48 }
 0x645   : >> { %2768 = vadd.xlane.f32.xlu1 %v2767_v14  ;;  %v2720_v55 = vmul.f32 1.442695, %v2666_v51  ;;  %v2722_v30 = vmul.f32 1.442695, %v2667_v0 }
 0x647   : >> { %3513 = vpow2.f32 %v2720_v55 }
 0x648   : >> { %3515 = vpow2.f32 %v2722_v30 }
 0x649   : >> { %v4853_v33 = vpop.eup %3509 }
 0x64a   : >> { %v4855_v45 = vpop.eup %3511  ;;  %v2634_v56 = vpop.xlane.xlu0 %2633 }
 0x64b   : >> { %v2668_v27 = vsub.f32 %v4705_v20, %v2634_v56  ;;  %v2669_v1 = vsub.f32 %v4707_v59, %v2634_v56  ;;  %v2770_v57 = vadd.f32 %v4855_v45, %v4853_v33 }
 0x64d   : >> { %v2724_v31 = vmul.f32 1.442695, %v2668_v27  ;;  %v2726_v22 = vmul.f32 1.442695, %v2669_v1  ;;  %2771 = vadd.xlane.f32.xlu0 %v2770_v57 }
 0x64f   : >> { %3517 = vpow2.f32 %v2724_v31 }
 0x650   : >> { %3519 = vpow2.f32 %v2726_v22 }
 0x651   : >> { %v4861_v37 = vpop.eup %3513 }
 0x652   : >> { %v4863_v40 = vpop.eup %3515  ;;  %v2637_v26 = vpop.xlane.xlu1 %2636 }
 0x653   : >> { %v2670_v49 = vsub.f32 %v4731_v54, %v2637_v26  ;;  %v2671_v36 = vsub.f32 %v4733_v53, %v2637_v26  ;;  %v2773_v20 = vadd.f32 %v4863_v40, %v4861_v37 }
 0x655   : >> { %v2728_v59 = vmul.f32 1.442695, %v2670_v49  ;;  %v2730_v63 = vmul.f32 1.442695, %v2671_v36  ;;  %2774 = vadd.xlane.f32.xlu1 %v2773_v20 }
 0x657   : >> { %3521 = vpow2.f32 %v2728_v59 }
 0x658   : >> { %3523 = vpow2.f32 %v2730_v63 }
 0x659   : >> { %v4869_v15 = vpop.eup %3517 }
 0x65a   : >> { %v4871_v25 = vpop.eup %3519  ;;  %v2640_v62 = vpop.xlane.xlu0 %2639 }
 0x65b   : >> { %v2672_v17 = vsub.f32 %v4747_v12, %v2640_v62  ;;  %v2673_v19 = vsub.f32 %v4749_v5, %v2640_v62  ;;  %v2776_v54 = vadd.f32 %v4871_v25, %v4869_v15 }
 0x65d   : >> { %v2732_v53 = vmul.f32 1.442695, %v2672_v17  ;;  %v2734_v47 = vmul.f32 1.442695, %v2673_v19  ;;  %2777 = vadd.xlane.f32.xlu0 %v2776_v54 }
 0x65f   : >> { %3525 = vpow2.f32 %v2732_v53 }
 0x660   : >> { %3527 = vpow2.f32 %v2734_v47 }
 0x661   : >> { %v4877_v10 = vpop.eup %3521 }
 0x662   : >> { %v4879_v61 = vpop.eup %3523  ;;  %v2643_v42 = vpop.xlane.xlu1 %2642 }
 0x663   : >> { %v2674_v2 = vsub.f32 %v4763_v43, %v2643_v42  ;;  %v2675_v16 = vsub.f32 %v4765_v7, %v2643_v42  ;;  %v2779_v12 = vadd.f32 %v4879_v61, %v4877_v10 }
 0x665   : >> { %v2736_v5 = vmul.f32 1.442695, %v2674_v2  ;;  %v2738_v13 = vmul.f32 1.442695, %v2675_v16  ;;  %2780 = vadd.xlane.f32.xlu1 %v2779_v12 }
 0x667   : >> { %3529 = vpow2.f32 %v2736_v5 }
 0x668   : >> { %3531 = vpow2.f32 %v2738_v13 }
 0x669   : >> { %v4885_v23 = vpop.eup %3525 }
 0x66a   : >> { %v4887_v35 = vpop.eup %3527 }
 0x66b   : >> { %v2782_v4 = vadd.f32 %v4887_v35, %v4885_v23 }
 0x66d   : >> { %2783 = vadd.xlane.f32.xlu0 %v2782_v4 }
 0x671   : >> { %v4891_v34 = vpop.eup %3529 }
 0x672   : >> { %v4893_v43 = vpop.eup %3531 }
 0x673   : >> { %v2785_v7 = vadd.f32 %v4893_v43, %v4891_v34 }
 0x675   : >> { %2786 = vadd.xlane.f32.xlu1 %v2785_v7 }
 0x68e   : >> { %v2742_v48 = vpop.xlane.xlu0 %2741 }
 0x68f   : >> { %3533 = vrcp.f32 %v2742_v48 }
 0x696   : >> { %v2745_v14 = vpop.xlane.xlu1 %2744 }
 0x697   : >> { %3535 = vrcp.f32 %v2745_v14 }
 0x699   : >> { %v3534_v51 = vpop.eup %3533 }
 0x69a   : >> { %v2805_v30 = vmul.f32 %v3534_v51, %v4775_v21  ;;  %v2804_v27 = vmul.f32 %v3534_v51, %v4773_v50 }
 0x69e   : >> { %v2748_v55 = vpop.xlane.xlu0 %2747 }
 0x69f   : >> { %3537 = vrcp.f32 %v2748_v55 }
 0x6a1   : >> { %v3536_v0 = vpop.eup %3535 }
 0x6a2   : >> { %v2807_v56 = vmul.f32 %v3536_v0, %v4783_v6  ;;  %v2806_v1 = vmul.f32 %v3536_v0, %v4781_v24 }
 0x6a4   : >> { %v3295_v57 = vpack.c.bf16 %v2807_v56, %v2805_v30  ;;  %v3297_v31 = vpack.c.bf16 %v2806_v1, %v2804_v27 }
 0x6a6   : >> { %v2751_v22 = vpop.xlane.xlu1 %2750  ;;  %3296 = vmatprep.subr.bf16.mxu0 %v3295_v57 }
 0x6a7   : >> { %3539 = vrcp.f32 %v2751_v22  ;;  %3298 = vmatpush1.bf16.msra.mxu0 %v3297_v31 }
 0x6a9   : >> { %v3538_v26 = vpop.eup %3537 }
 0x6aa   : >> { %v2809_v20 = vmul.f32 %v3538_v26, %v4791_v52  ;;  %v2808_v6 = vmul.f32 %v3538_v26, %v4789_v46 }
 0x6ae   : >> { %v2754_v36 = vpop.xlane.xlu0 %2753 }
 0x6af   : >> { %3541 = vrcp.f32 %v2754_v36 }
 0x6b1   : >> { %v3540_v49 = vpop.eup %3539 }
 0x6b2   : >> { %v2811_v21 = vmul.f32 %v3540_v49, %v4799_v38  ;;  %v2810_v50 = vmul.f32 %v3540_v49, %v4797_v41 }
 0x6b4   : >> { %v3299_v59 = vpack.c.bf16 %v2811_v21, %v2809_v20  ;;  %v3301_v24 = vpack.c.bf16 %v2810_v50, %v2808_v6 }
 0x6b6   : >> { %v2757_v63 = vpop.xlane.xlu1 %2756  ;;  %3300 = vmatprep.subr.bf16.mxu0 %v3299_v59 }
 0x6b7   : >> { %3543 = vrcp.f32 %v2757_v63  ;;  %3302 = vmatpush1.bf16.msra.mxu0 %v3301_v24  ;;  %v2838_v24 = vld [vmem:[%s2837_s29] sm:$0xff]  ;;  %s3580_s29 = scalar_lea.vmem (%p1469_p12), %s3579_s28, 256 }
 0x6b8   : >> { %v2839_v63 = vld [vmem:[#allocation5] sm:$0xff]  ;;  %p3582_p3 = scmp.lt.s32.totalorder (%p1469_p12), %s3580_s29, %s3574_s24 }
 0x6b9   : >> { %v3542_v62 = vpop.eup %3541 }
 0x6ba   : >> { %v2813_v54 = vmul.f32 %v3542_v62, %v4807_v44  ;;  %v2812_v38 = vmul.f32 %v3542_v62, %v4805_v60  ;;  %v2840_v62 = vld [vmem:[#allocation5 + $0x8] sm:$0xff]  ;;  %p3583_p4 = por (%p1469_p12), %p3582_p3, %p3581_p2 }
 0x6bc   : > { %p3584_p7 = pnand (%p1469_p12), %p3583_p4, %p3577_p1 }
 0x6be   : >> { %v2760_v19 = vpop.xlane.xlu0 %2759 }
 0x6bf   : >> { %3545 = vrcp.f32 %v2760_v19 }
 0x6c1   : >> { %v3544_v17 = vpop.eup %3543 }
 0x6c2   : >> { %v2815_v52 = vmul.f32 %v3544_v17, %v4815_v3  ;;  %v2814_v46 = vmul.f32 %v3544_v17, %v4813_v28 }
 0x6c4   : >> { %v3303_v41 = vpack.c.bf16 %v2815_v52, %v2813_v54  ;;  %v3305_v53 = vpack.c.bf16 %v2814_v46, %v2812_v38  ;;  %v5193_v38 = vmov (%p1469_p12), 0   ;;  %v2919_v46 = vld [vmem:[%s5030_s7] sm:$0xff] (%p1469_p12) }
 0x6c5   : > { %3565 = vset.pattern.permute.xlu0 (%p1469_p12), %v5193_v38 }
 0x6c6   : >> { %3304 = vmatprep.subr.bf16.mxu0 %v3303_v41  ;;  %2922 = vperm.xlu0 (%p1469_p12), %3565, %v2919_v46  }
 0x6c7   : >> { %v2763_v47 = vpop.xlane.xlu1 %2762  ;;  %3306 = vmatpush1.bf16.msra.mxu0 %v3305_v53 }
 0x6c8   : >> { %3547 = vrcp.f32 %v2763_v47 }
 0x6c9   : >> { %v3546_v2 = vpop.eup %3545 }
 0x6ca   : >> { %v2817_v44 = vmul.f32 %v3546_v2, %v4823_v32  ;;  %v2816_v60 = vmul.f32 %v3546_v2, %v4821_v9 }
 0x6ce   : >> { %v2766_v42 = vpop.xlane.xlu0 %2765 }
 0x6cf   : >> { %3549 = vrcp.f32 %v2766_v42 }
 0x6d2   : >> { %v3548_v16 = vpop.eup %3547  ;;  %v2769_v12 = vpop.xlane.xlu1 %2768 }
 0x6d3   : >> { %3551 = vrcp.f32 %v2769_v12  ;;  %v2819_v3 = vmul.f32 %v3548_v16, %v4833_v8  ;;  %v2818_v28 = vmul.f32 %v3548_v16, %v4831_v18 }
 0x6d5   : >> { %v3307_v5 = vpack.c.bf16 %v2819_v3, %v2817_v44  ;;  %v3309_v13 = vpack.c.bf16 %v2818_v28, %v2816_v60 }
 0x6d7   : >> { %3308 = vmatprep.subr.bf16.mxu0 %v3307_v5 }
 0x6d8   : >> { %3310 = vmatpush1.bf16.msra.mxu0 %v3309_v13 }
 0x6d9   : >> { %v3550_v4 = vpop.eup %3549 }
 0x6da   : >> { %v2821_v48 = vmul.f32 %v3550_v4, %v4841_v29  ;;  %v2820_v51 = vmul.f32 %v3550_v4, %v4839_v39  ;;  %v2772_v0 = vpop.xlane.xlu0 %2771 }
 0x6db   : >> { %3553 = vrcp.f32 %v2772_v0 }
 0x6dd   : >> { %v3552_v7 = vpop.eup %3551 }
 0x6de   : >> { %v2823_v14 = vmul.f32 %v3552_v7, %v4847_v11  ;;  %v2822_v32 = vmul.f32 %v3552_v7, %v4845_v58 }
 0x6e0   : >> { %v3311_v8 = vpack.c.bf16 %v2823_v14, %v2821_v48  ;;  %v3313_v55 = vpack.c.bf16 %v2822_v32, %v2820_v51  ;;  %v3014_v48 = vld [vmem:[%s3839_s26] sm:$0xff] (%p1469_p12) }
 0x6e1   : > { %v3021_v14 = vld [vmem:[%s3834_s22] sm:$0xff] (%p1469_p12)  ;;  %s3027_s22 = scalar_lea.sflag (%p1469_p12), [#allocation11], %s3793_s21 }
 0x6e2   : >> { %3312 = vmatprep.subr.bf16.mxu0 %v3311_v8  ;;  %v2775_v9 = vpop.xlane.xlu1 %2774 }
 0x6e3   : >> { %3314 = vmatpush1.bf16.msra.mxu0 %v3313_v55  ;;  %3555 = vrcp.f32 %v2775_v9 }
 0x6e5   : >> { %v3554_v18 = vpop.eup %3553 }
 0x6e6   : >> { %v2825_v27 = vmul.f32 %v3554_v18, %v4855_v45  ;;  %v2824_v11 = vmul.f32 %v3554_v18, %v4853_v33 }
 0x6ea   : >> { %v2778_v56 = vpop.xlane.xlu0 %2777 }
 0x6eb   : >> { %3557 = vrcp.f32 %v2778_v56 }
 0x6ed   : >> { %v3556_v30 = vpop.eup %3555 }
 0x6ee   : >> { %v2827_v29 = vmul.f32 %v3556_v30, %v4863_v40  ;;  %v2826_v39 = vmul.f32 %v3556_v30, %v4861_v37 }
 0x6f0   : >> { %v3315_v58 = vpack.c.bf16 %v2827_v29, %v2825_v27  ;;  %v3317_v1 = vpack.c.bf16 %v2826_v39, %v2824_v11 }
 0x6f2   : >> { %v2781_v57 = vpop.xlane.xlu1 %2780  ;;  %3316 = vmatprep.subr.bf16.mxu0 %v3315_v58 }
 0x6f3   : >> { %3559 = vrcp.f32 %v2781_v57  ;;  %3318 = vmatpush1.bf16.msra.mxu0 %v3317_v1 }
 0x6f5   : >> { %v3558_v31 = vpop.eup %3557 }
 0x6f6   : >> { %v2829_v49 = vmul.f32 %v3558_v31, %v4871_v25  ;;  %v2828_v40 = vmul.f32 %v3558_v31, %v4869_v15 }
 0x6fa   : >> { %v2784_v26 = vpop.xlane.xlu0 %2783 }
 0x6fb   : >> { %3561 = vrcp.f32 %v2784_v26 }
 0x6fd   : >> { %v3560_v22 = vpop.eup %3559 }
 0x6fe   : >> { %v2831_v45 = vmul.f32 %v3560_v22, %v4879_v61  ;;  %v2830_v33 = vmul.f32 %v3560_v22, %v4877_v10 }
 0x700   : >> { %v3319_v37 = vpack.c.bf16 %v2831_v45, %v2829_v49  ;;  %v3321_v36 = vpack.c.bf16 %v2830_v33, %v2828_v40 }
 0x702   : >> { %v2787_v20 = vpop.xlane.xlu1 %2786  ;;  %3320 = vmatprep.subr.bf16.mxu0 %v3319_v37 }
 0x703   : >> { %3563 = vrcp.f32 %v2787_v20  ;;  %3322 = vmatpush1.bf16.msra.mxu0 %v3321_v36 }
 0x705   : >> { %v3562_v21 = vpop.eup %3561 }
 0x706   : >> { %v2833_v50 = vmul.f32 %v3562_v21, %v4887_v35  ;;  %v2832_v61 = vmul.f32 %v3562_v21, %v4885_v23 }
 0x70d   : >> { %v3564_v6 = vpop.eup %3563 }
 0x70e   : >> { %v2835_v25 = vmul.f32 %v3564_v6, %v4893_v43  ;;  %v2834_v15 = vmul.f32 %v3564_v6, %v4891_v34  ;;  %v5192_v34 = vmov (%p1469_p12), 0.0   ;;  %v2918_v43 = vld [vmem:[%s5029_s6] sm:$0xff] (%p1469_p12) }
 0x710   : >> { %v3323_v59 = vpack.c.bf16 %v2835_v25, %v2833_v50  ;;  %v3325_v10 = vpack.c.bf16 %v2834_v15, %v2832_v61 }
 0x712   : >> { %3324 = vmatprep.subr.bf16.mxu0 %v3323_v59 }
 0x713   : >> { %3326 = vmatpush1.bf16.msra.mxu0 %v3325_v10 }
 0x716   : >> { %2906 = vmatmul.mubr.f32.vlgmr.msra.gmra.mrb[32].mxu0 %v2838_v24 }
 0x717   : > { %2993 = vmatprep.mubr.f32.mxu0 (%p1469_p12), %v5192_v34 }
 0x745   : > { %v2923_v41 = vpop.permute.xlu0 (%p1469_p12), %2922 }
 0x7e7   : > { %1471 = sbr.rel (!%p1469_p12) target bundleno = 795 (0x31b), region = 137 }
 0x7e9   : >> { %v2907_v17 = vpop.f32.mrb[32].mxu0 }
 0x7ea   : >> { %v2912_v19 = vadd.f32 %v2907_v17, %v2839_v63  ;;  %v2909_v54 = vpop.f32.mrb[33].mxu0 }
 0x7eb   : >> { %v2913_v52 = vadd.f32 %v2909_v54, %v2840_v62 }
 0x7ec   : >> { %2914 = vst [vmem:[#allocation5] sm:$0xff] %v2912_v19 }
 0x7ed   : >> { %2915 = vst [vmem:[#allocation5 + $0x8] sm:$0xff] %v2913_v52 }
 0x7f3   : > { %v2916_v35 = vld [vmem:[#allocation5] sm:$0xff] }
 0x7f4   : > { %v2917_v23 = vld [vmem:[#allocation5 + $0x8] sm:$0xff] }
 0x7f5   : > { %2929 = vmatprep.subr.mxu0 %v2917_v23 }
 0x7f6   : > { %2930 = vmatpush1.msra.mxu0 %v2916_v35 }
 0x7f7   : > { %3280 = vmatmul.mubr.msk.f32.vlgmr.msra.gmra.mrb[0].mxu0 %vm2925_vm3, %v2918_v43 }
 0x8ca   : > { %v2995_v53 = vpop.f32.mrb[0].mxu0 }
 0x8cb   : > { %v2996_v47 = vadd.f32 %v2995_v53, %v2923_v41  ;;  %v2997_v42 = vpop.f32.mrb[1].mxu0 }
 0x8cc   : > { %v2998_v2 = vadd.f32 %v2997_v42, %v2923_v41 }
 0x8cd   : > { %v3281_v16 = vmul.f32 -1.442695, %v2996_v47 }
 0x8ce   : > { %v3282_v12 = vmul.f32 -1.442695, %v2998_v2 }
 0x8cf   : > { %3566 = vpow2.f32 %v3281_v16 }
 0x8d0   : > { %3568 = vpow2.f32 %v3282_v12 }
 0x8d9   : > { %v3567_v44 = vpop.eup %3566 }
 0x8da   : > { %v3569_v3 = vpop.eup %3568  ;;  %v3006_v60 = vadd.f32 1.0, %v3567_v44 }
 0x8db   : > { %v3007_v28 = vadd.f32 1.0, %v3569_v3 }
 0x8dc   : > { %3570 = vrcp.f32 %v3006_v60 }
 0x8dd   : > { %3572 = vrcp.f32 %v3007_v28 }
 0x8e6   : > { %v3571_v5 = vpop.eup %3570 }
 0x8e7   : > { %v3573_v13 = vpop.eup %3572  ;;  %v3012_v4 = vmul.f32 %v3571_v5, %v2916_v35 }
 0x8e8   : > { %v3013_v7 = vmul.f32 %v3573_v13, %v2917_v23 }
 0x8ea   : > { %v3017_v51 = vcombine.low %v3012_v4, %v3013_v7  ;;  %v3022_v32 = vcombine.high %v3012_v4, %v3013_v7 }
 0x8ec   : > { %v3019_v0 = vadd.f32 %v3017_v51, %v3014_v48  ;;  %v3024_v8 = vadd.f32 %v3022_v32, %v3021_v14 }
 0x8ee   : > { %3020 = vst [vmem:[%s3902_s23] sm:$0xff] %v3019_v0  ;;  %3025 = vst [vmem:[%s3906_s25] sm:$0xff] %v3024_v8 }
 0x8ef   : > { %3587 = shalt.err (!%p3584_p7)
}
 0x8f0   : > { %s3588_s23 = scalar_lea.hbm %s4949_s14, 128  ;;  %s3592_s13 = scalar_lea.hbm %s5031_s8, 256 }
 0x8f1   : > { %p3589_p8 = scmp.ne.s32.totalorder %s4949_s14, %s3588_s23  ;;  %p3593_p11 = scmp.lt.u32.totalorder %s4949_s14, %s5031_s8 }
 0x8f2   : > { %p3594_p12 = scmp.lt.u32.totalorder %s3592_s13, %s3588_s23  ;;  %p3596_p0 = scmp.lt.u32.totalorder %s3588_s23, %s4949_s14 }
 0x8f3   : > { %p3590_p9 = pnand %p3589_p8, %p3782_p5 }
 0x8f4   : > { %p3595_p13 = por %p3594_p12, %p3593_p11 }
 0x8f5   : > { %p3591_p10 = pneg %p3590_p9 }
 0x8f6   : > { %p3597_p1 = por %p3596_p0, %p3595_p13 }
 0x8f8   : > { %p3598_p2 = pnand %p3597_p1, %p3591_p10 }
 0x8fa   : > { %3601 = shalt.err (!%p3598_p2)
}
 0x8fb   : > { %3327 = dma.vmem_to_hbm [thread:$0]  (%p3782_p5), %s4951_s18, 128, %s4949_s14, %s3027_s22  }
 0x8fc   : > { %s3032_s24 = scalar_lea.sflag [#allocation13], %s3793_s21  ;;  %s3602_s28 = scalar_lea.vmem %s4958_s27, 128 }
 0x8fd   : > { %p3603_p3 = scmp.ne.s32.totalorder %s4958_s27, %s3602_s28  ;;  %s3693_s29 = smov [#allocation12]  }
 0x8fe   : > { %s3606_s23 = sshll.u32 %s3693_s29, 4  ;;  %s3607_s23 = int_to_ptr.vmem [resolvable:$false] %s3606_s23 }
 0x8ff   : > { %p3604_p4 = pnand %p3603_p3, %p3782_p5  ;;  %s3608_s25 = scalar_lea.vmem %s3607_s23, 256 }
 0x900   : > { %p3609_p8 = scmp.lt.s32.totalorder %s4958_s27, %s3607_s23  ;;  %p3610_p9 = scmp.lt.s32.totalorder %s3608_s25, %s3602_s28 }
 0x901   : > { %p3605_p7 = pneg %p3604_p4 }
 0x902   : > { %p3611_p10 = por %p3610_p9, %p3609_p8 }
 0x904   : > { %p3612_p11 = pnand %p3611_p10, %p3605_p7 }
 0x906   : > { %3615 = shalt.err (!%p3612_p11)
}
 0x907   : > { %s3616_s21 = scalar_lea.hbm %s4956_s17, 128  ;;  %s3620_s22 = scalar_lea.hbm %s5032_s9, 256 }
 0x908   : > { %p3617_p12 = scmp.ne.s32.totalorder %s4956_s17, %s3616_s21  ;;  %p3621_p1 = scmp.lt.u32.totalorder %s4956_s17, %s5032_s9 }
 0x909   : > { %p3622_p2 = scmp.lt.u32.totalorder %s3620_s22, %s3616_s21  ;;  %p3624_p4 = scmp.lt.u32.totalorder %s3616_s21, %s4956_s17 }
 0x90a   : > { %p3618_p13 = pnand %p3617_p12, %p3782_p5 }
 0x90b   : > { %p3623_p3 = por %p3622_p2, %p3621_p1 }
 0x90c   : > { %p3619_p0 = pneg %p3618_p13 }
 0x90d   : > { %p3625_p7 = por %p3624_p4, %p3623_p3 }
 0x90f   : > { %p3626_p8 = pnand %p3625_p7, %p3619_p0 }
 0x911   : > { %3629 = shalt.err (!%p3626_p8)
}
 0x912   : > { %3328 = dma.vmem_to_hbm [thread:$0]  (%p3782_p5), %s4958_s27, 128, %s4956_s17, %s3032_s24  }
 0x913 PF: > { %p3338_p9 = scmp.ge.s32.totalorder %s3676_s12, 2  ;;  %s3072_s26 = sand.u32 1, %s3664_s30  }
 0x914   : > { %s3073_s11 = scalar_lea.sflag [#allocation11], %s3072_s26 }
 0x915   : > { %p3332_p10 = pnand %p3338_p9, %p3786_p6 }
 0x917   : > { %3655 = dma.done.wait (!%p3332_p10), %s3073_s11, 128  }
 0x918   : > { %3657 = vsyncadd (!%p3332_p10), %s3073_s11, 4294967168  ;;  %s3082_s28 = scalar_lea.sflag [#allocation13], %s3072_s26 }
 0x919   : > { %3659 = dma.done.wait (!%p3332_p10), %s3082_s28, 128  }
 0x91a   : > { %3661 = vsyncadd (!%p3332_p10), %s3082_s28, 4294967168  ;;  %s5194_s19 = sld [smem:[#allocation16_spill]]  ;;  %s5195_s11 = sld [smem:[#allocation17_spill]] }
 0x91b   : > { %p23_p5 = scmp.ge.s32.totalorder %s3769_s15, 4   ;;  %s5196_s30 = smov %s3668_s10 }
 0x91c   : > { %s5198_s12 = smov %s3769_s15 }
 0x91d   :  { %25 = sbr.rel (!%p23_p5) target bundleno = 5 (0x5), region = 148 }
 0x920   : > { %s5197_s10 = smov %s5194_s19 }
 0x924   :  { %3087 = vsyncpa [#allocation11], 1 }
 0x925   :  { %3089 = vsyncpa [#allocation11 + $0x1], 1 }
 0x926   :  { %3090 = vsyncpa [#allocation13], 1 }
 0x927   :  { %3092 = vsyncpa [#allocation13 + $0x1], 1 }

</bundles_post_ra>
